<compile_context>
chip_gen: v7x
topology: tpu7x:2x2x1
jax: 0.10.0
libtpu: 0.0.40
codegen_flags: <defaults>
</compile_context>

<pallas_src>
import functools

import jax
import jax.numpy as jnp
from jax import lax
from jax.experimental import pallas as pl
from jax.experimental.pallas import tpu as pltpu


def _is_v5e():
    try:
        kind = jax.devices()[0].device_kind.lower()
    except Exception:
        return False
    return ("v5e" in kind) or ("v5 lite" in kind) or ("v5lite" in kind)


def _pick_cout_tile(cout):
    """MXU-native output-channel tile: 128 on v5e (4x128^2 MXU), 256 on v6e/v7x."""
    prefer = (128, 256) if _is_v5e() else (256, 128)
    for t in prefer:
        if cout % t == 0:
            return t
    return cout


def _conv3x3_kernel(x_ref, w_ref, b_ref, *rest, H, W, Cin, Cout_t,
                    in_relu, use_bn, use_res, out_relu, emit_stats):
    """3x3 stride-1 pad-1 conv (+ fused input-BN/ReLU, residual add, output ReLU,
    optional BN partial statistics of the produced activation).

    x_ref : (1, H, W, Cin)             un-padded input tile (bf16)
    w_ref : (n_ct, 3, 3*Cin, Cout_t)   full conv weight, kx folded into K (bf16)
    b_ref : (n_ct, 1, Cout_t)          full conv bias (f32)
    rest  : [scale, shift] if use_bn, [residual] if use_res,
            out_ref, [sum_ref, sumsq_ref] if emit_stats,
            xcat_ref (H+2, W, 3*Cin) bf16 scratch (persists across Cout steps)
    """
    idx = 0
    if use_bn:
        scale_ref, shift_ref = rest[idx], rest[idx + 1]
        idx += 2
    if use_res:
        res_ref = rest[idx]
        idx += 1
    out_ref = rest[idx]
    idx += 1
    if emit_stats:
        sum_ref, sumsq_ref = rest[idx], rest[idx + 1]
        idx += 2
    xcat_ref = rest[idx]                               # (H+2, W, 3*Cin) bf16 scratch

    c = pl.program_id(1)

    # --- build the zero-padded, kx-folded activation ONCE per batch item ------
    # (Cout axis is "arbitrary", so c == 0 runs first for every batch item and
    #  the scratch is reused for all later Cout tiles of the same item.)
    @pl.when(c == 0)
    def _build_activation():
        xin = x_ref[0].astype(jnp.float32)             # (H, W, Cin)
        if use_bn:
            xin = xin * scale_ref[0][None, None, :] + shift_ref[0][None, None, :]
        if in_relu:
            xin = jnp.maximum(xin, 0.0)
        xb = xin.astype(jnp.bfloat16)                  # cast once; scratch is bf16

        zcol = jnp.zeros((H, 1, Cin), jnp.bfloat16)
        left = jnp.concatenate([zcol, xb[:, :W - 1, :]], axis=1)   # x[:, w-1], zero col 0
        right = jnp.concatenate([xb[:, 1:, :], zcol], axis=1)      # x[:, w+1], zero col W-1
        interior = jnp.concatenate([left, xb, right], axis=-1)     # (H, W, 3*Cin)

        zrow = jnp.zeros((W, 3 * Cin), jnp.bfloat16)
        xcat_ref[0] = zrow                              # top halo row (zero)
        xcat_ref[H + 1] = zrow                          # bottom halo row (zero)
        xcat_ref[1:H + 1] = interior

    # --- 3 bf16 MXU dots with K = 3*Cin, f32 accumulation ---------------------
    w_t = w_ref[c]                                      # (3, 3*Cin, Cout_t) bf16
    acc = jnp.dot(xcat_ref[0:H], w_t[0], preferred_element_type=jnp.float32)
    acc = acc + jnp.dot(xcat_ref[1:H + 1], w_t[1], preferred_element_type=jnp.float32)
    acc = acc + jnp.dot(xcat_ref[2:H + 2], w_t[2], preferred_element_type=jnp.float32)

    y = acc + b_ref[c][None]                            # (H, W, Cout_t) + (1, 1, Cout_t)
    if use_res:
        y = y + res_ref[0].astype(jnp.float32)
    if out_relu:
        y = jnp.maximum(y, 0.0)
    y_out = y.astype(out_ref.dtype)
    out_ref[0] = y_out

    if emit_stats:
        # BN statistics of the value actually stored (bf16-rounded), f32 accumulation.
        yf = y_out.astype(jnp.float32).reshape(H * W, Cout_t)
        sum_ref[0] = jnp.sum(yf, axis=0, keepdims=True)
        sumsq_ref[0] = jnp.sum(yf * yf, axis=0, keepdims=True)


def conv3x3(x_nhwc, w, b, *, scale=None, shift=None, residual=None,
            in_relu=False, out_relu=False, out_dtype=jnp.float32,
            emit_stats=False, cout_tile=None,
            vmem_limit_bytes=48 * 1024 * 1024):
    """3x3, stride 1, pad 1 conv in NHWC. Grid = (batch, Cout tiles)."""
    N, H, W, Cin = x_nhwc.shape
    Cout = w.shape[-1]
    use_bn = scale is not None
    use_res = residual is not None

    tc = cout_tile or _pick_cout_tile(Cout)
    assert Cout % tc == 0
    n_ct = Cout // tc
    K3 = 3 * Cin

    x_bf = x_nhwc.astype(jnp.bfloat16)
    # Fold kx into the contraction dim and tile Cout on a leading (major) axis:
    # (3, 3, Cin, Cout) -> (n_ct, 3, 3*Cin, tc).  Constant index_map => the whole
    # weight is DMA'd once and stays VMEM-resident across all grid steps.
    w_bf = (w.astype(jnp.bfloat16)
             .reshape(3, K3, n_ct, tc)
             .transpose(2, 0, 1, 3))
    b_r = b.astype(jnp.float32).reshape(n_ct, 1, tc)

    # TODO(synk): single-buffer the grid-invariant weight/bias blocks
    # (pipeline_mode=pl.Buffered(1)) once that path is exercised here.
    in_specs = [
        pl.BlockSpec((1, H, W, Cin), lambda n, c: (n, 0, 0, 0)),
        pl.BlockSpec((n_ct, 3, K3, tc), lambda n, c: (0, 0, 0, 0)),
        pl.BlockSpec((n_ct, 1, tc), lambda n, c: (0, 0, 0)),
    ]
    args = [x_bf, w_bf, b_r]
    if use_bn:
        in_specs += [pl.BlockSpec((1, Cin), lambda n, c: (0, 0)),
                     pl.BlockSpec((1, Cin), lambda n, c: (0, 0))]
        args += [scale.reshape(1, Cin).astype(jnp.float32),
                 shift.reshape(1, Cin).astype(jnp.float32)]
    if use_res:
        in_specs.append(pl.BlockSpec((1, H, W, tc), lambda n, c: (n, 0, 0, c)))
        args.append(residual)

    out_shape = [jax.ShapeDtypeStruct((N, H, W, Cout), out_dtype)]
    out_specs = [pl.BlockSpec((1, H, W, tc), lambda n, c: (n, 0, 0, c))]
    if emit_stats:
        out_shape += [jax.ShapeDtypeStruct((N, 1, Cout), jnp.float32)] * 2
        out_specs += [pl.BlockSpec((1, 1, tc), lambda n, c: (n, 0, c))] * 2

    kernel = functools.partial(_conv3x3_kernel, H=H, W=W, Cin=Cin, Cout_t=tc,
                               in_relu=in_relu, use_bn=use_bn, use_res=use_res,
                               out_relu=out_relu, emit_stats=emit_stats)

    return pl.pallas_call(
        kernel,
        out_shape=tuple(out_shape) if emit_stats else out_shape[0],
        grid=(N, n_ct),
        in_specs=in_specs,
        out_specs=tuple(out_specs) if emit_stats else out_specs[0],
        scratch_shapes=[pltpu.VMEM((H + 2, W, K3), jnp.bfloat16)],
        compiler_params=pltpu.CompilerParams(
            # Cout axis MUST be "arbitrary": the xcat scratch is built at c == 0
            # and reused by every later Cout tile of the same batch item.
            dimension_semantics=("parallel", "arbitrary"),
            vmem_limit_bytes=vmem_limit_bytes),
    )(*args)


def init_ftb_params(key, inchannels, midchannels):
    """Deterministic init matching FTB.init_params (conv: N(0, 0.01), bias 0; BN: 1/0)."""
    k1, k2, k3 = jax.random.split(key, 3)
    std = 0.01
    return {
        "w1": std * jax.random.normal(k1, (3, 3, inchannels, midchannels), jnp.float32),
        "b1": jnp.zeros((midchannels,), jnp.float32),
        "w2": std * jax.random.normal(k2, (3, 3, midchannels, midchannels), jnp.float32),
        "b2": jnp.zeros((midchannels,), jnp.float32),
        "w3": std * jax.random.normal(k3, (3, 3, midchannels, midchannels), jnp.float32),
        "b3": jnp.zeros((midchannels,), jnp.float32),
        "bn_gamma": jnp.ones((midchannels,), jnp.float32),
        "bn_beta": jnp.zeros((midchannels,), jnp.float32),
    }


@jax.jit
def ftb_forward(x_nchw, params):
    """FTB.forward. Input/output are NCHW float32 like the PyTorch module."""
    x = jnp.transpose(x_nchw, (0, 2, 3, 1))                       # NCHW -> NHWC
    N, H, W, _ = x.shape

    # conv1 (bf16 intermediate)
    y1 = conv3x3(x, params["w1"], params["b1"], out_dtype=jnp.bfloat16)

    # conv_branch[0:2] : ReLU + conv, with fused BN partial statistics
    y2, s, sq = conv3x3(y1, params["w2"], params["b2"], in_relu=True,
                        out_dtype=jnp.bfloat16, emit_stats=True)

    # conv_branch[2] : BatchNorm2d (training mode -> batch stats, biased variance).
    # TODO(synk): running_mean/running_var momentum buffers are not tracked
    # (they do not affect the forward output).
    eps = 1e-5
    count = float(N * H * W)
    mean = jnp.sum(s, axis=(0, 1)) / count
    var = jnp.sum(sq, axis=(0, 1)) / count - mean * mean
    scale = params["bn_gamma"] * lax.rsqrt(var + eps)
    shift = params["bn_beta"] - mean * scale

    # conv_branch[3:5] : ReLU + conv, then residual add + final ReLU (all fused)
    out = conv3x3(y2, params["w3"], params["b3"], scale=scale, shift=shift,
                  residual=y1, in_relu=True, out_relu=True, out_dtype=jnp.float32)

    return jnp.transpose(out, (0, 3, 1, 2))                       # NHWC -> NCHW


# ---------------- pure-JAX reference (same bf16-MXU / f32-acc recipe) ----------------
def _conv_ref(x, w, b):
    y = lax.conv_general_dilated(
        x.astype(jnp.bfloat16), w.astype(jnp.bfloat16),
        window_strides=(1, 1), padding=((1, 1), (1, 1)),
        dimension_numbers=("NHWC", "HWIO", "NHWC"),
        preferred_element_type=jnp.float32)
    return y + b.astype(jnp.float32)


def ftb_reference(x_nchw, p):
    x = jnp.transpose(x_nchw, (0, 2, 3, 1))
    y1 = _conv_ref(x, p["w1"], p["b1"]).astype(jnp.bfloat16)
    y1f = y1.astype(jnp.float32)
    y2 = _conv_ref(jax.nn.relu(y1f), p["w2"], p["b2"]).astype(jnp.bfloat16)
    y2f = y2.astype(jnp.float32)
    mean = y2f.mean((0, 1, 2))
    var = (y2f * y2f).mean((0, 1, 2)) - mean * mean
    scale = p["bn_gamma"] * lax.rsqrt(var + 1e-5)
    shift = p["bn_beta"] - mean * scale
    z = jax.nn.relu(y2f * scale + shift)
    y3 = _conv_ref(z, p["w3"], p["b3"])
    return jnp.transpose(jax.nn.relu(y1f + y3), (0, 3, 1, 2))


if __name__ == "__main__":
    key = jax.random.PRNGKey(0)
    kx_, kp = jax.random.split(key)

    N, Cin, H, W = 2, 4, 16, 16
    mid = 32                       # small stand-in for the default midchannels=512

    x = jax.random.normal(kx_, (N, Cin, H, W), jnp.float32)
    params = init_ftb_params(kp, Cin, mid)

    out = jax.block_until_ready(ftb_forward(x, params))
    ref = ftb_reference(x, params)

    assert out.shape == (N, mid, H, W)
    max_err = float(jnp.max(jnp.abs(out - ref)))
    assert jnp.allclose(out, ref, atol=3e-3, rtol=2e-2), f"mismatch vs reference (max_err={max_err})"

    print("KERNEL_OK")
</pallas_src>

<mosaic_0001>
module attributes {stable_mosaic.version = 11 : i64} {
  func.func @_conv3x3_kernel(%arg0: i32, %arg1: i32, %arg2: memref<1x16x16x32xbf16, #tpu.memory_space<vmem>>, %arg3: memref<1x3x96x32xbf16, #tpu.memory_space<vmem>>, %arg4: memref<1x1x32xf32, #tpu.memory_space<vmem>>, %arg5: memref<1x16x16x32xbf16, #tpu.memory_space<vmem>>, %arg6: memref<1x1x32xf32, #tpu.memory_space<vmem>>, %arg7: memref<1x1x32xf32, #tpu.memory_space<vmem>>, %arg8: memref<18x16x96xbf16, #tpu.memory_space<vmem>>) attributes {dimension_semantics = [#tpu.dimension_semantics<parallel>, #tpu.dimension_semantics<arbitrary>], iteration_bounds = array<i64: 2, 1>, scalar_prefetch = 0 : i64, scratch_operands = 1 : i64, tpu.core_type = #tpu.core_type<tc>, window_params = [{transform_indices = @transform_0, window_bounds = array<i64: 1, 16, 16, 32>}, {pipeline_mode = #tpu.pipeline_mode<synchronous>, transform_indices = @transform_1, window_bounds = array<i64: 1, 3, 96, 32>}, {pipeline_mode = #tpu.pipeline_mode<synchronous>, transform_indices = @transform_2, window_bounds = array<i64: 1, 1, 32>}, {transform_indices = @transform_3, window_bounds = array<i64: 1, 16, 16, 32>}, {transform_indices = @transform_4, window_bounds = array<i64: 1, 1, 32>}, {transform_indices = @transform_5, window_bounds = array<i64: 1, 1, 32>}]} {
    %c0_i32 = arith.constant 0 : i32
    %0 = arith.cmpi eq, %arg1, %c0_i32 : i32
    %1 = arith.extui %0 : i1 to i32
    %c0_i32_0 = arith.constant 0 : i32
    %2 = arith.cmpi ne, %1, %c0_i32_0 : i32
    scf.if %2 {
      %c0_26 = arith.constant 0 : index
      %c0_27 = arith.constant 0 : index
      %c0_28 = arith.constant 0 : index
      %c0_29 = arith.constant 0 : index
      %43 = vector.load %arg2[%c0_26, %c0_27, %c0_28, %c0_29] : memref<1x16x16x32xbf16, #tpu.memory_space<vmem>>, vector<1x16x16x32xbf16>
      %44 = vector.shape_cast %43 : vector<1x16x16x32xbf16> to vector<16x16x32xbf16>
      %45 = arith.extf %44 : vector<16x16x32xbf16> to vector<16x16x32xf32>
      %cst_30 = arith.constant 0.000000e+00 : f32
      %46 = vector.broadcast %cst_30 : f32 to vector<16x16x32xf32>
      %47 = arith.maximumf %45, %46 : vector<16x16x32xf32>
      %48 = arith.truncf %47 : vector<16x16x32xf32> to vector<16x16x32xbf16>
      %cst_31 = arith.constant 0.000000e+00 : bf16
      %49 = vector.broadcast %cst_31 : bf16 to vector<16x1x32xbf16>
      %50 = vector.extract_strided_slice %48 {offsets = [0, 0, 0], sizes = [16, 15, 32], strides = [1, 1, 1]} : vector<16x16x32xbf16> to vector<16x15x32xbf16>
      %51 = tpu.concatenate %49, %50 in 1 : vector<16x1x32xbf16>, vector<16x15x32xbf16> -> vector<16x16x32xbf16>
      %52 = vector.extract_strided_slice %48 {offsets = [0, 1, 0], sizes = [16, 15, 32], strides = [1, 1, 1]} : vector<16x16x32xbf16> to vector<16x15x32xbf16>
      %53 = tpu.concatenate %52, %49 in 1 : vector<16x15x32xbf16>, vector<16x1x32xbf16> -> vector<16x16x32xbf16>
      %54 = tpu.concatenate %51, %48, %53 in 2 : vector<16x16x32xbf16>, vector<16x16x32xbf16>, vector<16x16x32xbf16> -> vector<16x16x96xbf16>
      %cst_32 = arith.constant 0.000000e+00 : bf16
      %55 = vector.broadcast %cst_32 : bf16 to vector<16x96xbf16>
      %c0_33 = arith.constant 0 : index
      %c0_34 = arith.constant 0 : index
      %c0_35 = arith.constant 0 : index
      %56 = vector.load %arg8[%c0_33, %c0_34, %c0_35] : memref<18x16x96xbf16, #tpu.memory_space<vmem>>, vector<1x16x96xbf16>
      %57 = vector.shape_cast %56 : vector<1x16x96xbf16> to vector<16x96xbf16>
      %58 = vector.shape_cast %55 : vector<16x96xbf16> to vector<1x16x96xbf16>
      tpu.vector_store %arg8[%c0_33, %c0_34, %c0_35], %58 {strides = array<i32>} : memref<18x16x96xbf16, #tpu.memory_space<vmem>>, vector<1x16x96xbf16>,
      %c17 = arith.constant 17 : index
      %c0_36 = arith.constant 0 : index
      %c0_37 = arith.constant 0 : index
      %59 = vector.load %arg8[%c17, %c0_36, %c0_37] : memref<18x16x96xbf16, #tpu.memory_space<vmem>>, vector<1x16x96xbf16>
      %60 = vector.shape_cast %59 : vector<1x16x96xbf16> to vector<16x96xbf16>
      %61 = vector.shape_cast %55 : vector<16x96xbf16> to vector<1x16x96xbf16>
      tpu.vector_store %arg8[%c17, %c0_36, %c0_37], %61 {strides = array<i32>} : memref<18x16x96xbf16, #tpu.memory_space<vmem>>, vector<1x16x96xbf16>,
      %c1_38 = arith.constant 1 : index
      %c0_39 = arith.constant 0 : index
      %c0_40 = arith.constant 0 : index
      %62 = vector.load %arg8[%c1_38, %c0_39, %c0_40] : memref<18x16x96xbf16, #tpu.memory_space<vmem>>, vector<16x16x96xbf16>
      tpu.vector_store %arg8[%c1_38, %c0_39, %c0_40], %54 {strides = array<i32>} : memref<18x16x96xbf16, #tpu.memory_space<vmem>>, vector<16x16x96xbf16>,
    } else {
    }
    %3 = arith.index_cast %arg1 : i32 to index
    %c0 = arith.constant 0 : index
    %c0_1 = arith.constant 0 : index
    %c0_2 = arith.constant 0 : index
    %4 = vector.load %arg3[%3, %c0, %c0_1, %c0_2] : memref<1x3x96x32xbf16, #tpu.memory_space<vmem>>, vector<1x3x96x32xbf16>
    %5 = vector.shape_cast %4 : vector<1x3x96x32xbf16> to vector<3x96x32xbf16>
    %c0_3 = arith.constant 0 : index
    %c0_4 = arith.constant 0 : index
    %c0_5 = arith.constant 0 : index
    %6 = vector.load %arg8[%c0_3, %c0_4, %c0_5] : memref<18x16x96xbf16, #tpu.memory_space<vmem>>, vector<16x16x96xbf16>
    %7 = vector.extract_strided_slice %5 {offsets = [0, 0, 0], sizes = [1, 96, 32], strides = [1, 1, 1]} : vector<3x96x32xbf16> to vector<1x96x32xbf16>
    %8 = vector.shape_cast %7 : vector<1x96x32xbf16> to vector<96x32xbf16>
    %cst = arith.constant dense<0.000000e+00> : vector<16x16x32xf32>
    %9 = tpu.matmul %6, %8, %cst {dimension_numbers = #tpu.dot_dimension_numbers<[2], [0], [0, 1], [1], [0, 0, 0, 1, 1, 1], [], []>} : vector<16x16x96xbf16>, vector<96x32xbf16>, vector<16x16x32xf32> -> vector<16x16x32xf32>
    %c1 = arith.constant 1 : index
    %c0_6 = arith.constant 0 : index
    %c0_7 = arith.constant 0 : index
    %10 = vector.load %arg8[%c1, %c0_6, %c0_7] : memref<18x16x96xbf16, #tpu.memory_space<vmem>>, vector<16x16x96xbf16>
    %11 = vector.extract_strided_slice %5 {offsets = [1, 0, 0], sizes = [1, 96, 32], strides = [1, 1, 1]} : vector<3x96x32xbf16> to vector<1x96x32xbf16>
    %12 = vector.shape_cast %11 : vector<1x96x32xbf16> to vector<96x32xbf16>
    %cst_8 = arith.constant dense<0.000000e+00> : vector<16x16x32xf32>
    %13 = tpu.matmul %10, %12, %cst_8 {dimension_numbers = #tpu.dot_dimension_numbers<[2], [0], [0, 1], [1], [0, 0, 0, 1, 1, 1], [], []>} : vector<16x16x96xbf16>, vector<96x32xbf16>, vector<16x16x32xf32> -> vector<16x16x32xf32>
    %14 = arith.addf %9, %13 : vector<16x16x32xf32>
    %c2 = arith.constant 2 : index
    %c0_9 = arith.constant 0 : index
    %c0_10 = arith.constant 0 : index
    %15 = vector.load %arg8[%c2, %c0_9, %c0_10] : memref<18x16x96xbf16, #tpu.memory_space<vmem>>, vector<16x16x96xbf16>
    %16 = vector.extract_strided_slice %5 {offsets = [2, 0, 0], sizes = [1, 96, 32], strides = [1, 1, 1]} : vector<3x96x32xbf16> to vector<1x96x32xbf16>
    %17 = vector.shape_cast %16 : vector<1x96x32xbf16> to vector<96x32xbf16>
    %cst_11 = arith.constant dense<0.000000e+00> : vector<16x16x32xf32>
    %18 = tpu.matmul %15, %17, %cst_11 {dimension_numbers = #tpu.dot_dimension_numbers<[2], [0], [0, 1], [1], [0, 0, 0, 1, 1, 1], [], []>} : vector<16x16x96xbf16>, vector<96x32xbf16>, vector<16x16x32xf32> -> vector<16x16x32xf32>
    %19 = arith.addf %14, %18 : vector<16x16x32xf32>
    %20 = arith.index_cast %arg1 : i32 to index
    %c0_12 = arith.constant 0 : index
    %c0_13 = arith.constant 0 : index
    %21 = vector.load %arg4[%20, %c0_12, %c0_13] : memref<1x1x32xf32, #tpu.memory_space<vmem>>, vector<1x1x32xf32>
    %22 = vector.shape_cast %21 : vector<1x1x32xf32> to vector<1x32xf32>
    %23 = vector.shape_cast %22 : vector<1x32xf32> to vector<1x1x32xf32>
    %24 = vector.broadcast %23 : vector<1x1x32xf32> to vector<16x16x32xf32>
    %25 = arith.addf %19, %24 : vector<16x16x32xf32>
    %26 = arith.truncf %25 : vector<16x16x32xf32> to vector<16x16x32xbf16>
    %c0_14 = arith.constant 0 : index
    %c0_15 = arith.constant 0 : index
    %c0_16 = arith.constant 0 : index
    %c0_17 = arith.constant 0 : index
    %27 = vector.load %arg5[%c0_14, %c0_15, %c0_16, %c0_17] : memref<1x16x16x32xbf16, #tpu.memory_space<vmem>>, vector<1x16x16x32xbf16>
    %28 = vector.shape_cast %27 : vector<1x16x16x32xbf16> to vector<16x16x32xbf16>
    %29 = vector.shape_cast %26 : vector<16x16x32xbf16> to vector<1x16x16x32xbf16>
    tpu.vector_store %arg5[%c0_14, %c0_15, %c0_16, %c0_17], %29 {strides = array<i32>} : memref<1x16x16x32xbf16, #tpu.memory_space<vmem>>, vector<1x16x16x32xbf16>,
    %30 = arith.extf %26 : vector<16x16x32xbf16> to vector<16x16x32xf32>
    %31 = vector.shape_cast %30 : vector<16x16x32xf32> to vector<256x32xf32>
    %cst_18 = arith.constant dense<0.000000e+00> : vector<32xf32>
    %32 = vector.multi_reduction <add>, %31, %cst_18 [0] : vector<256x32xf32> to vector<32xf32>
    %33 = vector.shape_cast %32 : vector<32xf32> to vector<1x32xf32>
    %c0_19 = arith.constant 0 : index
    %c0_20 = arith.constant 0 : index
    %c0_21 = arith.constant 0 : index
    %34 = vector.load %arg6[%c0_19, %c0_20, %c0_21] : memref<1x1x32xf32, #tpu.memory_space<vmem>>, vector<1x1x32xf32>
    %35 = vector.shape_cast %34 : vector<1x1x32xf32> to vector<1x32xf32>
    %36 = vector.shape_cast %33 : vector<1x32xf32> to vector<1x1x32xf32>
    tpu.vector_store %arg6[%c0_19, %c0_20, %c0_21], %36 {strides = array<i32>} : memref<1x1x32xf32, #tpu.memory_space<vmem>>, vector<1x1x32xf32>,
    %37 = arith.mulf %31, %31 : vector<256x32xf32>
    %cst_22 = arith.constant dense<0.000000e+00> : vector<32xf32>
    %38 = vector.multi_reduction <add>, %37, %cst_22 [0] : vector<256x32xf32> to vector<32xf32>
    %39 = vector.shape_cast %38 : vector<32xf32> to vector<1x32xf32>
    %c0_23 = arith.constant 0 : index
    %c0_24 = arith.constant 0 : index
    %c0_25 = arith.constant 0 : index
    %40 = vector.load %arg7[%c0_23, %c0_24, %c0_25] : memref<1x1x32xf32, #tpu.memory_space<vmem>>, vector<1x1x32xf32>
    %41 = vector.shape_cast %40 : vector<1x1x32xf32> to vector<1x32xf32>
    %42 = vector.shape_cast %39 : vector<1x32xf32> to vector<1x1x32xf32>
    tpu.vector_store %arg7[%c0_23, %c0_24, %c0_25], %42 {strides = array<i32>} : memref<1x1x32xf32, #tpu.memory_space<vmem>>, vector<1x1x32xf32>,
    return
  }
  func.func @transform_0(%arg0: i32, %arg1: i32) -> (i32, i32, i32, i32) {
    %c0_i32 = arith.constant 0 : i32
    %c0_i32_0 = arith.constant 0 : i32
    %c0_i32_1 = arith.constant 0 : i32
    %c0_i32_2 = arith.constant 0 : i32
    return %arg0, %c0_i32, %c0_i32_0, %c0_i32_1 : i32, i32, i32, i32
  }
  func.func @transform_1(%arg0: i32, %arg1: i32) -> (i32, i32, i32, i32) {
    %c0_i32 = arith.constant 0 : i32
    %c0_i32_0 = arith.constant 0 : i32
    %c0_i32_1 = arith.constant 0 : i32
    %c0_i32_2 = arith.constant 0 : i32
    %c0_i32_3 = arith.constant 0 : i32
    return %c0_i32, %c0_i32_0, %c0_i32_1, %c0_i32_2 : i32, i32, i32, i32
  }
  func.func @transform_2(%arg0: i32, %arg1: i32) -> (i32, i32, i32) {
    %c0_i32 = arith.constant 0 : i32
    %c0_i32_0 = arith.constant 0 : i32
    %c0_i32_1 = arith.constant 0 : i32
    %c0_i32_2 = arith.constant 0 : i32
    return %c0_i32, %c0_i32_0, %c0_i32_1 : i32, i32, i32
  }
  func.func @transform_3(%arg0: i32, %arg1: i32) -> (i32, i32, i32, i32) {
    %c0_i32 = arith.constant 0 : i32
    %c0_i32_0 = arith.constant 0 : i32
    %c0_i32_1 = arith.constant 0 : i32
    return %arg0, %c0_i32, %c0_i32_0, %arg1 : i32, i32, i32, i32
  }
  func.func @transform_4(%arg0: i32, %arg1: i32) -> (i32, i32, i32) {
    %c0_i32 = arith.constant 0 : i32
    %c0_i32_0 = arith.constant 0 : i32
    return %arg0, %c0_i32, %arg1 : i32, i32, i32
  }
  func.func @transform_5(%arg0: i32, %arg1: i32) -> (i32, i32, i32) {
    %c0_i32 = arith.constant 0 : i32
    %c0_i32_0 = arith.constant 0 : i32
    return %arg0, %c0_i32, %arg1 : i32, i32, i32
  }
}

module attributes {stable_mosaic.version = 11 : i64} {
  func.func @_conv3x3_kernel(%arg0: i32, %arg1: i32, %arg2: memref<1x16x16x4xbf16, #tpu.memory_space<vmem>>, %arg3: memref<1x3x12x32xbf16, #tpu.memory_space<vmem>>, %arg4: memref<1x1x32xf32, #tpu.memory_space<vmem>>, %arg5: memref<1x16x16x32xbf16, #tpu.memory_space<vmem>>, %arg6: memref<18x16x12xbf16, #tpu.memory_space<vmem>>) attributes {dimension_semantics = [#tpu.dimension_semantics<parallel>, #tpu.dimension_semantics<arbitrary>], iteration_bounds = array<i64: 2, 1>, scalar_prefetch = 0 : i64, scratch_operands = 1 : i64, tpu.core_type = #tpu.core_type<tc>, window_params = [{transform_indices = @transform_0, window_bounds = array<i64: 1, 16, 16, 4>}, {pipeline_mode = #tpu.pipeline_mode<synchronous>, transform_indices = @transform_1, window_bounds = array<i64: 1, 3, 12, 32>}, {pipeline_mode = #tpu.pipeline_mode<synchronous>, transform_indices = @transform_2, window_bounds = array<i64: 1, 1, 32>}, {transform_indices = @transform_3, window_bounds = array<i64: 1, 16, 16, 32>}]} {
    %c0_i32 = arith.constant 0 : i32
    %0 = arith.cmpi eq, %arg1, %c0_i32 : i32
    %1 = arith.extui %0 : i1 to i32
    %c0_i32_0 = arith.constant 0 : i32
    %2 = arith.cmpi ne, %1, %c0_i32_0 : i32
    scf.if %2 {
      %c0_18 = arith.constant 0 : index
      %c0_19 = arith.constant 0 : index
      %c0_20 = arith.constant 0 : index
      %c0_21 = arith.constant 0 : index
      %30 = vector.load %arg2[%c0_18, %c0_19, %c0_20, %c0_21] : memref<1x16x16x4xbf16, #tpu.memory_space<vmem>>, vector<1x16x16x4xbf16>
      %31 = vector.shape_cast %30 : vector<1x16x16x4xbf16> to vector<16x16x4xbf16>
      %32 = arith.extf %31 : vector<16x16x4xbf16> to vector<16x16x4xf32>
      %33 = arith.truncf %32 : vector<16x16x4xf32> to vector<16x16x4xbf16>
      %cst_22 = arith.constant 0.000000e+00 : bf16
      %34 = vector.broadcast %cst_22 : bf16 to vector<16x1x4xbf16>
      %35 = vector.extract_strided_slice %33 {offsets = [0, 0, 0], sizes = [16, 15, 4], strides = [1, 1, 1]} : vector<16x16x4xbf16> to vector<16x15x4xbf16>
      %36 = tpu.concatenate %34, %35 in 1 : vector<16x1x4xbf16>, vector<16x15x4xbf16> -> vector<16x16x4xbf16>
      %37 = vector.extract_strided_slice %33 {offsets = [0, 1, 0], sizes = [16, 15, 4], strides = [1, 1, 1]} : vector<16x16x4xbf16> to vector<16x15x4xbf16>
      %38 = tpu.concatenate %37, %34 in 1 : vector<16x15x4xbf16>, vector<16x1x4xbf16> -> vector<16x16x4xbf16>
      %39 = tpu.concatenate %36, %33, %38 in 2 : vector<16x16x4xbf16>, vector<16x16x4xbf16>, vector<16x16x4xbf16> -> vector<16x16x12xbf16>
      %cst_23 = arith.constant 0.000000e+00 : bf16
      %40 = vector.broadcast %cst_23 : bf16 to vector<16x12xbf16>
      %c0_24 = arith.constant 0 : index
      %c0_25 = arith.constant 0 : index
      %c0_26 = arith.constant 0 : index
      %41 = vector.load %arg6[%c0_24, %c0_25, %c0_26] : memref<18x16x12xbf16, #tpu.memory_space<vmem>>, vector<1x16x12xbf16>
      %42 = vector.shape_cast %41 : vector<1x16x12xbf16> to vector<16x12xbf16>
      %43 = vector.shape_cast %40 : vector<16x12xbf16> to vector<1x16x12xbf16>
      tpu.vector_store %arg6[%c0_24, %c0_25, %c0_26], %43 {strides = array<i32>} : memref<18x16x12xbf16, #tpu.memory_space<vmem>>, vector<1x16x12xbf16>,
      %c17 = arith.constant 17 : index
      %c0_27 = arith.constant 0 : index
      %c0_28 = arith.constant 0 : index
      %44 = vector.load %arg6[%c17, %c0_27, %c0_28] : memref<18x16x12xbf16, #tpu.memory_space<vmem>>, vector<1x16x12xbf16>
      %45 = vector.shape_cast %44 : vector<1x16x12xbf16> to vector<16x12xbf16>
      %46 = vector.shape_cast %40 : vector<16x12xbf16> to vector<1x16x12xbf16>
      tpu.vector_store %arg6[%c17, %c0_27, %c0_28], %46 {strides = array<i32>} : memref<18x16x12xbf16, #tpu.memory_space<vmem>>, vector<1x16x12xbf16>,
      %c1_29 = arith.constant 1 : index
      %c0_30 = arith.constant 0 : index
      %c0_31 = arith.constant 0 : index
      %47 = vector.load %arg6[%c1_29, %c0_30, %c0_31] : memref<18x16x12xbf16, #tpu.memory_space<vmem>>, vector<16x16x12xbf16>
      tpu.vector_store %arg6[%c1_29, %c0_30, %c0_31], %39 {strides = array<i32>} : memref<18x16x12xbf16, #tpu.memory_space<vmem>>, vector<16x16x12xbf16>,
    } else {
    }
    %3 = arith.index_cast %arg1 : i32 to index
    %c0 = arith.constant 0 : index
    %c0_1 = arith.constant 0 : index
    %c0_2 = arith.constant 0 : index
    %4 = vector.load %arg3[%3, %c0, %c0_1, %c0_2] : memref<1x3x12x32xbf16, #tpu.memory_space<vmem>>, vector<1x3x12x32xbf16>
    %5 = vector.shape_cast %4 : vector<1x3x12x32xbf16> to vector<3x12x32xbf16>
    %c0_3 = arith.constant 0 : index
    %c0_4 = arith.constant 0 : index
    %c0_5 = arith.constant 0 : index
    %6 = vector.load %arg6[%c0_3, %c0_4, %c0_5] : memref<18x16x12xbf16, #tpu.memory_space<vmem>>, vector<16x16x12xbf16>
    %7 = vector.extract_strided_slice %5 {offsets = [0, 0, 0], sizes = [1, 12, 32], strides = [1, 1, 1]} : vector<3x12x32xbf16> to vector<1x12x32xbf16>
    %8 = vector.shape_cast %7 : vector<1x12x32xbf16> to vector<12x32xbf16>
    %cst = arith.constant dense<0.000000e+00> : vector<16x16x32xf32>
    %9 = tpu.matmul %6, %8, %cst {dimension_numbers = #tpu.dot_dimension_numbers<[2], [0], [0, 1], [1], [0, 0, 0, 1, 1, 1], [], []>} : vector<16x16x12xbf16>, vector<12x32xbf16>, vector<16x16x32xf32> -> vector<16x16x32xf32>
    %c1 = arith.constant 1 : index
    %c0_6 = arith.constant 0 : index
    %c0_7 = arith.constant 0 : index
    %10 = vector.load %arg6[%c1, %c0_6, %c0_7] : memref<18x16x12xbf16, #tpu.memory_space<vmem>>, vector<16x16x12xbf16>
    %11 = vector.extract_strided_slice %5 {offsets = [1, 0, 0], sizes = [1, 12, 32], strides = [1, 1, 1]} : vector<3x12x32xbf16> to vector<1x12x32xbf16>
    %12 = vector.shape_cast %11 : vector<1x12x32xbf16> to vector<12x32xbf16>
    %cst_8 = arith.constant dense<0.000000e+00> : vector<16x16x32xf32>
    %13 = tpu.matmul %10, %12, %cst_8 {dimension_numbers = #tpu.dot_dimension_numbers<[2], [0], [0, 1], [1], [0, 0, 0, 1, 1, 1], [], []>} : vector<16x16x12xbf16>, vector<12x32xbf16>, vector<16x16x32xf32> -> vector<16x16x32xf32>
    %14 = arith.addf %9, %13 : vector<16x16x32xf32>
    %c2 = arith.constant 2 : index
    %c0_9 = arith.constant 0 : index
    %c0_10 = arith.constant 0 : index
    %15 = vector.load %arg6[%c2, %c0_9, %c0_10] : memref<18x16x12xbf16, #tpu.memory_space<vmem>>, vector<16x16x12xbf16>
    %16 = vector.extract_strided_slice %5 {offsets = [2, 0, 0], sizes = [1, 12, 32], strides = [1, 1, 1]} : vector<3x12x32xbf16> to vector<1x12x32xbf16>
    %17 = vector.shape_cast %16 : vector<1x12x32xbf16> to vector<12x32xbf16>
    %cst_11 = arith.constant dense<0.000000e+00> : vector<16x16x32xf32>
    %18 = tpu.matmul %15, %17, %cst_11 {dimension_numbers = #tpu.dot_dimension_numbers<[2], [0], [0, 1], [1], [0, 0, 0, 1, 1, 1], [], []>} : vector<16x16x12xbf16>, vector<12x32xbf16>, vector<16x16x32xf32> -> vector<16x16x32xf32>
    %19 = arith.addf %14, %18 : vector<16x16x32xf32>
    %20 = arith.index_cast %arg1 : i32 to index
    %c0_12 = arith.constant 0 : index
    %c0_13 = arith.constant 0 : index
    %21 = vector.load %arg4[%20, %c0_12, %c0_13] : memref<1x1x32xf32, #tpu.memory_space<vmem>>, vector<1x1x32xf32>
    %22 = vector.shape_cast %21 : vector<1x1x32xf32> to vector<1x32xf32>
    %23 = vector.shape_cast %22 : vector<1x32xf32> to vector<1x1x32xf32>
    %24 = vector.broadcast %23 : vector<1x1x32xf32> to vector<16x16x32xf32>
    %25 = arith.addf %19, %24 : vector<16x16x32xf32>
    %26 = arith.truncf %25 : vector<16x16x32xf32> to vector<16x16x32xbf16>
    %c0_14 = arith.constant 0 : index
    %c0_15 = arith.constant 0 : index
    %c0_16 = arith.constant 0 : index
    %c0_17 = arith.constant 0 : index
    %27 = vector.load %arg5[%c0_14, %c0_15, %c0_16, %c0_17] : memref<1x16x16x32xbf16, #tpu.memory_space<vmem>>, vector<1x16x16x32xbf16>
    %28 = vector.shape_cast %27 : vector<1x16x16x32xbf16> to vector<16x16x32xbf16>
    %29 = vector.shape_cast %26 : vector<16x16x32xbf16> to vector<1x16x16x32xbf16>
    tpu.vector_store %arg5[%c0_14, %c0_15, %c0_16, %c0_17], %29 {strides = array<i32>} : memref<1x16x16x32xbf16, #tpu.memory_space<vmem>>, vector<1x16x16x32xbf16>,
    return
  }
  func.func @transform_0(%arg0: i32, %arg1: i32) -> (i32, i32, i32, i32) {
    %c0_i32 = arith.constant 0 : i32
    %c0_i32_0 = arith.constant 0 : i32
    %c0_i32_1 = arith.constant 0 : i32
    %c0_i32_2 = arith.constant 0 : i32
    return %arg0, %c0_i32, %c0_i32_0, %c0_i32_1 : i32, i32, i32, i32
  }
  func.func @transform_1(%arg0: i32, %arg1: i32) -> (i32, i32, i32, i32) {
    %c0_i32 = arith.constant 0 : i32
    %c0_i32_0 = arith.constant 0 : i32
    %c0_i32_1 = arith.constant 0 : i32
    %c0_i32_2 = arith.constant 0 : i32
    %c0_i32_3 = arith.constant 0 : i32
    return %c0_i32, %c0_i32_0, %c0_i32_1, %c0_i32_2 : i32, i32, i32, i32
  }
  func.func @transform_2(%arg0: i32, %arg1: i32) -> (i32, i32, i32) {
    %c0_i32 = arith.constant 0 : i32
    %c0_i32_0 = arith.constant 0 : i32
    %c0_i32_1 = arith.constant 0 : i32
    %c0_i32_2 = arith.constant 0 : i32
    return %c0_i32, %c0_i32_0, %c0_i32_1 : i32, i32, i32
  }
  func.func @transform_3(%arg0: i32, %arg1: i32) -> (i32, i32, i32, i32) {
    %c0_i32 = arith.constant 0 : i32
    %c0_i32_0 = arith.constant 0 : i32
    %c0_i32_1 = arith.constant 0 : i32
    return %arg0, %c0_i32, %c0_i32_0, %arg1 : i32, i32, i32, i32
  }
}

module attributes {stable_mosaic.version = 11 : i64} {
  func.func @_conv3x3_kernel(%arg0: i32, %arg1: i32, %arg2: memref<1x16x16x32xbf16, #tpu.memory_space<vmem>>, %arg3: memref<1x3x96x32xbf16, #tpu.memory_space<vmem>>, %arg4: memref<1x1x32xf32, #tpu.memory_space<vmem>>, %arg5: memref<1x32xf32, #tpu.memory_space<vmem>>, %arg6: memref<1x32xf32, #tpu.memory_space<vmem>>, %arg7: memref<1x16x16x32xbf16, #tpu.memory_space<vmem>>, %arg8: memref<1x16x16x32xf32, #tpu.memory_space<vmem>>, %arg9: memref<18x16x96xbf16, #tpu.memory_space<vmem>>) attributes {dimension_semantics = [#tpu.dimension_semantics<parallel>, #tpu.dimension_semantics<arbitrary>], iteration_bounds = array<i64: 2, 1>, scalar_prefetch = 0 : i64, scratch_operands = 1 : i64, tpu.core_type = #tpu.core_type<tc>, window_params = [{transform_indices = @transform_0, window_bounds = array<i64: 1, 16, 16, 32>}, {pipeline_mode = #tpu.pipeline_mode<synchronous>, transform_indices = @transform_1, window_bounds = array<i64: 1, 3, 96, 32>}, {pipeline_mode = #tpu.pipeline_mode<synchronous>, transform_indices = @transform_2, window_bounds = array<i64: 1, 1, 32>}, {pipeline_mode = #tpu.pipeline_mode<synchronous>, transform_indices = @transform_3, window_bounds = array<i64: 1, 32>}, {pipeline_mode = #tpu.pipeline_mode<synchronous>, transform_indices = @transform_4, window_bounds = array<i64: 1, 32>}, {transform_indices = @transform_5, window_bounds = array<i64: 1, 16, 16, 32>}, {transform_indices = @transform_6, window_bounds = array<i64: 1, 16, 16, 32>}]} {
    %c0_i32 = arith.constant 0 : i32
    %0 = arith.cmpi eq, %arg1, %c0_i32 : i32
    %1 = arith.extui %0 : i1 to i32
    %c0_i32_0 = arith.constant 0 : i32
    %2 = arith.cmpi ne, %1, %c0_i32_0 : i32
    scf.if %2 {
      %c0_23 = arith.constant 0 : index
      %c0_24 = arith.constant 0 : index
      %c0_25 = arith.constant 0 : index
      %c0_26 = arith.constant 0 : index
      %35 = vector.load %arg2[%c0_23, %c0_24, %c0_25, %c0_26] : memref<1x16x16x32xbf16, #tpu.memory_space<vmem>>, vector<1x16x16x32xbf16>
      %36 = vector.shape_cast %35 : vector<1x16x16x32xbf16> to vector<16x16x32xbf16>
      %37 = arith.extf %36 : vector<16x16x32xbf16> to vector<16x16x32xf32>
      %c0_27 = arith.constant 0 : index
      %c0_28 = arith.constant 0 : index
      %38 = vector.load %arg5[%c0_27, %c0_28] : memref<1x32xf32, #tpu.memory_space<vmem>>, vector<1x32xf32>
      %39 = vector.shape_cast %38 : vector<1x32xf32> to vector<32xf32>
      %40 = vector.shape_cast %39 : vector<32xf32> to vector<1x1x32xf32>
      %41 = vector.broadcast %40 : vector<1x1x32xf32> to vector<16x16x32xf32>
      %42 = arith.mulf %37, %41 : vector<16x16x32xf32>
      %c0_29 = arith.constant 0 : index
      %c0_30 = arith.constant 0 : index
      %43 = vector.load %arg6[%c0_29, %c0_30] : memref<1x32xf32, #tpu.memory_space<vmem>>, vector<1x32xf32>
      %44 = vector.shape_cast %43 : vector<1x32xf32> to vector<32xf32>
      %45 = vector.shape_cast %44 : vector<32xf32> to vector<1x1x32xf32>
      %46 = vector.broadcast %45 : vector<1x1x32xf32> to vector<16x16x32xf32>
      %47 = arith.addf %42, %46 : vector<16x16x32xf32>
      %cst_31 = arith.constant 0.000000e+00 : f32
      %48 = vector.broadcast %cst_31 : f32 to vector<16x16x32xf32>
      %49 = arith.maximumf %47, %48 : vector<16x16x32xf32>
      %50 = arith.truncf %49 : vector<16x16x32xf32> to vector<16x16x32xbf16>
      %cst_32 = arith.constant 0.000000e+00 : bf16
      %51 = vector.broadcast %cst_32 : bf16 to vector<16x1x32xbf16>
      %52 = vector.extract_strided_slice %50 {offsets = [0, 0, 0], sizes = [16, 15, 32], strides = [1, 1, 1]} : vector<16x16x32xbf16> to vector<16x15x32xbf16>
      %53 = tpu.concatenate %51, %52 in 1 : vector<16x1x32xbf16>, vector<16x15x32xbf16> -> vector<16x16x32xbf16>
      %54 = vector.extract_strided_slice %50 {offsets = [0, 1, 0], sizes = [16, 15, 32], strides = [1, 1, 1]} : vector<16x16x32xbf16> to vector<16x15x32xbf16>
      %55 = tpu.concatenate %54, %51 in 1 : vector<16x15x32xbf16>, vector<16x1x32xbf16> -> vector<16x16x32xbf16>
      %56 = tpu.concatenate %53, %50, %55 in 2 : vector<16x16x32xbf16>, vector<16x16x32xbf16>, vector<16x16x32xbf16> -> vector<16x16x96xbf16>
      %cst_33 = arith.constant 0.000000e+00 : bf16
      %57 = vector.broadcast %cst_33 : bf16 to vector<16x96xbf16>
      %c0_34 = arith.constant 0 : index
      %c0_35 = arith.constant 0 : index
      %c0_36 = arith.constant 0 : index
      %58 = vector.load %arg9[%c0_34, %c0_35, %c0_36] : memref<18x16x96xbf16, #tpu.memory_space<vmem>>, vector<1x16x96xbf16>
      %59 = vector.shape_cast %58 : vector<1x16x96xbf16> to vector<16x96xbf16>
      %60 = vector.shape_cast %57 : vector<16x96xbf16> to vector<1x16x96xbf16>
      tpu.vector_store %arg9[%c0_34, %c0_35, %c0_36], %60 {strides = array<i32>} : memref<18x16x96xbf16, #tpu.memory_space<vmem>>, vector<1x16x96xbf16>,
      %c17 = arith.constant 17 : index
      %c0_37 = arith.constant 0 : index
      %c0_38 = arith.constant 0 : index
      %61 = vector.load %arg9[%c17, %c0_37, %c0_38] : memref<18x16x96xbf16, #tpu.memory_space<vmem>>, vector<1x16x96xbf16>
      %62 = vector.shape_cast %61 : vector<1x16x96xbf16> to vector<16x96xbf16>
      %63 = vector.shape_cast %57 : vector<16x96xbf16> to vector<1x16x96xbf16>
      tpu.vector_store %arg9[%c17, %c0_37, %c0_38], %63 {strides = array<i32>} : memref<18x16x96xbf16, #tpu.memory_space<vmem>>, vector<1x16x96xbf16>,
      %c1_39 = arith.constant 1 : index
      %c0_40 = arith.constant 0 : index
      %c0_41 = arith.constant 0 : index
      %64 = vector.load %arg9[%c1_39, %c0_40, %c0_41] : memref<18x16x96xbf16, #tpu.memory_space<vmem>>, vector<16x16x96xbf16>
      tpu.vector_store %arg9[%c1_39, %c0_40, %c0_41], %56 {strides = array<i32>} : memref<18x16x96xbf16, #tpu.memory_space<vmem>>, vector<16x16x96xbf16>,
    } else {
    }
    %3 = arith.index_cast %arg1 : i32 to index
    %c0 = arith.constant 0 : index
    %c0_1 = arith.constant 0 : index
    %c0_2 = arith.constant 0 : index
    %4 = vector.load %arg3[%3, %c0, %c0_1, %c0_2] : memref<1x3x96x32xbf16, #tpu.memory_space<vmem>>, vector<1x3x96x32xbf16>
    %5 = vector.shape_cast %4 : vector<1x3x96x32xbf16> to vector<3x96x32xbf16>
    %c0_3 = arith.constant 0 : index
    %c0_4 = arith.constant 0 : index
    %c0_5 = arith.constant 0 : index
    %6 = vector.load %arg9[%c0_3, %c0_4, %c0_5] : memref<18x16x96xbf16, #tpu.memory_space<vmem>>, vector<16x16x96xbf16>
    %7 = vector.extract_strided_slice %5 {offsets = [0, 0, 0], sizes = [1, 96, 32], strides = [1, 1, 1]} : vector<3x96x32xbf16> to vector<1x96x32xbf16>
    %8 = vector.shape_cast %7 : vector<1x96x32xbf16> to vector<96x32xbf16>
    %cst = arith.constant dense<0.000000e+00> : vector<16x16x32xf32>
    %9 = tpu.matmul %6, %8, %cst {dimension_numbers = #tpu.dot_dimension_numbers<[2], [0], [0, 1], [1], [0, 0, 0, 1, 1, 1], [], []>} : vector<16x16x96xbf16>, vector<96x32xbf16>, vector<16x16x32xf32> -> vector<16x16x32xf32>
    %c1 = arith.constant 1 : index
    %c0_6 = arith.constant 0 : index
    %c0_7 = arith.constant 0 : index
    %10 = vector.load %arg9[%c1, %c0_6, %c0_7] : memref<18x16x96xbf16, #tpu.memory_space<vmem>>, vector<16x16x96xbf16>
    %11 = vector.extract_strided_slice %5 {offsets = [1, 0, 0], sizes = [1, 96, 32], strides = [1, 1, 1]} : vector<3x96x32xbf16> to vector<1x96x32xbf16>
    %12 = vector.shape_cast %11 : vector<1x96x32xbf16> to vector<96x32xbf16>
    %cst_8 = arith.constant dense<0.000000e+00> : vector<16x16x32xf32>
    %13 = tpu.matmul %10, %12, %cst_8 {dimension_numbers = #tpu.dot_dimension_numbers<[2], [0], [0, 1], [1], [0, 0, 0, 1, 1, 1], [], []>} : vector<16x16x96xbf16>, vector<96x32xbf16>, vector<16x16x32xf32> -> vector<16x16x32xf32>
    %14 = arith.addf %9, %13 : vector<16x16x32xf32>
    %c2 = arith.constant 2 : index
    %c0_9 = arith.constant 0 : index
    %c0_10 = arith.constant 0 : index
    %15 = vector.load %arg9[%c2, %c0_9, %c0_10] : memref<18x16x96xbf16, #tpu.memory_space<vmem>>, vector<16x16x96xbf16>
    %16 = vector.extract_strided_slice %5 {offsets = [2, 0, 0], sizes = [1, 96, 32], strides = [1, 1, 1]} : vector<3x96x32xbf16> to vector<1x96x32xbf16>
    %17 = vector.shape_cast %16 : vector<1x96x32xbf16> to vector<96x32xbf16>
    %cst_11 = arith.constant dense<0.000000e+00> : vector<16x16x32xf32>
    %18 = tpu.matmul %15, %17, %cst_11 {dimension_numbers = #tpu.dot_dimension_numbers<[2], [0], [0, 1], [1], [0, 0, 0, 1, 1, 1], [], []>} : vector<16x16x96xbf16>, vector<96x32xbf16>, vector<16x16x32xf32> -> vector<16x16x32xf32>
    %19 = arith.addf %14, %18 : vector<16x16x32xf32>
    %20 = arith.index_cast %arg1 : i32 to index
    %c0_12 = arith.constant 0 : index
    %c0_13 = arith.constant 0 : index
    %21 = vector.load %arg4[%20, %c0_12, %c0_13] : memref<1x1x32xf32, #tpu.memory_space<vmem>>, vector<1x1x32xf32>
    %22 = vector.shape_cast %21 : vector<1x1x32xf32> to vector<1x32xf32>
    %23 = vector.shape_cast %22 : vector<1x32xf32> to vector<1x1x32xf32>
    %24 = vector.broadcast %23 : vector<1x1x32xf32> to vector<16x16x32xf32>
    %25 = arith.addf %19, %24 : vector<16x16x32xf32>
    %c0_14 = arith.constant 0 : index
    %c0_15 = arith.constant 0 : index
    %c0_16 = arith.constant 0 : index
    %c0_17 = arith.constant 0 : index
    %26 = vector.load %arg7[%c0_14, %c0_15, %c0_16, %c0_17] : memref<1x16x16x32xbf16, #tpu.memory_space<vmem>>, vector<1x16x16x32xbf16>
    %27 = vector.shape_cast %26 : vector<1x16x16x32xbf16> to vector<16x16x32xbf16>
    %28 = arith.extf %27 : vector<16x16x32xbf16> to vector<16x16x32xf32>
    %29 = arith.addf %25, %28 : vector<16x16x32xf32>
    %cst_18 = arith.constant 0.000000e+00 : f32
    %30 = vector.broadcast %cst_18 : f32 to vector<16x16x32xf32>
    %31 = arith.maximumf %29, %30 : vector<16x16x32xf32>
    %c0_19 = arith.constant 0 : index
    %c0_20 = arith.constant 0 : index
    %c0_21 = arith.constant 0 : index
    %c0_22 = arith.constant 0 : index
    %32 = vector.load %arg8[%c0_19, %c0_20, %c0_21, %c0_22] : memref<1x16x16x32xf32, #tpu.memory_space<vmem>>, vector<1x16x16x32xf32>
    %33 = vector.shape_cast %32 : vector<1x16x16x32xf32> to vector<16x16x32xf32>
    %34 = vector.shape_cast %31 : vector<16x16x32xf32> to vector<1x16x16x32xf32>
    tpu.vector_store %arg8[%c0_19, %c0_20, %c0_21, %c0_22], %34 {strides = array<i32>} : memref<1x16x16x32xf32, #tpu.memory_space<vmem>>, vector<1x16x16x32xf32>,
    return
  }
  func.func @transform_0(%arg0: i32, %arg1: i32) -> (i32, i32, i32, i32) {
    %c0_i32 = arith.constant 0 : i32
    %c0_i32_0 = arith.constant 0 : i32
    %c0_i32_1 = arith.constant 0 : i32
    %c0_i32_2 = arith.constant 0 : i32
    return %arg0, %c0_i32, %c0_i32_0, %c0_i32_1 : i32, i32, i32, i32
  }
  func.func @transform_1(%arg0: i32, %arg1: i32) -> (i32, i32, i32, i32) {
    %c0_i32 = arith.constant 0 : i32
    %c0_i32_0 = arith.constant 0 : i32
    %c0_i32_1 = arith.constant 0 : i32
    %c0_i32_2 = arith.constant 0 : i32
    %c0_i32_3 = arith.constant 0 : i32
    return %c0_i32, %c0_i32_0, %c0_i32_1, %c0_i32_2 : i32, i32, i32, i32
  }
  func.func @transform_2(%arg0: i32, %arg1: i32) -> (i32, i32, i32) {
    %c0_i32 = arith.constant 0 : i32
    %c0_i32_0 = arith.constant 0 : i32
    %c0_i32_1 = arith.constant 0 : i32
    %c0_i32_2 = arith.constant 0 : i32
    return %c0_i32, %c0_i32_0, %c0_i32_1 : i32, i32, i32
  }
  func.func @transform_3(%arg0: i32, %arg1: i32) -> (i32, i32) {
    %c0_i32 = arith.constant 0 : i32
    %c0_i32_0 = arith.constant 0 : i32
    %c0_i32_1 = arith.constant 0 : i32
    return %c0_i32, %c0_i32_0 : i32, i32
  }
  func.func @transform_4(%arg0: i32, %arg1: i32) -> (i32, i32) {
    %c0_i32 = arith.constant 0 : i32
    %c0_i32_0 = arith.constant 0 : i32
    %c0_i32_1 = arith.constant 0 : i32
    return %c0_i32, %c0_i32_0 : i32, i32
  }
  func.func @transform_5(%arg0: i32, %arg1: i32) -> (i32, i32, i32, i32) {
    %c0_i32 = arith.constant 0 : i32
    %c0_i32_0 = arith.constant 0 : i32
    %c0_i32_1 = arith.constant 0 : i32
    return %arg0, %c0_i32, %c0_i32_0, %arg1 : i32, i32, i32, i32
  }
  func.func @transform_6(%arg0: i32, %arg1: i32) -> (i32, i32, i32, i32) {
    %c0_i32 = arith.constant 0 : i32
    %c0_i32_0 = arith.constant 0 : i32
    %c0_i32_1 = arith.constant 0 : i32
    return %arg0, %c0_i32, %c0_i32_0, %arg1 : i32, i32, i32, i32
  }
}

</mosaic_0001>

<bundles_post_ra>
// kernel: ftb_forward.5
= control target key start
LH: loop header
LB: loop body
LE: loop exit
PB: predicated region body
PF: predicated region fallthrough
CT: control target
= control target key end

     0   :  { %11 = vsyncpa [#allocation4], 0  ;;  %s3719_s0 = inlined_call_operand.vmem [shape: bf16[2,16,16,32], index: 0, kind: input, shape index: {}]   ;;  %s3720_s1 = inlined_call_operand.vmem [shape: bf16[1,3,96,32], index: 1, kind: input, shape index: {}]   ;;  %s3721_s2 = inlined_call_operand.vmem [shape: f32[1,1,32], index: 2, kind: input, shape index: {}]   ;;  %s3722_s3 = inlined_call_operand.vmem [shape: f32[1,32], index: 3, kind: input, shape index: {}]   ;;  %s3723_s4 = inlined_call_operand.vmem [shape: f32[1,32], index: 4, kind: input, shape index: {}]   ;;  %s3724_s5 = inlined_call_operand.vmem [shape: bf16[2,16,16,32], index: 5, kind: input, shape index: {}]   ;;  %s3725_s6 = inlined_call_operand.hbm [shape: f32[2,16,16,32], index: 6, kind: output, shape index: {}]  }
   0x1   :  { %13 = vsyncpa [#allocation4 + $0x1], 0  ;;  %s2803_s21 = smov 0   ;;  %s2805_s22 = smov 0  }
   0x2   :  { %s2807_s23 = smov 0   ;;  %s2809_s24 = smov 0  }
   0x3   :  { %s2811_s25 = smov 0   ;;  %s2813_s26 = smov 0  }
   0x4 LB: > { %s2085_s27 = sadd.s32 4294967295, %s2760_s26   ;;  %s2086_s28 = sadd.s32 4294967294, %s2760_s26   ;;  %s2760_s26 = sphi %s2813_s26, %s19_s26   ;;  %s2756_s25 = sphi %s2811_s25, %s3742_s25   ;;  %s2752_s24 = sphi %s2809_s24, %s3741_s24   ;;  %s2748_s23 = sphi %s2807_s23, %s3740_s23   ;;  %s2744_s22 = sphi %s2805_s22, %s3739_s22   ;;  %s2740_s21 = sphi %s2803_s21, %s3738_s21  }
   0x5   : > { %s31_s29 = sadd.s32 1, %s2756_s25  ;;  %s178_s30 = sadd.s32 1, %s2748_s23 }
   0x6   : > { %p33_p0 = scmp.ge.s32.totalorder %s31_s29, 2  ;;  %p188_p1 = scmp.ne.s32.totalorder %s2748_s23, %s2744_s22 }
   0x7   : > { %p189_p2 = scmp.eq.s32.totalorder %s2085_s27, 1  ;;  %p194_p3 = scmp.ne.s32.totalorder %s2744_s22, %s2740_s21 }
   0x8   : > { %s3744_s29 = smov (%p33_p0, %s31_s29), 0  ;;  %p195_p5 = scmp.eq.s32.totalorder %s2086_s28, 1 }
   0x9   : > { %p2843_p4 = por %p189_p2, %p188_p1  ;;  %s173_s8 = ssub.s32 %s2756_s25, %s3744_s29 }
   0xa   : > { %p2089_p6 = scmp.ge.s32.totalorder %s2760_s26, 1  ;;  %p176_p7 = scmp.eq.s32.totalorder %s173_s8, 0 }
   0xb   : > { %p2850_p8 = por %p195_p5, %p194_p3  ;;  %p244_p9 = scmp.lt.s32.totalorder %s2760_s26, 3 }
   0xc   : > { %s2856_s10 = scalar_select %p176_p7, %s2748_s23, %s178_s30  }
   0xd   : > { %p245_p10 = pnand %p2089_p6, %p244_p9 }
   0xe   : > { %p282_p11 = scmp.lt.s32.totalorder (!%p245_p10), %s2752_s24, 1  ;;  %v2865_v0 = vld [vmem:[%s3720_s1] sm:$0xff] (!%p245_p10)   ;;  %v2665_v1 = vld [vmem:[%s3720_s1 + $0x30] sm:$0xff] (!%p245_p10)   ;;  %v2880_v3 = vld [vmem:[%s3720_s1 + $0x8] sm:$0xff] (!%p245_p10)   ;;  %vm686_vm0 = vsmask.f32 (!%p245_p10), 7424 }
   0xf   : > { %248 = sbr.rel (%p245_p10) target bundleno = 498 (0x1f2), region = 44  ;;  %v2874_v2 = vld [vmem:[%s3722_s3] ss:$0 sm:$0xff] (!%p245_p10)  ;;  %2440 = vmatprep.subr.bf16.mxu0 (!%p245_p10), %v2865_v0  ;;  %2396 = vmatprep.subr.bf16.mxu1 (!%p245_p10), %v2665_v1  ;;  %v2667_v4 = vld [vmem:[%s3720_s1 + $0x38] sm:$0xff] (!%p245_p10)   ;;  %v2927_v36 = vld [vmem:[%s3720_s1 + $0x10] sm:$0xff] (!%p245_p10)   ;;  %vm685_vm1 = vcmask (!%p245_p10), 1047552  }
  0x10   : > { %2441 = vmatpush3.bf16.msra.mxu0 (!%p245_p10), %v2865_v0  ;;  %2397 = vmatpush3.bf16.msra.mxu1 (!%p245_p10), %v2665_v1  ;;  %v2901_v13 = vld [vmem:[%s3723_s4] ss:$0 sm:$0xff] (!%p245_p10)  ;;  %v2936_v46 = vld [vmem:[%s3720_s1 + $0x18] sm:$0xff] (!%p245_p10)   ;;  %v2671_v54 = vld [vmem:[%s3720_s1 + $0x48] sm:$0xff] (!%p245_p10)   ;;  %s2762_s12 = smov (!%p245_p10), 32   ;;  %s2763_s28 = smov (!%p245_p10), 64  }
  0x11   : > { %2442 = vmatprep.subr.bf16.mxu0 (!%p245_p10), %v2880_v3  ;;  %2398 = vmatprep.subr.bf16.mxu1 (!%p245_p10), %v2667_v4  ;;  %v2669_v45 = vld [vmem:[%s3720_s1 + $0x40] sm:$0xff] (!%p245_p10)   ;;  %v2673_v1 = vld [vmem:[%s3720_s1 + $0x50] sm:$0xff] (!%p245_p10)   ;;  %vm2974_vm2 = vmand (!%p245_p10), %vm685_vm1, %vm686_vm0  ;;  %vm898_vm3 = vcmask (!%p245_p10), 785408   ;;  %vm618_vm4 = vcmask (!%p245_p10), 1040384   ;;  %vm619_vm5 = vsmask.f32 (!%p245_p10), 256 }
  0x12   : > { %v2965_v63 = vld [vmem:[%s3720_s1 + $0x20] sm:$0xff] (!%p245_p10)   ;;  %vm3311_vm6 = vmand (!%p245_p10), %vm618_vm4, %vm619_vm5  ;;  %vm800_vm7 = vcmask (!%p245_p10), 261120   ;;  %vm849_vm8 = vcmask (!%p245_p10), 523264   ;;  %s2171_s17 = sshll.u32 (!%p245_p10), %s2752_s24, 12  ;;  %s2765_s8 = smov (!%p245_p10), [#allocation3]  }
  0x13   : > { %s3661_s27 = scalar_lea.hbm (!%p245_p10), %s3725_s6, %s2171_s17  ;;  %s2686_s13 = sshll.u32 (!%p245_p10), %s2765_s8, 4  ;;  %s2687_s13 = int_to_ptr.vmem [resolvable:$false] %s2686_s13 }
  0x14   : > { %2443 = vmatpush3.bf16.msra.mxu0 (!%p245_p10), %v2880_v3  ;;  %2399 = vmatpush3.bf16.msra.mxu1 (!%p245_p10), %v2667_v4 }
  0x15   : > { %2444 = vmatprep.subr.bf16.mxu0 (!%p245_p10), %v2927_v36  ;;  %2400 = vmatprep.subr.bf16.mxu1 (!%p245_p10), %v2669_v45 }
  0x16   : > { %s2860_s11 = scalar_select %p282_p11, %s2752_s24, 1 }
  0x18   : > { %s2169_s16 = sshll.u32 %s2860_s11, 7  ;;  %2445 = vmatpush3.bf16.msra.mxu0 %v2927_v36  ;;  %2401 = vmatpush3.bf16.msra.mxu1 %v2669_v45 }
  0x19   : > { %s2887_s30 = scalar_lea.vmem %s3719_s0, %s2169_s16  ;;  %2446 = vmatprep.subr.bf16.mxu0 %v2936_v46  ;;  %2402 = vmatprep.subr.bf16.mxu1 %v2671_v54 }
  0x1a   : > { %v2173_v5 = vld [vmem:[%s2887_s30] sm:$0xff]   ;;  %v2300_v6 = vld [vmem:[%s2887_s30 + $0x8] sm:$0xff]   ;;  %v2301_v7 = vld [vmem:[%s2887_s30 + $0x10] sm:$0xff]  }
  0x1b   : > { %v2174_v8 = vunpack.c.l.bf16 %v2173_v5  ;;  %v2175_v9 = vunpack.c.h.bf16 %v2173_v5  ;;  %v2178_v10 = vunpack.c.l.bf16 %v2300_v6  ;;  %v2179_v11 = vunpack.c.h.bf16 %v2300_v6  ;;  %v2302_v12 = vld [vmem:[%s2887_s30 + $0x18] sm:$0xff]   ;;  %v2303_v30 = vld [vmem:[%s2887_s30 + $0x20] sm:$0xff]   ;;  %v2922_v35 = vld [vmem:[%s2887_s30 + $0x28] sm:$0xff]  }
  0x1c   : > { %v2182_v14 = vunpack.c.l.bf16 %v2301_v7  ;;  %v2183_v15 = vunpack.c.h.bf16 %v2301_v7  ;;  %v2186_v16 = vunpack.c.l.bf16 %v2302_v12  ;;  %v2187_v17 = vunpack.c.h.bf16 %v2302_v12  ;;  %2447 = vmatpush3.bf16.msra.mxu0 %v2936_v46  ;;  %v2306_v12 = vld [vmem:[%s2887_s30 + $0x38] sm:$0xff]   ;;  %2403 = vmatpush3.bf16.msra.mxu1 %v2671_v54 }
  0x1d   : > { %v371_v18 = vmul.f32 %v2174_v8, %v2874_v2  ;;  %v372_v19 = vmul.f32 %v2175_v9, %v2874_v2  ;;  %v373_v20 = vmul.f32 %v2178_v10, %v2874_v2  ;;  %v374_v21 = vmul.f32 %v2179_v11, %v2874_v2  ;;  %v2305_v11 = vld [vmem:[%s2887_s30 + $0x30] sm:$0xff]   ;;  %2448 = vmatprep.subr.bf16.mxu0 %v2965_v63 }
  0x1e   : > { %v375_v22 = vmul.f32 %v2182_v14, %v2874_v2  ;;  %v376_v23 = vmul.f32 %v2183_v15, %v2874_v2  ;;  %v377_v24 = vmul.f32 %v2186_v16, %v2874_v2  ;;  %v378_v25 = vmul.f32 %v2187_v17, %v2874_v2  ;;  %v2999_v17 = vld [vmem:[%s3720_s1 + $0x28] sm:$0xff]   ;;  %2404 = vmatprep.subr.bf16.mxu1 %v2673_v1 }
  0x1f   : > { %v410_v26 = vadd.f32 %v2901_v13, %v371_v18  ;;  %v411_v27 = vadd.f32 %v2901_v13, %v372_v19  ;;  %v412_v28 = vadd.f32 %v2901_v13, %v373_v20  ;;  %v413_v29 = vadd.f32 %v2901_v13, %v374_v21  ;;  %v2675_v18 = vld [vmem:[%s3720_s1 + $0x58] sm:$0xff]  }
  0x20   : > { %v414_v31 = vadd.f32 %v2901_v13, %v375_v22  ;;  %v415_v32 = vadd.f32 %v2901_v13, %v376_v23  ;;  %v416_v33 = vadd.f32 %v2901_v13, %v377_v24  ;;  %v417_v34 = vadd.f32 %v2901_v13, %v378_v25  ;;  %2449 = vmatpush3.bf16.msra.mxu0 %v2965_v63 }
  0x21   : > { %v442_v37 = vmax.f32 %v410_v26, 0.0  ;;  %v443_v38 = vmax.f32 %v411_v27, 0.0  ;;  %v444_v39 = vmax.f32 %v412_v28, 0.0  ;;  %v445_v40 = vmax.f32 %v413_v29, 0.0  ;;  %2450 = vmatprep.subr.bf16.mxu0 %v2999_v17  ;;  %2405 = vmatpush3.bf16.msra.mxu1 %v2673_v1 }
  0x22   : > { %v446_v41 = vmax.f32 %v414_v31, 0.0  ;;  %v447_v42 = vmax.f32 %v415_v32, 0.0  ;;  %v448_v43 = vmax.f32 %v416_v33, 0.0  ;;  %v449_v44 = vmax.f32 %v417_v34, 0.0  ;;  %v3026_v31 = vld [vmem:[%s3720_s1 + $0x60] sm:$0xff]   ;;  %2406 = vmatprep.subr.bf16.mxu1 %v2675_v18 }
  0x23   : > { %v2938_v47 = vpack.c.bf16 %v443_v38, %v442_v37  ;;  %v2940_v48 = vpack.c.bf16 %v445_v40, %v444_v39  ;;  %v2190_v49 = vunpack.c.l.bf16 %v2303_v30  ;;  %v2191_v50 = vunpack.c.h.bf16 %v2303_v30  ;;  %v2307_v40 = vld [vmem:[%s2887_s30 + $0x40] sm:$0xff]  }
  0x24   : > { %v2943_v51 = vpack.c.bf16 %v447_v42, %v446_v41  ;;  %v2945_v52 = vpack.c.bf16 %v449_v44, %v448_v43  ;;  %v2194_v53 = vunpack.c.l.bf16 %v2922_v35  ;;  %v2195_v10 = vunpack.c.h.bf16 %v2922_v35  ;;  %2451 = vmatpush3.bf16.msra.mxu0 %v2999_v17 }
  0x25   : > { %720 = vrot.lane.b32.xlu0 %v2938_v47, %s2762_s12  ;;  %v491_v55 = vshrl.u32 %v2938_v47, 16  ;;  %v494_v56 = vshll.u32 %v2938_v47, 16  ;;  %v498_v57 = vshrl.u32 %v2940_v48, 16  ;;  %v501_v58 = vshll.u32 %v2940_v48, 16  ;;  %2484 = vmatprep.subr.bf16.mxu0 %v3026_v31 }
  0x26   : > { %v505_v59 = vshrl.u32 %v2943_v51, 16  ;;  %v508_v60 = vshll.u32 %v2943_v51, 16  ;;  %v379_v61 = vmul.f32 %v2190_v49, %v2874_v2  ;;  %v380_v62 = vmul.f32 %v2191_v50, %v2874_v2  ;;  %2407 = vmatpush3.bf16.msra.mxu1 %v2675_v18 }
  0x27   : > { %v637_v4 = vrot.slane %v494_v56, 1  ;;  %v639_v6 = vrot.slane %v501_v58, 1  ;;  %v515_v16 = vshll.u32 %v2945_v52, 16  ;;  %v381_v22 = vmul.f32 %v2194_v53, %v2874_v2  ;;  %2528 = vmatprep.subr.bf16.mxu1 %v2865_v0 }
  0x28   : > { %v641_v7 = vrot.slane %v508_v60, 1  ;;  %v418_v8 = vadd.f32 %v2901_v13, %v379_v61  ;;  %v419_v9 = vadd.f32 %v2901_v13, %v380_v62  ;;  %v512_v25 = vshrl.u32 %v2945_v52, 16 }
  0x29   : > { %722 = vrot.lane.b32.xlu0 %v2940_v48, %s2762_s12  ;;  %v638_v14 = vor.u32 %v637_v4, %v491_v55  ;;  %v640_v15 = vor.u32 %v639_v6, %v498_v57  ;;  %v643_v26 = vrot.slane %v515_v16, 1  ;;  %v382_v29 = vmul.f32 %v2195_v10, %v2874_v2 }
  0x2a   : > { %v642_v19 = vor.u32 %v641_v7, %v505_v59  ;;  %v450_v20 = vmax.f32 %v418_v8, 0.0  ;;  %v451_v21 = vmax.f32 %v419_v9, 0.0  ;;  %v420_v30 = vadd.f32 %v2901_v13, %v381_v22 }
  0x2b   : > { %v688_v23 = vsel %vm2974_vm2, %v638_v14, 0  ;;  %v689_v24 = vsel %vm2974_vm2, %v640_v15, 0  ;;  %v2198_v32 = vunpack.c.l.bf16 %v2305_v11  ;;  %v2199_v33 = vunpack.c.h.bf16 %v2305_v11 }
  0x2c   : > { %768 = vrot.lane.b32.xlu1 %v688_v23, %s2763_s28  ;;  %v690_v27 = vsel %vm2974_vm2, %v642_v19, 0  ;;  %v3018_v28 = vpack.c.bf16 %v451_v21, %v450_v20  ;;  %v2202_v34 = vunpack.c.l.bf16 %v2306_v12  ;;  %v421_v38 = vadd.f32 %v2901_v13, %v382_v29 }
  0x2d   : > { %724 = vrot.lane.b32.xlu0 %v2943_v51, %s2762_s12  ;;  %v452_v39 = vmax.f32 %v420_v30, 0.0  ;;  %v383_v41 = vmul.f32 %v2198_v32, %v2874_v2  ;;  %v384_v42 = vmul.f32 %v2199_v33, %v2874_v2  ;;  %v2203_v43 = vunpack.c.h.bf16 %v2306_v12  ;;  %v2308_v12 = vld [vmem:[%s2887_s30 + $0x48] sm:$0xff]  }
  0x2e   : > { %v519_v35 = vshrl.u32 %v3018_v28, 16  ;;  %v522_v37 = vshll.u32 %v3018_v28, 16  ;;  %v644_v44 = vor.u32 %v643_v26, %v512_v25  ;;  %v453_v49 = vmax.f32 %v421_v38, 0.0 }
  0x2f   : > { %v385_v50 = vmul.f32 %v2202_v34, %v2874_v2  ;;  %v422_v53 = vadd.f32 %v2901_v13, %v383_v41  ;;  %v423_v54 = vadd.f32 %v2901_v13, %v384_v42  ;;  %v386_v61 = vmul.f32 %v2203_v43, %v2874_v2  ;;  %v2309_v41 = vld [vmem:[%s2887_s30 + $0x50] sm:$0xff]  }
  0x30   : > { %770 = vrot.lane.b32.xlu1 %v689_v24, %s2763_s28  ;;  %v645_v45 = vrot.slane %v522_v37, 1  ;;  %v2206_v62 = vunpack.c.l.bf16 %v2307_v40  ;;  %v3050_v4 = vpack.c.bf16 %v453_v49, %v452_v39  ;;  %v2207_v7 = vunpack.c.h.bf16 %v2307_v40 }
  0x31   : > { %772 = vrot.lane.b32.xlu0 %v690_v27, %s2763_s28  ;;  %v424_v6 = vadd.f32 %v2901_v13, %v385_v50  ;;  %v454_v8 = vmax.f32 %v422_v53, 0.0  ;;  %v455_v9 = vmax.f32 %v423_v54, 0.0  ;;  %v425_v10 = vadd.f32 %v2901_v13, %v386_v61 }
  0x32   : > { %v646_v1 = vor.u32 %v645_v45, %v519_v35  ;;  %v387_v11 = vmul.f32 %v2206_v62, %v2874_v2  ;;  %v691_v14 = vsel %vm2974_vm2, %v644_v44, 0  ;;  %v526_v15 = vshrl.u32 %v3050_v4, 16 }
  0x33   : > { %v529_v18 = vshll.u32 %v3050_v4, 16  ;;  %v456_v19 = vmax.f32 %v424_v6, 0.0  ;;  %v3065_v20 = vpack.c.bf16 %v455_v9, %v454_v8  ;;  %v457_v21 = vmax.f32 %v425_v10, 0.0  ;;  %v2310_v6 = vld [vmem:[%s2887_s30 + $0x58] sm:$0xff]  }
  0x34   : > { %726 = vrot.lane.b32.xlu1 %v2945_v52, %s2762_s12  ;;  %v388_v22 = vmul.f32 %v2207_v7, %v2874_v2  ;;  %v426_v23 = vadd.f32 %v2901_v13, %v387_v11  ;;  %v692_v24 = vsel %vm2974_vm2, %v646_v1, 0  ;;  %v2210_v27 = vunpack.c.l.bf16 %v2308_v12 }
  0x35   : > { %728 = vrot.lane.b32.xlu0 %v3018_v28, %s2762_s12  ;;  %v647_v26 = vrot.slane %v529_v18, 1  ;;  %v2211_v29 = vunpack.c.h.bf16 %v2308_v12  ;;  %v533_v30 = vshrl.u32 %v3065_v20, 16  ;;  %v536_v32 = vshll.u32 %v3065_v20, 16 }
  0x36   : > { %v3075_v33 = vpack.c.bf16 %v457_v21, %v456_v19  ;;  %v427_v34 = vadd.f32 %v2901_v13, %v388_v22  ;;  %v458_v38 = vmax.f32 %v426_v23, 0.0  ;;  %v389_v39 = vmul.f32 %v2210_v27, %v2874_v2 }
  0x37   : > { %v390_v40 = vmul.f32 %v2211_v29, %v2874_v2  ;;  %v648_v42 = vor.u32 %v647_v26, %v526_v15  ;;  %v649_v43 = vrot.slane %v536_v32, 1  ;;  %v3089_v45 = vrot.slane %v491_v55, 7 }
  0x38   : > { %774 = vrot.lane.b32.xlu1 %v691_v14, %s2763_s28  ;;  %v459_v44 = vmax.f32 %v427_v34, 0.0  ;;  %v543_v49 = vshll.u32 %v3075_v33, 16  ;;  %v428_v50 = vadd.f32 %v2901_v13, %v389_v39  ;;  %v540_v62 = vshrl.u32 %v3075_v33, 16  ;;  %v2311_v34 = vld [vmem:[%s2887_s30 + $0x60] sm:$0xff]  }
  0x39   : > { %776 = vrot.lane.b32.xlu0 %v692_v24, %s2763_s28  ;;  %v429_v53 = vadd.f32 %v2901_v13, %v390_v40  ;;  %v650_v54 = vor.u32 %v649_v43, %v533_v30  ;;  %v2214_v1 = vunpack.c.l.bf16 %v2309_v41  ;;  %v2215_v9 = vunpack.c.h.bf16 %v2309_v41 }
  0x3a   : > { %v3096_v61 = vpack.c.bf16 %v459_v44, %v458_v38  ;;  %v651_v55 = vrot.slane %v543_v49, 1  ;;  %v460_v7 = vmax.f32 %v428_v50, 0.0  ;;  %v693_v10 = vsel %vm2974_vm2, %v648_v42, 0  ;;  %v2312_v50 = vld [vmem:[%s2887_s30 + $0x68] sm:$0xff]  }
  0x3b   : > { %v461_v8 = vmax.f32 %v429_v53, 0.0  ;;  %v391_v14 = vmul.f32 %v2214_v1, %v2874_v2  ;;  %v694_v19 = vsel %vm2974_vm2, %v650_v54, 0  ;;  %v392_v22 = vmul.f32 %v2215_v9, %v2874_v2 }
  0x3c   : > { %730 = vrot.lane.b32.xlu1 %v3050_v4, %s2762_s12  ;;  %v547_v11 = vshrl.u32 %v3096_v61, 16  ;;  %v550_v12 = vshll.u32 %v3096_v61, 16  ;;  %v2218_v23 = vunpack.c.l.bf16 %v2310_v6  ;;  %v652_v24 = vor.u32 %v651_v55, %v540_v62 }
  0x3d   : > { %732 = vrot.lane.b32.xlu0 %v3065_v20, %s2762_s12  ;;  %v3113_v21 = vpack.c.bf16 %v461_v8, %v460_v7  ;;  %v430_v27 = vadd.f32 %v2901_v13, %v391_v14  ;;  %v2219_v29 = vunpack.c.h.bf16 %v2310_v6  ;;  %v3124_v38 = vrot.slane %v498_v57, 7 }
  0x3e   : > { %v653_v26 = vrot.slane %v550_v12, 1  ;;  %v3128_v39 = vrot.slane %v505_v59, 7  ;;  %v431_v40 = vadd.f32 %v2901_v13, %v392_v22  ;;  %v393_v44 = vmul.f32 %v2218_v23, %v2874_v2 }
  0x3f   : > { %v3728_v41 = vshll.u32 %v3113_v21, 16  ;;  %v462_v43 = vmax.f32 %v430_v27, 0.0  ;;  %v394_v57 = vmul.f32 %v2219_v29, %v2874_v2  ;;  %v554_v59 = vshrl.u32 %v3113_v21, 16  ;;  %v2313_v27 = vld [vmem:[%s2887_s30 + $0x70] sm:$0xff]  }
  0x40   : > { %778 = vrot.lane.b32.xlu1 %v693_v10, %s2763_s28  ;;  %v654_v42 = vor.u32 %v653_v26, %v547_v11  ;;  %v463_v53 = vmax.f32 %v431_v40, 0.0  ;;  %v2222_v1 = vunpack.c.l.bf16 %v2311_v34  ;;  %v695_v6 = vsel %vm2974_vm2, %v652_v24, 0 }
  0x41   : > { %780 = vrot.lane.b32.xlu0 %v694_v19, %s2763_s28  ;;  %v655_v54 = vrot.slane %v3728_v41, 1  ;;  %v432_v55 = vadd.f32 %v2901_v13, %v393_v44  ;;  %v433_v7 = vadd.f32 %v2901_v13, %v394_v57  ;;  %v2223_v8 = vunpack.c.h.bf16 %v2311_v34 }
  0x42   : > { %v696_v9 = vsel %vm2974_vm2, %v654_v42, 0  ;;  %v3150_v10 = vpack.c.bf16 %v463_v53, %v462_v43  ;;  %v395_v14 = vmul.f32 %v2222_v1, %v2874_v2  ;;  %v2226_v19 = vunpack.c.l.bf16 %v2312_v50 }
  0x43   : > { %v464_v22 = vmax.f32 %v432_v55, 0.0  ;;  %v465_v23 = vmax.f32 %v433_v7, 0.0  ;;  %v396_v24 = vmul.f32 %v2223_v8, %v2874_v2  ;;  %v2227_v26 = vunpack.c.h.bf16 %v2312_v50 }
  0x44   : > { %734 = vrot.lane.b32.xlu1 %v3075_v33, %s2762_s12  ;;  %v656_v29 = vor.u32 %v655_v54, %v554_v59  ;;  %v561_v34 = vshrl.u32 %v3150_v10, 16  ;;  %v3727_v40 = vshll.u32 %v3150_v10, 16  ;;  %v434_v42 = vadd.f32 %v2901_v13, %v395_v14 }
  0x45   : > { %736 = vrot.lane.b32.xlu0 %v3096_v61, %s2762_s12  ;;  %v3162_v43 = vpack.c.bf16 %v465_v23, %v464_v22  ;;  %v435_v44 = vadd.f32 %v2901_v13, %v396_v24  ;;  %v397_v57 = vmul.f32 %v2226_v19, %v2874_v2  ;;  %v398_v53 = vmul.f32 %v2227_v26, %v2874_v2  ;;  %v2314_v24 = vld [vmem:[%s2887_s30 + $0x78] sm:$0xff]   ;;  %s3522_s30 = scalar_lea.vmem %s3724_s5, %s2169_s16 }
  0x46   : > { %v3169_v50 = vrot.slane %v512_v25, 7  ;;  %v657_v54 = vrot.slane %v3727_v40, 1  ;;  %v466_v1 = vmax.f32 %v434_v42, 0.0  ;;  %v2230_v55 = vunpack.c.l.bf16 %v2313_v27 }
  0x47   : > { %v3176_v7 = vrot.slane %v519_v35, 7  ;;  %v467_v8 = vmax.f32 %v435_v44, 0.0  ;;  %v3726_v14 = vshll.u32 %v3162_v43, 16  ;;  %v436_v19 = vadd.f32 %v2901_v13, %v397_v57 }
  0x48   : > { %782 = vrot.lane.b32.xlu1 %v695_v6, %s2763_s28  ;;  %v658_v25 = vor.u32 %v657_v54, %v561_v34  ;;  %v437_v22 = vadd.f32 %v2901_v13, %v398_v53  ;;  %v2231_v6 = vunpack.c.h.bf16 %v2313_v27  ;;  %v399_v23 = vmul.f32 %v2230_v55, %v2874_v2 }
  0x49   : > { %784 = vrot.lane.b32.xlu0 %v696_v9, %s2763_s28  ;;  %v697_v26 = vsel %vm2974_vm2, %v656_v29, 0  ;;  %v3186_v42 = vpack.c.bf16 %v467_v8, %v466_v1  ;;  %v568_v35 = vshrl.u32 %v3162_v43, 16  ;;  %v468_v9 = vmax.f32 %v436_v19, 0.0 }
  0x4a   : > { %v659_v44 = vrot.slane %v3726_v14, 1  ;;  %v469_v57 = vmax.f32 %v437_v22, 0.0  ;;  %v400_v27 = vmul.f32 %v2231_v6, %v2874_v2  ;;  %v438_v53 = vadd.f32 %v2901_v13, %v399_v23 }
  0x4b   : > { %v698_v29 = vsel %vm2974_vm2, %v658_v25, 0  ;;  %v575_v54 = vshrl.u32 %v3186_v42, 16  ;;  %v578_v1 = vshll.u32 %v3186_v42, 16  ;;  %v2234_v55 = vunpack.c.l.bf16 %v2314_v24 }
  0x4c   : > { %738 = vrot.lane.b32.xlu1 %v3113_v21, %s2762_s12  ;;  %v3201_v8 = vpack.c.bf16 %v469_v57, %v468_v9  ;;  %v439_v19 = vadd.f32 %v2901_v13, %v400_v27  ;;  %v470_v22 = vmax.f32 %v438_v53, 0.0  ;;  %v2235_v14 = vunpack.c.h.bf16 %v2314_v24 }
  0x4d   : > { %740 = vrot.lane.b32.xlu0 %v3150_v10, %s2762_s12  ;;  %v528_v6 = vrot.slane %v526_v15, 7  ;;  %v535_v23 = vrot.slane %v533_v30, 7  ;;  %v661_v25 = vrot.slane %v578_v1, 1  ;;  %v401_v40 = vmul.f32 %v2234_v55, %v2874_v2 }
  0x4e   : > { %v542_v41 = vrot.slane %v540_v62, 7  ;;  %v471_v9 = vmax.f32 %v439_v19, 0.0  ;;  %v585_v57 = vshll.u32 %v3201_v8, 16  ;;  %v402_v24 = vmul.f32 %v2235_v14, %v2874_v2 }
  0x4f   : > { %v660_v15 = vor.u32 %v659_v44, %v568_v35  ;;  %v440_v30 = vadd.f32 %v2901_v13, %v401_v40  ;;  %v3221_v27 = vor.u32 %v494_v56, %v3089_v45  ;;  %v3226_v62 = vor.u32 %v501_v58, %v3124_v38 }
  0x50   : > { %786 = vrot.lane.b32.xlu1 %v697_v26, %s2763_s28  ;;  %v549_v26 = vrot.slane %v547_v11, 7  ;;  %v662_v53 = vor.u32 %v661_v25, %v575_v54  ;;  %v488_v2 = vpack.c.bf16 %v471_v9, %v470_v22  ;;  %v441_v14 = vadd.f32 %v2901_v13, %v402_v24 }
  0x51   : > { %788 = vrot.lane.b32.xlu0 %v698_v29, %s2763_s28  ;;  %v556_v40 = vrot.slane %v554_v59, 7  ;;  %v563_v44 = vrot.slane %v561_v34, 7  ;;  %v570_v29 = vrot.slane %v568_v35, 7  ;;  %v472_v47 = vmax.f32 %v440_v30, 0.0 }
  0x52   : > { %v582_v48 = vshrl.u32 %v3201_v8, 16  ;;  %v663_v56 = vrot.slane %v585_v57, 1  ;;  %v592_v58 = vshll.u32 %v488_v2, 16  ;;  %v473_v45 = vmax.f32 %v441_v14, 0.0 }
  0x53   : > { %v699_v13 = vsel %vm2974_vm2, %v660_v15, 0  ;;  %v510_v11 = vor.u32 %v508_v60, %v3128_v39  ;;  %v3246_v38 = vor.u32 %v515_v16, %v3169_v50  ;;  %v700_v59 = vsel %vm2974_vm2, %v662_v53, 0 }
  0x54   : > { %742 = vrot.lane.b32.xlu1 %v3162_v43, %s2762_s12  ;;  %v589_v34 = vshrl.u32 %v488_v2, 16  ;;  %v665_v35 = vrot.slane %v592_v58, 1  ;;  %v489_v55 = vpack.c.bf16 %v473_v45, %v472_v47  ;;  %v577_v19 = vrot.slane %v575_v54, 7 }
  0x55   : > { %744 = vrot.lane.b32.xlu0 %v3186_v42, %s2762_s12  ;;  %v584_v22 = vrot.slane %v582_v48, 7  ;;  %v3253_v25 = vor.u32 %v522_v37, %v3176_v7  ;;  %v664_v51 = vor.u32 %v663_v56, %v582_v48  ;;  %v2764_v16 = vmov 0  }
  0x56   : > { %v591_v60 = vrot.slane %v589_v34, 7  ;;  %v596_v52 = vshrl.u32 %v489_v55, 16  ;;  %899 = vst.msk [vmem:[#allocation2] sm:$0xff] %vm898_vm3, %v2764_v16  ;;  %901 = vst.msk [vmem:[#allocation2 + $0x88] sm:$0xff] %vm898_vm3, %v2764_v16  ;;  %v3260_v39 = vor.u32 %v529_v18, %v528_v6  ;;  %v599_v50 = vshll.u32 %v489_v55, 16 }
  0x57   : > { %v3265_v28 = vor.u32 %v536_v32, %v535_v23  ;;  %v3269_v37 = vor.u32 %v543_v49, %v542_v41  ;;  %v3273_v7 = vor.u32 %v550_v12, %v549_v26  ;;  %v666_v54 = vor.u32 %v665_v35, %v589_v34 }
  0x58   : > { %790 = vrot.lane.b32.xlu1 %v699_v13, %s2763_s28  ;;  %v598_v9 = vrot.slane %v596_v52, 7  ;;  %v3733_v4 = vshll.u32 %v3113_v21, 16  ;;  %v701_v20 = vsel %vm2974_vm2, %v664_v51, 0  ;;  %v3734_v32 = vshll.u32 %v3150_v10, 16 }
  0x59   : > { %792 = vrot.lane.b32.xlu0 %v700_v59, %s2763_s28  ;;  %v3735_v49 = vshll.u32 %v3162_v43, 16  ;;  %v3293_v12 = vor.u32 %v578_v1, %v577_v19  ;;  %v667_v21 = vrot.slane %v599_v50, 1  ;;  %v3296_v41 = vor.u32 %v585_v57, %v584_v22 }
  0x5a   : > { %v3277_v18 = vor.u32 %v3733_v4, %v556_v40  ;;  %v3285_v33 = vor.u32 %v3734_v32, %v563_v44  ;;  %v3300_v6 = vor.u32 %v599_v50, %v598_v9  ;;  %v702_v10 = vsel %vm2974_vm2, %v666_v54, 0 }
  0x5b   : > { %v3289_v61 = vor.u32 %v3735_v49, %v570_v29  ;;  %v668_v43 = vor.u32 %v667_v21, %v596_v52  ;;  %v621_v24 = vsel %vm3311_vm6, 0, %v3221_v27  ;;  %v622_v5 = vsel %vm3311_vm6, 0, %v3226_v62 }
  0x5c   : > { %746 = vrot.lane.b32.xlu1 %v3201_v8, %s2762_s12  ;;  %v3298_v8 = vor.u32 %v592_v58, %v591_v60  ;;  %v623_v53 = vsel %vm3311_vm6, 0, %v510_v11  ;;  %v625_v56 = vsel %vm3311_vm6, 0, %v3253_v25  ;;  %v2677_v58 = vld [vmem:[%s3720_s1 + $0x68] sm:$0xff]   ;;  %v624_v45 = vsel %vm3311_vm6, 0, %v3246_v38  ;;  %v2678_v38 = vld [vmem:[%s3720_s1 + $0x70] sm:$0xff]  }
  0x5d   : > { %748 = vrot.lane.b32.xlu0 %v488_v2, %s2762_s12  ;;  %v958_v23 = vld [vmem:[#allocation2] sm:$0xff]  ;;  %v703_v42 = vsel %vm2974_vm2, %v668_v43, 0  ;;  %v627_v60 = vsel %vm3311_vm6, 0, %v3265_v28  ;;  %v626_v52 = vsel %vm3311_vm6, 0, %v3260_v39  ;;  %v629_v21 = vsel %vm3311_vm6, 0, %v3273_v7  ;;  %v2681_v43 = vld [vmem:[%s3720_s1 + $0x88] sm:$0xff]  }
  0x5e   : > { %2452 = vmatprep.mubr.msk.bf16.mxu0 %vm898_vm3, %v958_v23  ;;  %v1498_v1 = vld [vmem:[#allocation2 + $0x88] sm:$0xff] }
  0x60   : > { %794 = vrot.lane.b32.xlu1 %v701_v20, %s2763_s28  ;;  %v2680_v20 = vld [vmem:[%s3720_s1 + $0x80] sm:$0xff]  }
  0x61   : > { %796 = vrot.lane.b32.xlu0 %v702_v10, %s2763_s28  ;;  %v628_v10 = vsel %vm3311_vm6, 0, %v3269_v37 }
  0x64   : > { %750 = vrot.lane.b32.xlu1 %v489_v55, %s2762_s12  ;;  %s279_s12 = sand.u32 1, %s2744_s22  }
  0x65   : > { %s2090_s16 = sshll.u32 %s279_s12, 8  ;;  %s3673_s24 = scalar_lea.sflag [#allocation4], %s279_s12 }
  0x66   : > { %s3548_s15 = scalar_lea.vmem [#allocation3], %s2090_s16 }
  0x67   : > { %s1992_s18 = sshll.u32 %s3548_s15, 4  ;;  %s3663_s18 = int_to_ptr.vmem [resolvable:$true] %s1992_s18 }
  0x68   : > { %798 = vrot.lane.b32.xlu1 %v703_v42, %s2763_s28  ;;  %s2682_s28 = scalar_lea.vmem %s3663_s18, 4096  ;;  %p2689_p1 = scmp.lt.s32.totalorder %s3663_s18, %s2687_s13 }
  0x69   : > { %p2683_p12 = scmp.ne.s32.totalorder %s3663_s18, %s2682_s28 }
  0x6b   : > { %p2684_p13 = pnand %p2683_p12, %p2843_p4 }
  0x6d   : > { %p2685_p0 = pneg %p2684_p13 }
  0x97   : > { %v721_v57 = vpop.permute.xlu0 %720 }
  0x98   : > { %v803_v30 = vsel %vm800_vm7, %v621_v24, %v721_v57 }
  0x9b   : > { %v723_v15 = vpop.permute.xlu0 %722 }
  0x9c   : > { %v806_v40 = vsel %vm800_vm7, %v622_v5, %v723_v15  ;;  %v631_v5 = vsel %vm3311_vm6, 0, %v3285_v33 }
  0x9e   : > { %v769_v26 = vpop.permute.xlu1 %768 }
  0x9f   : > { %v851_v2 = vsel %vm849_vm8, %v803_v30, %v769_v26  ;;  %v725_v14 = vpop.permute.xlu0 %724  ;;  %v630_v26 = vsel %vm3311_vm6, 0, %v3277_v18 }
  0xa0   : > { %903 = vst.msk [vmem:[#allocation2 + $0x8] sm:$0xff] %vm898_vm3, %v851_v2  ;;  %v809_v27 = vsel %vm800_vm7, %v623_v53, %v725_v14 }
  0xa2   : > { %v771_v44 = vpop.permute.xlu1 %770 }
  0xa3   : > { %v854_v29 = vsel %vm849_vm8, %v806_v40, %v771_v44  ;;  %v773_v47 = vpop.permute.xlu0 %772 }
  0xa4   : > { %904 = vst.msk [vmem:[#allocation2 + $0x10] sm:$0xff] %vm898_vm3, %v854_v29  ;;  %v857_v62 = vsel %vm849_vm8, %v809_v27, %v773_v47  ;;  %v632_v47 = vsel %vm3311_vm6, 0, %v3289_v61 }
  0xa5   : > { %905 = vst.msk [vmem:[#allocation2 + $0x18] sm:$0xff] %vm898_vm3, %v857_v62 }
  0xa6   : > { %v727_v48 = vpop.permute.xlu1 %726 }
  0xa7   : > { %v975_v13 = vld [vmem:[#allocation2 + $0x8] sm:$0xff]  ;;  %v729_v11 = vpop.permute.xlu0 %728  ;;  %v812_v34 = vsel %vm800_vm7, %v624_v45, %v727_v48 }
  0xa8   : > { %2408 = vmatprep.mubr.msk.bf16.mxu1 %vm898_vm3, %v975_v13  ;;  %2453 = vmatmul.mubr.msk.bf16.vlgmr.msra.gmra.mrb[0].mxu0 %vm898_vm3, %v975_v13  ;;  %v815_v59 = vsel %vm800_vm7, %v625_v56, %v729_v11 }
  0xa9   : > { %2485 = vmatpush3.bf16.msra.mxu0 %v3026_v31 }
  0xaa   : > { %v775_v35 = vpop.permute.xlu1 %774  ;;  %2486 = vmatprep.subr.bf16.mxu0 %v2677_v58 }
  0xab   : > { %v860_v55 = vsel %vm849_vm8, %v812_v34, %v775_v35  ;;  %v3347_v19 = vld [vmem:[#allocation2 + $0x10] sm:$0xff]  ;;  %v777_v22 = vpop.permute.xlu0 %776  ;;  %v635_v34 = vsel %vm3311_vm6, 0, %v3298_v8  ;;  %v634_v35 = vsel %vm3311_vm6, 0, %v3296_v41 }
  0xac   : > { %906 = vst.msk [vmem:[#allocation2 + $0x20] sm:$0xff] %vm898_vm3, %v860_v55  ;;  %2409 = vmatmul.mubr.msk.bf16.vlgmr.msra.gmra.mrb[0].mxu1 %vm898_vm3, %v3347_v19  ;;  %2456 = vmatprep.mubr.msk.bf16.mxu0 %vm898_vm3, %v3347_v19  ;;  %v863_v31 = vsel %vm849_vm8, %v815_v59, %v777_v22  ;;  %v3358_v25 = vld [vmem:[#allocation2 + $0x18] sm:$0xff] }
  0xad   : > { %2534 = vmatpush3.bf16.msra.mxu1 %v2865_v0  ;;  %907 = vst.msk [vmem:[#allocation2 + $0x28] sm:$0xff] %vm898_vm3, %v863_v31  ;;  %2412 = vmatprep.mubr.msk.bf16.mxu1 %vm898_vm3, %v3358_v25  ;;  %v2679_v0 = vld [vmem:[%s3720_s1 + $0x78] sm:$0xff]  }
  0xae   : > { %v731_v51 = vpop.permute.xlu1 %730  ;;  %2487 = vmatpush3.bf16.msra.mxu0 %v2677_v58  ;;  %2529 = vmatprep.subr.bf16.mxu1 %v2880_v3 }
  0xaf   : > { %v733_v16 = vpop.permute.xlu0 %732  ;;  %2488 = vmatprep.subr.bf16.mxu0 %v2678_v38  ;;  %v818_v28 = vsel %vm800_vm7, %v626_v52, %v731_v51  ;;  %v636_v52 = vsel %vm3311_vm6, 0, %v3300_v6 }
  0xb0   : > { %2457 = vmatmul.mubr.msk.bf16.gmra.mrb[4].mxu0 %vm898_vm3, %v3358_v25  ;;  %v821_v50 = vsel %vm800_vm7, %v627_v60, %v733_v16 }
  0xb1   : > { %2535 = vmatpush3.bf16.msra.mxu1 %v2880_v3 }
  0xb2   : > { %v779_v54 = vpop.permute.xlu1 %778  ;;  %2489 = vmatpush3.bf16.msra.mxu0 %v2678_v38  ;;  %2530 = vmatprep.subr.bf16.mxu1 %v2927_v36 }
  0xb3   : > { %v866_v39 = vsel %vm849_vm8, %v818_v28, %v779_v54  ;;  %v3381_v9 = vld [vmem:[#allocation2 + $0x20] sm:$0xff]  ;;  %v781_v4 = vpop.permute.xlu0 %780  ;;  %2490 = vmatprep.subr.bf16.mxu0 %v2679_v0 }
  0xb4   : > { %908 = vst.msk [vmem:[#allocation2 + $0x30] sm:$0xff] %vm898_vm3, %v866_v39  ;;  %2413 = vmatmul.mubr.msk.bf16.gmra.mrb[4].mxu1 %vm898_vm3, %v3381_v9  ;;  %2460 = vmatprep.mubr.msk.bf16.mxu0 %vm898_vm3, %v3381_v9  ;;  %v869_v3 = vsel %vm849_vm8, %v821_v50, %v781_v4  ;;  %v3392_v32 = vld [vmem:[#allocation2 + $0x28] sm:$0xff] }
  0xb5   : > { %909 = vst.msk [vmem:[#allocation2 + $0x38] sm:$0xff] %vm898_vm3, %v869_v3  ;;  %2416 = vmatprep.mubr.msk.bf16.mxu1 %vm898_vm3, %v3392_v32  ;;  %2536 = vmatpush3.bf16.msra.mxu1 %v2927_v36 }
  0xb6   : > { %v735_v49 = vpop.permute.xlu1 %734  ;;  %2491 = vmatpush3.bf16.msra.mxu0 %v2679_v0  ;;  %2531 = vmatprep.subr.bf16.mxu1 %v2936_v46 }
  0xb7   : > { %v737_v23 = vpop.permute.xlu0 %736  ;;  %2492 = vmatprep.subr.bf16.mxu0 %v2680_v20  ;;  %v824_v7 = vsel %vm800_vm7, %v628_v10, %v735_v49 }
  0xb8   : > { %2461 = vmatmul.mubr.msk.bf16.gmra.mrb[8].mxu0 %vm898_vm3, %v3392_v32  ;;  %v827_v36 = vsel %vm800_vm7, %v629_v21, %v737_v23 }
  0xb9   : > { %2537 = vmatpush3.bf16.msra.mxu1 %v2936_v46 }
  0xba   : > { %v783_v42 = vpop.permute.xlu1 %782  ;;  %2493 = vmatpush3.bf16.msra.mxu0 %v2680_v20  ;;  %2532 = vmatprep.subr.bf16.mxu1 %v2965_v63 }
  0xbb   : > { %v872_v37 = vsel %vm849_vm8, %v824_v7, %v783_v42  ;;  %v980_v57 = vld [vmem:[#allocation2 + $0x30] sm:$0xff]  ;;  %v785_v24 = vpop.permute.xlu0 %784  ;;  %2494 = vmatprep.subr.bf16.mxu0 %v2681_v43 }
  0xbc   : > { %910 = vst.msk [vmem:[#allocation2 + $0x40] sm:$0xff] %vm898_vm3, %v872_v37  ;;  %2417 = vmatmul.mubr.msk.bf16.gmra.mrb[8].mxu1 %vm898_vm3, %v980_v57  ;;  %2464 = vmatprep.mubr.msk.bf16.mxu0 %vm898_vm3, %v980_v57  ;;  %v875_v15 = vsel %vm849_vm8, %v827_v36, %v785_v24  ;;  %v3419_v46 = vld [vmem:[#allocation2 + $0x38] sm:$0xff] }
  0xbd   : > { %911 = vst.msk [vmem:[#allocation2 + $0x48] sm:$0xff] %vm898_vm3, %v875_v15  ;;  %2420 = vmatprep.mubr.msk.bf16.mxu1 %vm898_vm3, %v3419_v46  ;;  %2538 = vmatpush3.bf16.msra.mxu1 %v2965_v63  ;;  %v2237_v15 = vld [vmem:[%s3522_s30] sm:$0xff]  }
  0xbe   : > { %v739_v30 = vpop.permute.xlu1 %738  ;;  %2495 = vmatpush3.bf16.msra.mxu0 %v2681_v43  ;;  %2533 = vmatprep.subr.bf16.mxu1 %v2999_v17 }
  0xbf   : > { %v741_v53 = vpop.permute.xlu0 %740  ;;  %v830_v33 = vsel %vm800_vm7, %v630_v26, %v739_v30  ;;  %v3538_v30 = vld [vmem:[%s3721_s2] ss:$0 sm:$0xff] }
  0xc0   : > { %2465 = vmatmul.mubr.msk.bf16.gmra.mrb[12].mxu0 %vm898_vm3, %v3419_v46  ;;  %v833_v63 = vsel %vm800_vm7, %v631_v5, %v741_v53 }
  0xc1   : > { %2496 = vmatprep.mubr.msk.bf16.mxu0 %vm898_vm3, %v3347_v19  ;;  %2539 = vmatpush3.bf16.msra.mxu1 %v2999_v17  ;;  %v633_v17 = vsel %vm3311_vm6, 0, %v3293_v12 }
  0xc2   : > { %v787_v2 = vpop.permute.xlu1 %786 }
  0xc3   : > { %v878_v14 = vsel %vm849_vm8, %v830_v33, %v787_v2  ;;  %v982_v40 = vld [vmem:[#allocation2 + $0x40] sm:$0xff]  ;;  %v789_v27 = vpop.permute.xlu0 %788  ;;  %v2238_v33 = vunpack.c.l.bf16 %v2237_v15 }
  0xc4   : > { %912 = vst.msk [vmem:[#allocation2 + $0x50] sm:$0xff] %vm898_vm3, %v878_v14  ;;  %2421 = vmatmul.mubr.msk.bf16.gmra.mrb[12].mxu1 %vm898_vm3, %v982_v40  ;;  %v881_v18 = vsel %vm849_vm8, %v833_v63, %v789_v27  ;;  %v983_v44 = vld [vmem:[#allocation2 + $0x48] sm:$0xff] }
  0xc5   : > { %913 = vst.msk [vmem:[#allocation2 + $0x58] sm:$0xff] %vm898_vm3, %v881_v18  ;;  %2424 = vmatprep.mubr.msk.bf16.mxu1 %vm898_vm3, %v983_v44 }
  0xc6   : > { %v743_v29 = vpop.permute.xlu1 %742 }
  0xc7   : > { %v745_v62 = vpop.permute.xlu0 %744  ;;  %v836_v56 = vsel %vm800_vm7, %v632_v47, %v743_v29 }
  0xc8   : > { %2497 = vmatmul.mubr.msk.bf16.vlgmr.msra.gmra.mrb[0].mxu0 %vm898_vm3, %v3358_v25  ;;  %v839_v48 = vsel %vm800_vm7, %v633_v17, %v745_v62  ;;  %v2239_v17 = vunpack.c.h.bf16 %v2237_v15 }
  0xc9   : > { %2500 = vmatprep.mubr.msk.bf16.mxu0 %vm898_vm3, %v3381_v9 }
  0xca   : > { %v791_v58 = vpop.permute.xlu1 %790 }
  0xcb   : > { %v884_v45 = vsel %vm849_vm8, %v836_v56, %v791_v58  ;;  %v984_v13 = vld [vmem:[#allocation2 + $0x50] sm:$0xff]  ;;  %v793_v12 = vpop.permute.xlu0 %792  ;;  %v2317_v58 = vld [vmem:[%s3522_s30 + $0x18] sm:$0xff]  }
  0xcc   : > { %914 = vst.msk [vmem:[#allocation2 + $0x60] sm:$0xff] %vm898_vm3, %v884_v45  ;;  %2425 = vmatmul.mubr.msk.bf16.gmra.mrb[16].mxu1 %vm898_vm3, %v984_v13  ;;  %v887_v61 = vsel %vm849_vm8, %v839_v48, %v793_v12  ;;  %v985_v11 = vld [vmem:[#allocation2 + $0x58] sm:$0xff]  ;;  %v2316_v12 = vld [vmem:[%s3522_s30 + $0x10] sm:$0xff]  }
  0xcd   : > { %915 = vst.msk [vmem:[#allocation2 + $0x68] sm:$0xff] %vm898_vm3, %v887_v61  ;;  %2428 = vmatprep.mubr.msk.bf16.mxu1 %vm898_vm3, %v985_v11 }
  0xce   : > { %v747_v59 = vpop.permute.xlu1 %746 }
  0xcf   : > { %v749_v55 = vpop.permute.xlu0 %748  ;;  %v842_v22 = vsel %vm800_vm7, %v634_v35, %v747_v59 }
  0xd0   : > { %2501 = vmatmul.mubr.msk.bf16.gmra.mrb[4].mxu0 %vm898_vm3, %v3392_v32  ;;  %v845_v19 = vsel %vm800_vm7, %v635_v34, %v749_v55  ;;  %v2250_v55 = vunpack.c.l.bf16 %v2317_v58 }
  0xd1   : > { %2504 = vmatprep.mubr.msk.bf16.mxu0 %vm898_vm3, %v980_v57  ;;  %v2315_v57 = vld [vmem:[%s3522_s30 + $0x8] sm:$0xff]  }
  0xd2   : > { %v795_v38 = vpop.permute.xlu1 %794  ;;  %v2242_v26 = vunpack.c.l.bf16 %v2315_v57  ;;  %v2243_v27 = vunpack.c.h.bf16 %v2315_v57 }
  0xd3   : > { %v890_v31 = vsel %vm849_vm8, %v842_v22, %v795_v38  ;;  %v986_v25 = vld [vmem:[#allocation2 + $0x60] sm:$0xff]  ;;  %v797_v51 = vpop.permute.xlu0 %796 }
  0xd4   : > { %916 = vst.msk [vmem:[#allocation2 + $0x70] sm:$0xff] %vm898_vm3, %v890_v31  ;;  %2429 = vmatmul.mubr.msk.bf16.gmra.mrb[20].mxu1 %vm898_vm3, %v986_v25  ;;  %v893_v41 = vsel %vm849_vm8, %v845_v19, %v797_v51  ;;  %v987_v8 = vld [vmem:[#allocation2 + $0x68] sm:$0xff]  ;;  %v2246_v31 = vunpack.c.l.bf16 %v2316_v12 }
  0xd5   : > { %917 = vst.msk [vmem:[#allocation2 + $0x78] sm:$0xff] %vm898_vm3, %v893_v41  ;;  %2432 = vmatprep.mubr.msk.bf16.mxu1 %vm898_vm3, %v987_v8 }
  0xd6   : > { %v751_v60 = vpop.permute.xlu1 %750 }
  0xd7   : > { %v848_v16 = vsel %vm800_vm7, %v636_v52, %v751_v60 }
  0xd8   : > { %2505 = vmatmul.mubr.msk.bf16.gmra.mrb[8].mxu0 %vm898_vm3, %v3419_v46 }
  0xd9   : > { %2508 = vmatprep.mubr.msk.bf16.mxu0 %vm898_vm3, %v982_v40 }
  0xda   : > { %v799_v0 = vpop.permute.xlu1 %798 }
  0xdb   : > { %v896_v50 = vsel %vm849_vm8, %v848_v16, %v799_v0  ;;  %v988_v28 = vld [vmem:[#allocation2 + $0x70] sm:$0xff]  ;;  %v2247_v0 = vunpack.c.h.bf16 %v2316_v12 }
  0xdc   : > { %918 = vst.msk [vmem:[#allocation2 + $0x80] sm:$0xff] %vm898_vm3, %v896_v50  ;;  %2433 = vmatmul.mubr.msk.bf16.gmra.mrb[24].mxu1 %vm898_vm3, %v988_v28  ;;  %v989_v54 = vld [vmem:[#allocation2 + $0x78] sm:$0xff] }
  0xdd   : > { %2436 = vmatprep.mubr.msk.bf16.mxu1 %vm898_vm3, %v989_v54 }
  0xe0   : > { %2509 = vmatmul.mubr.msk.bf16.gmra.mrb[12].mxu0 %vm898_vm3, %v983_v44 }
  0xe1   : > { %2512 = vmatprep.mubr.msk.bf16.mxu0 %vm898_vm3, %v984_v13 }
  0xe3   : > { %v990_v6 = vld [vmem:[#allocation2 + $0x80] sm:$0xff] }
  0xe4   : > { %2437 = vmatmul.mubr.msk.bf16.gmra.mrb[28].mxu1 %vm898_vm3, %v990_v6 }
  0xe5   : > { %2468 = vmatprep.mubr.msk.bf16.mxu1 %vm898_vm3, %v982_v40 }
  0xe8   : > { %2513 = vmatmul.mubr.msk.bf16.gmra.mrb[16].mxu0 %vm898_vm3, %v985_v11 }
  0xe9   : > { %2516 = vmatprep.mubr.msk.bf16.mxu0 %vm898_vm3, %v986_v25 }
  0xec   : > { %2469 = vmatmul.mubr.msk.bf16.vlgmr.msra.gmra.mrb[16].mxu1 %vm898_vm3, %v983_v44 }
  0xed   : > { %2472 = vmatprep.mubr.msk.bf16.mxu1 %vm898_vm3, %v984_v13 }
  0xf0   : > { %2517 = vmatmul.mubr.msk.bf16.gmra.mrb[20].mxu0 %vm898_vm3, %v987_v8 }
  0xf1   : > { %2520 = vmatprep.mubr.msk.bf16.mxu0 %vm898_vm3, %v988_v28 }
  0xf4   : > { %2473 = vmatmul.mubr.msk.bf16.gmra.mrb[20].mxu1 %vm898_vm3, %v985_v11 }
  0xf5   : > { %2476 = vmatprep.mubr.msk.bf16.mxu1 %vm898_vm3, %v986_v25 }
  0xf8   : > { %2521 = vmatmul.mubr.msk.bf16.gmra.mrb[24].mxu0 %vm898_vm3, %v989_v54 }
  0xf9   : > { %2524 = vmatprep.mubr.msk.bf16.mxu0 %vm898_vm3, %v990_v6 }
  0xfc   : > { %2477 = vmatmul.mubr.msk.bf16.gmra.mrb[24].mxu1 %vm898_vm3, %v987_v8  ;;  %v2251_v8 = vunpack.c.h.bf16 %v2317_v58 }
  0xfd   : > { %2480 = vmatprep.mubr.msk.bf16.mxu1 %vm898_vm3, %v988_v28 }
 0x100   : > { %2525 = vmatmul.mubr.msk.bf16.gmra.mrb[28].mxu0 %vm898_vm3, %v1498_v1  ;;  %v2319_v1 = vld [vmem:[%s3522_s30 + $0x28] sm:$0xff]  }
 0x101   : > { %v2258_v57 = vunpack.c.l.bf16 %v2319_v1 }
 0x104   : > { %2481 = vmatmul.mubr.msk.bf16.gmra.mrb[28].mxu1 %vm898_vm3, %v989_v54 }
 0x17f   : > { %v2410_v39 = vpop.f32.mrb[0].mxu1 }
 0x180   : > { %v1110_v9 = vpop.f32.mrb[1].mxu1 }
 0x181   : > { %v2411_v4 = vpop.f32.mrb[2].mxu1 }
 0x182   : > { %v1113_v20 = vpop.f32.mrb[3].mxu1 }
 0x187   : > { %v2414_v3 = vpop.f32.mrb[4].mxu1 }
 0x188   : > { %v1126_v32 = vpop.f32.mrb[5].mxu1 }
 0x189   : > { %v2415_v49 = vpop.f32.mrb[6].mxu1 }
 0x18a   : > { %v1129_v21 = vpop.f32.mrb[7].mxu1 }
 0x18f   : > { %v3509_v10 = vpop.f32.mrb[8].mxu1 }
 0x190   : > { %v3511_v23 = vpop.f32.mrb[9].mxu1 }
 0x191   : > { %v3513_v43 = vpop.f32.mrb[10].mxu1 }
 0x192   : > { %v3515_v36 = vpop.f32.mrb[11].mxu1 }
 0x197   : > { %v3524_v7 = vpop.f32.mrb[12].mxu1 }
 0x198   : > { %v3526_v42 = vpop.f32.mrb[13].mxu1 }
 0x199   : > { %v3528_v37 = vpop.f32.mrb[14].mxu1 }
 0x19a   : > { %v3531_v24 = vpop.f32.mrb[15].mxu1 }
 0x19b   : > { %v2498_v46 = vpop.f32.mrb[0].mxu0 }
 0x19c   : > { %v2540_v5 = vadd.f32 %v2498_v46, %v2410_v39  ;;  %v1617_v53 = vpop.f32.mrb[1].mxu0 }
 0x19d   : > { %v2541_v63 = vadd.f32 %v1617_v53, %v1110_v9  ;;  %v2499_v2 = vpop.f32.mrb[2].mxu0 }
 0x19e   : > { %v1786_v14 = vadd.f32 %v2540_v5, %v3538_v30  ;;  %v2542_v40 = vadd.f32 %v2499_v2, %v2411_v4  ;;  %v1620_v18 = vpop.f32.mrb[3].mxu0  ;;  %v2318_v4 = vld [vmem:[%s3522_s30 + $0x20] sm:$0xff]   ;;  %v2259_v2 = vunpack.c.h.bf16 %v2319_v1 }
 0x19f   : > { %v1784_v44 = vadd.f32 %v2541_v63, %v3538_v30  ;;  %v2543_v29 = vadd.f32 %v1620_v18, %v1113_v20  ;;  %v2322_v1 = vld [vmem:[%s3522_s30 + $0x40] sm:$0xff]  }
 0x1a0   : > { %v1882_v47 = vadd.f32 %v2242_v26, %v1786_v14  ;;  %v1787_v62 = vadd.f32 %v2542_v40, %v3538_v30  ;;  %v2254_v26 = vunpack.c.l.bf16 %v2318_v4 }
 0x1a1   : > { %v1880_v48 = vadd.f32 %v2238_v33, %v1784_v44  ;;  %v1785_v56 = vadd.f32 %v2543_v29, %v3538_v30 }
 0x1a2   : > { %v1914_v45 = vmax.f32 %v1882_v47, 0.0  ;;  %v1883_v13 = vadd.f32 %v2243_v27, %v1787_v62  ;;  %v2320_v62 = vld [vmem:[%s3522_s30 + $0x30] sm:$0xff]  }
 0x1a3   : > { %v1912_v61 = vmax.f32 %v1880_v48, 0.0  ;;  %v1881_v11 = vadd.f32 %v2239_v17, %v1785_v56  ;;  %v2502_v59 = vpop.f32.mrb[4].mxu0  ;;  %v2321_v17 = vld [vmem:[%s3522_s30 + $0x38] sm:$0xff]  }
 0x1a4   : > { %1947 = vst.msk [vmem:[%s3548_s15 + $0x10] sm:$0xff] %vm800_vm7, %v1914_v45  ;;  %v1915_v34 = vmax.f32 %v1883_v13, 0.0  ;;  %v2544_v35 = vadd.f32 %v2502_v59, %v2414_v3  ;;  %v1633_v19 = vpop.f32.mrb[5].mxu0  ;;  %v2266_v13 = vunpack.c.l.bf16 %v2321_v17  ;;  %v2262_v59 = vunpack.c.l.bf16 %v2320_v62 }
 0x1a5   : > { %1945 = vst.msk [vmem:[%s3548_s15] sm:$0xff] %vm800_vm7, %v1912_v61  ;;  %v1913_v22 = vmax.f32 %v1881_v11, 0.0  ;;  %v2545_v38 = vadd.f32 %v1633_v19, %v1126_v32  ;;  %v2503_v25 = vpop.f32.mrb[6].mxu0  ;;  %v2267_v19 = vunpack.c.h.bf16 %v2321_v17  ;;  %v2324_v17 = vld [vmem:[%s3522_s30 + $0x50] sm:$0xff]  }
 0x1a6   : > { %1948 = vst.msk [vmem:[%s3548_s15 + $0x18] sm:$0xff] %vm800_vm7, %v1915_v34  ;;  %v1790_v51 = vadd.f32 %v2544_v35, %v3538_v30  ;;  %v2546_v41 = vadd.f32 %v2503_v25, %v2415_v49  ;;  %v1636_v60 = vpop.f32.mrb[7].mxu0 }
 0x1a7   : > { %1946 = vst.msk [vmem:[%s3548_s15 + $0x8] sm:$0xff] %vm800_vm7, %v1913_v22  ;;  %v1788_v52 = vadd.f32 %v2545_v38, %v3538_v30  ;;  %v2547_v16 = vadd.f32 %v1636_v60, %v1129_v21 }
 0x1a8   : > { %v1886_v50 = vadd.f32 %v2250_v55, %v1790_v51  ;;  %v1791_v28 = vadd.f32 %v2546_v41, %v3538_v30 }
 0x1a9   : > { %v1884_v54 = vadd.f32 %v2246_v31, %v1788_v52  ;;  %v1789_v6 = vadd.f32 %v2547_v16, %v3538_v30  ;;  %v2263_v31 = vunpack.c.h.bf16 %v2320_v62 }
 0x1aa   : > { %v1918_v39 = vmax.f32 %v1886_v50, 0.0  ;;  %v1887_v9 = vadd.f32 %v2251_v8, %v1791_v28 }
 0x1ab   : > { %v1916_v20 = vmax.f32 %v1884_v54, 0.0  ;;  %v1885_v3 = vadd.f32 %v2247_v0, %v1789_v6  ;;  %v2506_v32 = vpop.f32.mrb[8].mxu0  ;;  %v2323_v54 = vld [vmem:[%s3522_s30 + $0x48] sm:$0xff]  }
 0x1ac   : > { %1951 = vst.msk [vmem:[%s3548_s15 + $0x30] sm:$0xff] %vm800_vm7, %v1918_v39  ;;  %v1919_v49 = vmax.f32 %v1887_v9, 0.0  ;;  %v2548_v21 = vadd.f32 %v2506_v32, %v3509_v10  ;;  %v1649_v15 = vpop.f32.mrb[9].mxu0  ;;  %v2270_v32 = vunpack.c.l.bf16 %v2322_v1 }
 0x1ad   : > { %1949 = vst.msk [vmem:[%s3548_s15 + $0x20] sm:$0xff] %vm800_vm7, %v1916_v20  ;;  %v1917_v46 = vmax.f32 %v1885_v3, 0.0  ;;  %v2549_v5 = vadd.f32 %v1649_v15, %v3511_v23  ;;  %v2507_v53 = vpop.f32.mrb[10].mxu0  ;;  %v2255_v23 = vunpack.c.h.bf16 %v2318_v4  ;;  %v2274_v4 = vunpack.c.l.bf16 %v2323_v54 }
 0x1ae   : > { %1952 = vst.msk [vmem:[%s3548_s15 + $0x38] sm:$0xff] %vm800_vm7, %v1919_v49  ;;  %v1794_v63 = vadd.f32 %v2548_v21, %v3538_v30  ;;  %v2550_v33 = vadd.f32 %v2507_v53, %v3513_v43  ;;  %v1652_v14 = vpop.f32.mrb[11].mxu0  ;;  %v2275_v15 = vunpack.c.h.bf16 %v2323_v54  ;;  %v2271_v53 = vunpack.c.h.bf16 %v2322_v1 }
 0x1af   : > { %1950 = vst.msk [vmem:[%s3548_s15 + $0x28] sm:$0xff] %vm800_vm7, %v1917_v46  ;;  %v1792_v10 = vadd.f32 %v2549_v5, %v3538_v30  ;;  %v2551_v40 = vadd.f32 %v1652_v14, %v3515_v36 }
 0x1b0   : > { %v1890_v27 = vadd.f32 %v2258_v57, %v1794_v63  ;;  %v1795_v18 = vadd.f32 %v2550_v33, %v3538_v30 }
 0x1b1   : > { %v1888_v44 = vadd.f32 %v2254_v26, %v1792_v10  ;;  %v1793_v29 = vadd.f32 %v2551_v40, %v3538_v30 }
 0x1b2   : > { %v1922_v47 = vmax.f32 %v1890_v27, 0.0  ;;  %v1891_v43 = vadd.f32 %v2259_v2, %v1795_v18  ;;  %v2325_v27 = vld [vmem:[%s3522_s30 + $0x58] sm:$0xff]  }
 0x1b3   : > { %v1920_v48 = vmax.f32 %v1888_v44, 0.0  ;;  %v1889_v56 = vadd.f32 %v2255_v23, %v1793_v29  ;;  %v2510_v58 = vpop.f32.mrb[12].mxu0 }
 0x1b4   : > { %1955 = vst.msk [vmem:[%s3548_s15 + $0x50] sm:$0xff] %vm800_vm7, %v1922_v47  ;;  %v1923_v36 = vmax.f32 %v1891_v43, 0.0  ;;  %v2552_v45 = vadd.f32 %v2510_v58, %v3524_v7  ;;  %v1665_v12 = vpop.f32.mrb[13].mxu0  ;;  %v2282_v58 = vunpack.c.l.bf16 %v2325_v27 }
 0x1b5   : > { %1953 = vst.msk [vmem:[%s3548_s15 + $0x40] sm:$0xff] %vm800_vm7, %v1920_v48  ;;  %v1921_v61 = vmax.f32 %v1889_v56, 0.0  ;;  %v2553_v11 = vadd.f32 %v1665_v12, %v3526_v42  ;;  %v2511_v34 = vpop.f32.mrb[14].mxu0  ;;  %v2278_v12 = vunpack.c.l.bf16 %v2324_v17 }
 0x1b6   : > { %1956 = vst.msk [vmem:[%s3548_s15 + $0x58] sm:$0xff] %vm800_vm7, %v1923_v36  ;;  %v1798_v35 = vadd.f32 %v2552_v45, %v3538_v30  ;;  %v2554_v55 = vadd.f32 %v2511_v34, %v3528_v37  ;;  %v1668_v22 = vpop.f32.mrb[15].mxu0  ;;  %v2283_v34 = vunpack.c.h.bf16 %v2325_v27 }
 0x1b7   : > { %1954 = vst.msk [vmem:[%s3548_s15 + $0x48] sm:$0xff] %vm800_vm7, %v1921_v61  ;;  %v1796_v7 = vadd.f32 %v2553_v11, %v3538_v30  ;;  %v2555_v38 = vadd.f32 %v1668_v22, %v3531_v24  ;;  %v2279_v22 = vunpack.c.h.bf16 %v2324_v17 }
 0x1b8   : > { %v1894_v42 = vadd.f32 %v2266_v13, %v1798_v35  ;;  %v1799_v25 = vadd.f32 %v2554_v55, %v3538_v30 }
 0x1b9   : > { %v1892_v51 = vadd.f32 %v2262_v59, %v1796_v7  ;;  %v1797_v37 = vadd.f32 %v2555_v38, %v3538_v30 }
 0x1ba   : > { %v1926_v41 = vmax.f32 %v1894_v42, 0.0  ;;  %v1895_v8 = vadd.f32 %v2267_v19, %v1799_v25 }
 0x1bb   : > { %v1924_v60 = vmax.f32 %v1892_v51, 0.0  ;;  %v1893_v52 = vadd.f32 %v2263_v31, %v1797_v37  ;;  %v2514_v16 = vpop.f32.mrb[16].mxu0 }
 0x1bc   : > { %1959 = vst.msk [vmem:[%s3548_s15 + $0x70] sm:$0xff] %vm800_vm7, %v1926_v41  ;;  %v1927_v0 = vmax.f32 %v1895_v8, 0.0  ;;  %v1681_v24 = vpop.f32.mrb[17].mxu0  ;;  %v2327_v41 = vld [vmem:[%s3522_s30 + $0x68] sm:$0xff]  }
 0x1bd   : > { %1957 = vst.msk [vmem:[%s3548_s15 + $0x60] sm:$0xff] %vm800_vm7, %v1924_v60  ;;  %v1925_v50 = vmax.f32 %v1893_v52, 0.0  ;;  %v2515_v28 = vpop.f32.mrb[18].mxu0 }
 0x1be   : > { %1960 = vst.msk [vmem:[%s3548_s15 + $0x78] sm:$0xff] %vm800_vm7, %v1927_v0  ;;  %v1684_v6 = vpop.f32.mrb[19].mxu0 }
 0x1bf   : > { %1958 = vst.msk [vmem:[%s3548_s15 + $0x68] sm:$0xff] %vm800_vm7, %v1925_v50  ;;  %v2470_v39 = vpop.f32.mrb[16].mxu1 }
 0x1c0   : > { %v2556_v9 = vadd.f32 %v2514_v16, %v2470_v39  ;;  %v1419_v20 = vpop.f32.mrb[17].mxu1  ;;  %v2326_v16 = vld [vmem:[%s3522_s30 + $0x60] sm:$0xff]  }
 0x1c1   : > { %v2557_v3 = vadd.f32 %v1681_v24, %v1419_v20  ;;  %v2471_v49 = vpop.f32.mrb[18].mxu1 }
 0x1c2   : > { %v1802_v21 = vadd.f32 %v2556_v9, %v3538_v30  ;;  %v2558_v57 = vadd.f32 %v2515_v28, %v2471_v49  ;;  %v1422_v46 = vpop.f32.mrb[19].mxu1  ;;  %v2291_v49 = vunpack.c.h.bf16 %v2327_v41 }
 0x1c3   : > { %v1800_v5 = vadd.f32 %v2557_v3, %v3538_v30  ;;  %v2559_v26 = vadd.f32 %v1684_v6, %v1422_v46  ;;  %v2518_v63 = vpop.f32.mrb[20].mxu0  ;;  %v2290_v6 = vunpack.c.l.bf16 %v2327_v41  ;;  %v2287_v46 = vunpack.c.h.bf16 %v2326_v16 }
 0x1c4   : > { %v1898_v33 = vadd.f32 %v2274_v4, %v1802_v21  ;;  %v1803_v2 = vadd.f32 %v2558_v57, %v3538_v30  ;;  %v1697_v14 = vpop.f32.mrb[21].mxu0  ;;  %v2286_v4 = vunpack.c.l.bf16 %v2326_v16 }
 0x1c5   : > { %v1896_v10 = vadd.f32 %v2270_v32, %v1800_v5  ;;  %v1801_v40 = vadd.f32 %v2559_v26, %v3538_v30  ;;  %v2519_v23 = vpop.f32.mrb[22].mxu0 }
 0x1c6   : > { %v1930_v18 = vmax.f32 %v1898_v33, 0.0  ;;  %v1899_v44 = vadd.f32 %v2275_v15, %v1803_v2  ;;  %v1700_v29 = vpop.f32.mrb[23].mxu0 }
 0x1c7   : > { %v1928_v47 = vmax.f32 %v1896_v10, 0.0  ;;  %v1897_v43 = vadd.f32 %v2271_v53, %v1801_v40  ;;  %v2474_v62 = vpop.f32.mrb[20].mxu1  ;;  %v2329_v10 = vld [vmem:[%s3522_s30 + $0x78] sm:$0xff]  }
 0x1c8   : > { %1963 = vst.msk [vmem:[%s3548_s15 + $0x90] sm:$0xff] %vm800_vm7, %v1930_v18  ;;  %v1931_v48 = vmax.f32 %v1899_v44, 0.0  ;;  %v2560_v56 = vadd.f32 %v2518_v63, %v2474_v62  ;;  %v1435_v36 = vpop.f32.mrb[21].mxu1  ;;  %v2328_v18 = vld [vmem:[%s3522_s30 + $0x70] sm:$0xff]   ;;  %v2298_v62 = vunpack.c.l.bf16 %v2329_v10  ;;  %s2688_s30 = scalar_lea.vmem %s2687_s13, 8192 }
 0x1c9   : > { %1961 = vst.msk [vmem:[%s3548_s15 + $0x80] sm:$0xff] %vm800_vm7, %v1928_v47  ;;  %v1929_v45 = vmax.f32 %v1897_v43, 0.0  ;;  %v2561_v13 = vadd.f32 %v1697_v14, %v1435_v36  ;;  %v2475_v61 = vpop.f32.mrb[22].mxu1  ;;  %v2294_v36 = vunpack.c.l.bf16 %v2328_v18  ;;  %p2690_p2 = scmp.lt.s32.totalorder %s2688_s30, %s2682_s28 }
 0x1ca   : > { %1964 = vst.msk [vmem:[%s3548_s15 + $0x98] sm:$0xff] %vm800_vm7, %v1931_v48  ;;  %v1806_v11 = vadd.f32 %v2560_v56, %v3538_v30  ;;  %v2562_v59 = vadd.f32 %v2519_v23, %v2475_v61  ;;  %v1438_v35 = vpop.f32.mrb[23].mxu1  ;;  %v2299_v61 = vunpack.c.h.bf16 %v2329_v10 }
 0x1cb   : > { %1962 = vst.msk [vmem:[%s3548_s15 + $0x88] sm:$0xff] %vm800_vm7, %v1929_v45  ;;  %v1804_v55 = vadd.f32 %v2561_v13, %v3538_v30  ;;  %v2563_v19 = vadd.f32 %v1700_v29, %v1438_v35  ;;  %v2522_v7 = vpop.f32.mrb[24].mxu0  ;;  %v2295_v35 = vunpack.c.h.bf16 %v2328_v18  ;;  %p2691_p3 = por %p2690_p2, %p2689_p1 }
 0x1cc   : > { %v1902_v38 = vadd.f32 %v2282_v58, %v1806_v11  ;;  %v1807_v31 = vadd.f32 %v2562_v59, %v3538_v30  ;;  %v1713_v42 = vpop.f32.mrb[25].mxu0 }
 0x1cd   : > { %v1900_v25 = vadd.f32 %v2278_v12, %v1804_v55  ;;  %v1805_v51 = vadd.f32 %v2563_v19, %v3538_v30  ;;  %v2523_v37 = vpop.f32.mrb[26].mxu0  ;;  %p2692_p5 = pnand %p2691_p3, %p2685_p0 }
 0x1ce   : > { %v1934_v8 = vmax.f32 %v1902_v38, 0.0  ;;  %v1903_v60 = vadd.f32 %v2283_v34, %v1807_v31  ;;  %v1716_v52 = vpop.f32.mrb[27].mxu0 }
 0x1cf   : > { %v1932_v0 = vmax.f32 %v1900_v25, 0.0  ;;  %v1901_v24 = vadd.f32 %v2279_v22, %v1805_v51  ;;  %v2478_v50 = vpop.f32.mrb[24].mxu1 }
 0x1d0   : > { %1967 = vst.msk [vmem:[%s3548_s15 + $0xb0] sm:$0xff] %vm800_vm7, %v1934_v8  ;;  %v1935_v28 = vmax.f32 %v1903_v60, 0.0  ;;  %v2564_v54 = vadd.f32 %v2522_v7, %v2478_v50  ;;  %v1451_v1 = vpop.f32.mrb[25].mxu1 }
 0x1d1   : > { %1965 = vst.msk [vmem:[%s3548_s15 + $0xa0] sm:$0xff] %vm800_vm7, %v1932_v0  ;;  %v1933_v39 = vmax.f32 %v1901_v24, 0.0  ;;  %v2565_v9 = vadd.f32 %v1713_v42, %v1451_v1  ;;  %v2479_v20 = vpop.f32.mrb[26].mxu1 }
 0x1d2   : > { %1968 = vst.msk [vmem:[%s3548_s15 + $0xb8] sm:$0xff] %vm800_vm7, %v1935_v28  ;;  %v1810_v3 = vadd.f32 %v2564_v54, %v3538_v30  ;;  %v2566_v32 = vadd.f32 %v2523_v37, %v2479_v20  ;;  %v1454_v21 = vpop.f32.mrb[27].mxu1 }
 0x1d3   : > { %1966 = vst.msk [vmem:[%s3548_s15 + $0xa8] sm:$0xff] %vm800_vm7, %v1933_v39  ;;  %v1808_v57 = vadd.f32 %v2565_v9, %v3538_v30  ;;  %v2567_v15 = vadd.f32 %v1716_v52, %v1454_v21  ;;  %v2526_v5 = vpop.f32.mrb[28].mxu0 }
 0x1d4   : > { %v1906_v26 = vadd.f32 %v2290_v6, %v1810_v3  ;;  %v1811_v53 = vadd.f32 %v2566_v32, %v3538_v30  ;;  %v1729_v63 = vpop.f32.mrb[29].mxu0 }
 0x1d5   : > { %v1904_v33 = vadd.f32 %v2286_v4, %v1808_v57  ;;  %v1809_v2 = vadd.f32 %v2567_v15, %v3538_v30  ;;  %v2527_v14 = vpop.f32.mrb[30].mxu0 }
 0x1d6   : > { %v1938_v40 = vmax.f32 %v1906_v26, 0.0  ;;  %v1907_v23 = vadd.f32 %v2291_v49, %v1811_v53  ;;  %v1732_v27 = vpop.f32.mrb[31].mxu0 }
 0x1d7   : > { %v1936_v44 = vmax.f32 %v1904_v33, 0.0  ;;  %v1905_v29 = vadd.f32 %v2287_v46, %v1809_v2  ;;  %v2482_v17 = vpop.f32.mrb[28].mxu1 }
 0x1d8   : > { %1971 = vst.msk [vmem:[%s3548_s15 + $0xd0] sm:$0xff] %vm800_vm7, %v1938_v40  ;;  %v1939_v47 = vmax.f32 %v1907_v23, 0.0  ;;  %v2568_v43 = vadd.f32 %v2526_v5, %v2482_v17  ;;  %v1467_v48 = vpop.f32.mrb[29].mxu1 }
 0x1d9   : > { %1969 = vst.msk [vmem:[%s3548_s15 + $0xc0] sm:$0xff] %vm800_vm7, %v1936_v44  ;;  %v1937_v56 = vmax.f32 %v1905_v29, 0.0  ;;  %v2569_v58 = vadd.f32 %v1729_v63, %v1467_v48  ;;  %v2483_v45 = vpop.f32.mrb[30].mxu1 }
 0x1da   : > { %1972 = vst.msk [vmem:[%s3548_s15 + $0xd8] sm:$0xff] %vm800_vm7, %v1939_v47  ;;  %v1814_v13 = vadd.f32 %v2568_v43, %v3538_v30  ;;  %v2570_v12 = vadd.f32 %v2527_v14, %v2483_v45  ;;  %v1470_v11 = vpop.f32.mrb[31].mxu1 }
 0x1db   : > { %1970 = vst.msk [vmem:[%s3548_s15 + $0xc8] sm:$0xff] %vm800_vm7, %v1937_v56  ;;  %v1812_v59 = vadd.f32 %v2569_v58, %v3538_v30  ;;  %v2571_v34 = vadd.f32 %v1732_v27, %v1470_v11 }
 0x1dc   : > { %v1910_v55 = vadd.f32 %v2298_v62, %v1814_v13  ;;  %v1815_v19 = vadd.f32 %v2570_v12, %v3538_v30 }
 0x1dd   : > { %v1908_v22 = vadd.f32 %v2294_v36, %v1812_v59  ;;  %v1813_v7 = vadd.f32 %v2571_v34, %v3538_v30 }
 0x1de   : > { %v1942_v38 = vmax.f32 %v1910_v55, 0.0  ;;  %v1911_v31 = vadd.f32 %v2299_v61, %v1815_v19 }
 0x1df   : > { %v1940_v42 = vmax.f32 %v1908_v22, 0.0  ;;  %v1909_v25 = vadd.f32 %v2295_v35, %v1813_v7 }
 0x1e0   : > { %1975 = vst.msk [vmem:[%s3548_s15 + $0xf0] sm:$0xff] %vm800_vm7, %v1942_v38  ;;  %v1943_v51 = vmax.f32 %v1911_v31, 0.0 }
 0x1e1   : > { %1973 = vst.msk [vmem:[%s3548_s15 + $0xe0] sm:$0xff] %vm800_vm7, %v1940_v42  ;;  %v1941_v30 = vmax.f32 %v1909_v25, 0.0 }
 0x1e2   : > { %1976 = vst.msk [vmem:[%s3548_s15 + $0xf8] sm:$0xff] %vm800_vm7, %v1943_v51 }
 0x1e3   : > { %1974 = vst.msk [vmem:[%s3548_s15 + $0xe8] sm:$0xff] %vm800_vm7, %v1941_v30 }
 0x1e4   : > { %2695 = shalt.err (!%p2692_p5)
}
 0x1e5   : > { %s2696_s12 = scalar_lea.hbm %s3661_s27, 4096  ;;  %s2700_s16 = scalar_lea.hbm %s3725_s6, 8192 }
 0x1e6   : > { %p2697_p6 = scmp.ne.s32.totalorder %s3661_s27, %s2696_s12  ;;  %p2701_p10 = scmp.lt.u32.totalorder %s3661_s27, %s3725_s6 }
 0x1e7   : > { %p2702_p11 = scmp.lt.u32.totalorder %s2700_s16, %s2696_s12  ;;  %p2704_p13 = scmp.lt.u32.totalorder %s2696_s12, %s3661_s27 }
 0x1e8   : > { %p2698_p7 = pnand %p2697_p6, %p2843_p4 }
 0x1e9   : > { %p2703_p12 = por %p2702_p11, %p2701_p10 }
 0x1ea   : > { %p2699_p9 = pneg %p2698_p7 }
 0x1eb   : > { %p2705_p0 = por %p2704_p13, %p2703_p12 }
 0x1ed   : > { %p2706_p1 = pnand %p2705_p0, %p2699_p9 }
 0x1ef   : > { %2709 = shalt.err (!%p2706_p1)
}
 0x1f0   : > { %s2766_s19 = smov 128   ;;  %s2767_s20 = smov 8  }
 0x1f1   : > { %2604 = dma.vmem_to_hbm [thread:$0]  (%p2843_p4), %s3663_s18, 4096, %s3661_s27, %s3673_s24, %s2766_s19, %s2766_s19, %s2767_s20  }
 0x1f2 PF: > { %p2610_p2 = scmp.ge.s32.totalorder %s2760_s26, 2  ;;  %s2007_s28 = sand.u32 1, %s2740_s21  }
 0x1f3   : > { %s2008_s8 = scalar_lea.sflag [#allocation4], %s2007_s28 }
 0x1f4   : > { %p2607_p3 = pnand %p2610_p2, %p2850_p8 }
 0x1f6   : > { %2735 = dma.done.wait (!%p2607_p3), %s2008_s8, 4096  }
 0x1f7   : > { %2737 = vsyncadd (!%p2607_p3), %s2008_s8, 4294963200  ;;  %s19_s26 = sadd.s32 1, %s2760_s26   ;;  %s3738_s21 = smov %s2744_s22 }
 0x1f8   : > { %p16_p5 = scmp.ge.s32.totalorder %s19_s26, 4   ;;  %s3739_s22 = smov %s2748_s23 }
 0x1f9   : > { %s3740_s23 = smov %s2856_s10  ;;  %s3741_s24 = smov %s2756_s25 }
 0x1fa   : > { %s3742_s25 = smov %s3744_s29  ;;  %18 = sbr.rel (!%p16_p5) target bundleno = 4 (0x4), region = 92 }
 0x201   :  { %2013 = vsyncpa [#allocation4], 1 }
 0x202   :  { %2015 = vsyncpa [#allocation4 + $0x1], 1 }

// kernel: ftb_forward.3
= control target key start
LH: loop header
LB: loop body
LE: loop exit
PB: predicated region body
PF: predicated region fallthrough
CT: control target
= control target key end

     0   :  { %s2207_s12 = smov 0   ;;  %s2209_s13 = smov 0   ;;  %s2675_s0 = inlined_call_operand.vmem [shape: bf16[2,16,16,4], index: 0, kind: input, shape index: {}]   ;;  %s2676_s1 = inlined_call_operand.vmem [shape: bf16[1,3,12,32], index: 1, kind: input, shape index: {}]   ;;  %s2677_s2 = inlined_call_operand.vmem [shape: f32[1,1,32], index: 2, kind: input, shape index: {}]   ;;  %s2678_s3 = inlined_call_operand.vmem [shape: bf16[2,16,16,32], index: 3, kind: output, shape index: {}]  }
   0x1   :  { %s2211_s14 = smov 0  }
   0x2 LB: > { %s25_s15 = sadd.s32 1, %s2178_s13  ;;  %p1750_p0 = scmp.ge.s32.totalorder %s2182_s14, 1  ;;  %s2182_s14 = sphi %s2211_s14, %s13_s14   ;;  %s2178_s13 = sphi %s2209_s13, %s2684_s13   ;;  %s2174_s12 = sphi %s2207_s12, %s2683_s12  }
   0x3   : > { %p27_p1 = scmp.ge.s32.totalorder %s25_s15, 2  ;;  %p151_p2 = scmp.lt.s32.totalorder %s2182_s14, 3 }
   0x5   : > { %s2686_s15 = smov (%p27_p1, %s25_s15), 0  ;;  %p152_p3 = pnand %p1750_p0, %p151_p2 }
   0x6   : > { %p178_p4 = scmp.lt.s32.totalorder (!%p152_p3), %s2174_s12, 1  ;;  %vm700_vm0 = vcmask (!%p152_p3), 97280   ;;  %v2184_v0 = vmov (!%p152_p3), 0   ;;  %vm503_vm1 = vcmask (!%p152_p3), 1047552   ;;  %vm504_vm2 = vsmask.f32 (!%p152_p3), 7424 }
   0x7   : > { %155 = sbr.rel (%p152_p3) target bundleno = 463 (0x1cf), region = 32  ;;  %701 = vst.msk [vmem:[#allocation2] sm:$0xff] (!%p152_p3), %vm700_vm0, %v2184_v0  ;;  %703 = vst.msk [vmem:[#allocation2 + $0x88] sm:$0xff] (!%p152_p3), %vm700_vm0, %v2184_v0  ;;  %v2240_v1 = vld [vmem:[%s2676_s1] sm:$0x3f] (!%p152_p3)   ;;  %vm817_vm3 = vcmask (!%p152_p3), 1045504  }
   0x8   : > { %2111 = vmatprep.subr.msk.bf16.mxu0 (!%p152_p3), %vm817_vm3, %v2240_v1  ;;  %v2248_v4 = vsel (!%p152_p3), %vm817_vm3, %v2240_v1, 0  ;;  %s2185_s22 = smov (!%p152_p3), 4   ;;  %vm2256_vm4 = vmand (!%p152_p3), %vm503_vm1, %vm504_vm2  ;;  %s2186_s23 = smov (!%p152_p3), 8   ;;  %vm436_vm5 = vcmask (!%p152_p3), 1040384   ;;  %vm437_vm6 = vsmask.f32 (!%p152_p3), 256 }
   0x9   : > { %1977 = vmatpush3.bf16.msra.mxu0 (!%p152_p3), %v2248_v4  ;;  %vm2397_vm7 = vmand (!%p152_p3), %vm436_vm5, %vm437_vm6  ;;  %vm602_vm8 = vcmask (!%p152_p3), 31744   ;;  %vm651_vm9 = vcmask (!%p152_p3), 64512   ;;  %vm1633_vm10 = vcmask (!%p152_p3), 257024  }
   0xe   : > { %s2688_s12 = smov (!%p178_p4, %s2174_s12), 1 }
   0xf   : > { %s1857_s16 = sshll.u32 %s2688_s12, 7 }
  0x10   : > { %s2235_s19 = scalar_lea.vmem %s2675_s0, %s1857_s16  ;;  %s2565_s5 = scalar_lea.vmem %s2678_s3, %s1857_s16 }
  0x11   : > { %v2141_v2 = vld [vmem:[%s2235_s19] sm:$0xff]   ;;  %v2142_v3 = vld [vmem:[%s2235_s19 + $0x8] sm:$0xff]   ;;  %v2143_v7 = vld [vmem:[%s2235_s19 + $0x10] sm:$0xff]  }
  0x12   : > { %522 = vrot.lane.b32.xlu0 %v2141_v2, %s2185_s22  ;;  %v309_v5 = vshrl.u32 %v2141_v2, 16  ;;  %v312_v6 = vshll.u32 %v2141_v2, 16  ;;  %v316_v8 = vshrl.u32 %v2142_v3, 16  ;;  %v319_v9 = vshll.u32 %v2142_v3, 16  ;;  %v2144_v10 = vld [vmem:[%s2235_s19 + $0x18] sm:$0xff]   ;;  %v2145_v19 = vld [vmem:[%s2235_s19 + $0x20] sm:$0xff]  }
  0x13   : > { %v323_v16 = vshrl.u32 %v2143_v7, 16  ;;  %v326_v17 = vshll.u32 %v2143_v7, 16  ;;  %v333_v20 = vshll.u32 %v2144_v10, 16  ;;  %v340_v28 = vshll.u32 %v2145_v19, 16  ;;  %v2146_v32 = vld [vmem:[%s2235_s19 + $0x28] sm:$0xff]   ;;  %v2278_v37 = vld [vmem:[%s2235_s19 + $0x30] sm:$0xff]  }
  0x14   : > { %v455_v11 = vrot.slane %v312_v6, 1  ;;  %v311_v12 = vrot.slane %v309_v5, 7  ;;  %v318_v14 = vrot.slane %v316_v8, 7  ;;  %v457_v15 = vrot.slane %v319_v9, 1  ;;  %v2148_v46 = vld [vmem:[%s2235_s19 + $0x38] sm:$0xff]   ;;  %v2149_v53 = vld [vmem:[%s2235_s19 + $0x40] sm:$0xff]  }
  0x15   : > { %v325_v23 = vrot.slane %v323_v16, 7  ;;  %v459_v24 = vrot.slane %v326_v17, 1  ;;  %v330_v30 = vshrl.u32 %v2144_v10, 16  ;;  %v461_v31 = vrot.slane %v333_v20, 1  ;;  %v2150_v61 = vld [vmem:[%s2235_s19 + $0x48] sm:$0xff]   ;;  %v2302_v62 = vld [vmem:[%s2235_s19 + $0x50] sm:$0xff]  }
  0x16   : > { %524 = vrot.lane.b32.xlu0 %v2142_v3, %s2185_s22  ;;  %v456_v18 = vor.u32 %v455_v11, %v309_v5  ;;  %v2262_v21 = vor.u32 %v312_v6, %v311_v12  ;;  %v458_v22 = vor.u32 %v457_v15, %v316_v8  ;;  %v2264_v25 = vor.u32 %v319_v9, %v318_v14  ;;  %v2158_v6 = vld [vmem:[%s2676_s1 + $0x8] sm:$0x3f]   ;;  %v2314_v11 = vld [vmem:[%s2235_s19 + $0x58] sm:$0xff]   ;;  %v2159_v12 = vld [vmem:[%s2676_s1 + $0x10] sm:$0x3f]  }
  0x17   : > { %v460_v27 = vor.u32 %v459_v24, %v323_v16  ;;  %v2273_v33 = vor.u32 %v326_v17, %v325_v23  ;;  %v337_v35 = vshrl.u32 %v2145_v19, 16  ;;  %v463_v36 = vrot.slane %v340_v28, 1  ;;  %2110 = vmatprep.subr.msk.bf16.mxu1 %vm817_vm3, %v2158_v6  ;;  %2113 = vmatprep.subr.msk.bf16.mxu0 %vm817_vm3, %v2159_v12 }
  0x18   : > { %v506_v26 = vsel %vm2256_vm4, %v456_v18, 0  ;;  %v507_v29 = vsel %vm2256_vm4, %v458_v22, 0  ;;  %v332_v38 = vrot.slane %v330_v30, 7  ;;  %v462_v39 = vor.u32 %v461_v31, %v330_v30 }
  0x19   : > { %570 = vrot.lane.b32.xlu1 %v506_v26, %s2186_s23  ;;  %v508_v34 = vsel %vm2256_vm4, %v460_v27, 0  ;;  %v347_v40 = vshll.u32 %v2146_v32, 16  ;;  %v464_v41 = vor.u32 %v463_v36, %v337_v35  ;;  %v344_v42 = vshrl.u32 %v2146_v32, 16  ;;  %v2153_v26 = vld [vmem:[%s2235_s19 + $0x60] sm:$0xff]  }
  0x1a   : > { %526 = vrot.lane.b32.xlu0 %v2143_v7, %s2185_s22  ;;  %v354_v43 = vshll.u32 %v2278_v37, 16  ;;  %v339_v44 = vrot.slane %v337_v35, 7  ;;  %v509_v47 = vsel %vm2256_vm4, %v462_v39, 0  ;;  %v2288_v49 = vor.u32 %v333_v20, %v332_v38  ;;  %v730_v7 = vld [vmem:[#allocation2] sm:$0xff] }
  0x1b   : > { %v346_v45 = vrot.slane %v344_v42, 7  ;;  %v465_v48 = vrot.slane %v347_v40, 1  ;;  %v510_v50 = vsel %vm2256_vm4, %v464_v41, 0  ;;  %v351_v51 = vshrl.u32 %v2278_v37, 16  ;;  %1978 = vmatprep.mubr.msk.bf16.mxu0 %vm700_vm0, %v730_v7 }
  0x1c   : > { %v467_v52 = vrot.slane %v354_v43, 1  ;;  %v2295_v54 = vor.u32 %v340_v28, %v339_v44  ;;  %v361_v56 = vshll.u32 %v2148_v46, 16  ;;  %v358_v59 = vshrl.u32 %v2148_v46, 16 }
  0x1d   : > { %572 = vrot.lane.b32.xlu1 %v507_v29, %s2186_s23  ;;  %v466_v55 = vor.u32 %v465_v48, %v344_v42  ;;  %v2298_v57 = vor.u32 %v347_v40, %v346_v45  ;;  %v368_v60 = vshll.u32 %v2149_v53, 16  ;;  %v353_v63 = vrot.slane %v351_v51, 7 }
  0x1e   : > { %574 = vrot.lane.b32.xlu0 %v508_v34, %s2186_s23  ;;  %v468_v58 = vor.u32 %v467_v52, %v351_v51  ;;  %v365_v0 = vshrl.u32 %v2149_v53, 16  ;;  %v360_v2 = vrot.slane %v358_v59, 7  ;;  %v372_v3 = vshrl.u32 %v2150_v61, 16 }
  0x1f   : > { %v379_v5 = vshrl.u32 %v2302_v62, 16  ;;  %v511_v8 = vsel %vm2256_vm4, %v466_v55, 0  ;;  %v469_v9 = vrot.slane %v361_v56, 1  ;;  %v471_v15 = vrot.slane %v368_v60, 1 }
  0x20   : > { %v512_v14 = vsel %vm2256_vm4, %v468_v58, 0  ;;  %v374_v16 = vrot.slane %v372_v3, 7  ;;  %v386_v18 = vshrl.u32 %v2314_v11, 16  ;;  %v375_v20 = vshll.u32 %v2150_v61, 16 }
  0x21   : > { %528 = vrot.lane.b32.xlu1 %v2144_v10, %s2185_s22  ;;  %v367_v10 = vrot.slane %v365_v0, 7  ;;  %v381_v17 = vrot.slane %v379_v5, 7  ;;  %v382_v22 = vshll.u32 %v2302_v62, 16  ;;  %v2329_v23 = vsel %vm817_vm3, %v2159_v12, 0 }
  0x22   : > { %530 = vrot.lane.b32.xlu0 %v2145_v19, %s2185_s22  ;;  %v819_v19 = vsel %vm817_vm3, %v2158_v6, 0  ;;  %v470_v24 = vor.u32 %v469_v9, %v358_v59  ;;  %v388_v27 = vrot.slane %v386_v18, 7  ;;  %v2335_v28 = vor.u32 %v354_v43, %v353_v63 }
  0x23   : > { %1943 = vmatpush3.bf16.msra.mxu1 %v819_v19  ;;  %v2337_v29 = vor.u32 %v361_v56, %v360_v2  ;;  %v472_v30 = vor.u32 %v471_v15, %v365_v0  ;;  %v2339_v31 = vor.u32 %v368_v60, %v367_v10  ;;  %v2343_v34 = vor.u32 %v382_v22, %v381_v17 }
  0x24   : > { %2112 = vmatprep.subr.msk.bf16.mxu1 %vm817_vm3, %v2240_v1  ;;  %v389_v35 = vshll.u32 %v2314_v11, 16  ;;  %v393_v36 = vshrl.u32 %v2153_v26, 16  ;;  %v513_v1 = vsel %vm2256_vm4, %v470_v24, 0  ;;  %v473_v38 = vrot.slane %v375_v20, 1 }
  0x25   : > { %576 = vrot.lane.b32.xlu1 %v509_v47, %s2186_s23  ;;  %v514_v41 = vsel %vm2256_vm4, %v472_v30, 0  ;;  %v475_v42 = vrot.slane %v382_v22, 1  ;;  %v396_v44 = vshll.u32 %v2153_v26, 16  ;;  %v2155_v47 = vld [vmem:[%s2235_s19 + $0x70] sm:$0xff]   ;;  %v439_v24 = vsel %vm2397_vm7, 0, %v2262_v21 }
  0x26   : > { %578 = vrot.lane.b32.xlu0 %v510_v50, %s2186_s23  ;;  %v395_v39 = vrot.slane %v393_v36, 7  ;;  %v2351_v40 = vor.u32 %v389_v35, %v388_v27  ;;  %v407_v52 = vshrl.u32 %v2155_v47, 16  ;;  %v477_v58 = vrot.slane %v389_v35, 1 }
  0x27   : > { %v476_v50 = vor.u32 %v475_v42, %v379_v5  ;;  %v479_v63 = vrot.slane %v396_v44, 1  ;;  %v410_v2 = vshll.u32 %v2155_v47, 16  ;;  %v440_v13 = vsel %vm2397_vm7, 0, %v2264_v25 }
  0x28   : > { %v2358_v48 = vor.u32 %v396_v44, %v395_v39  ;;  %v409_v59 = vrot.slane %v407_v52, 7  ;;  %v441_v35 = vsel %vm2397_vm7, 0, %v2273_v33  ;;  %v443_v42 = vsel %vm2397_vm7, 0, %v2295_v54 }
  0x29   : > { %532 = vrot.lane.b32.xlu1 %v2146_v32, %s2185_s22  ;;  %v2341_v32 = vor.u32 %v375_v20, %v374_v16  ;;  %v516_v60 = vsel %vm2256_vm4, %v476_v50, 0  ;;  %v483_v12 = vrot.slane %v410_v2, 1  ;;  %v1215_v20 = vld [vmem:[#allocation2 + $0x88] sm:$0xff] }
  0x2a   : > { %534 = vrot.lane.b32.xlu0 %v2278_v37, %s2185_s22  ;;  %v2154_v37 = vld [vmem:[%s2235_s19 + $0x68] sm:$0xff]   ;;  %v2372_v5 = vor.u32 %v410_v2, %v409_v59 }
  0x2b   : > { %v400_v43 = vshrl.u32 %v2154_v37, 16  ;;  %v403_v51 = vshll.u32 %v2154_v37, 16  ;;  %v484_v15 = vor.u32 %v483_v12, %v407_v52 }
  0x2d   : > { %580 = vrot.lane.b32.xlu1 %v511_v8, %s2186_s23  ;;  %v402_v45 = vrot.slane %v400_v43, 7  ;;  %v481_v9 = vrot.slane %v403_v51, 1  ;;  %v520_v17 = vsel %vm2256_vm4, %v484_v15, 0 }
  0x2e   : > { %582 = vrot.lane.b32.xlu0 %v512_v14, %s2186_s23 }
  0x2f   : > { %v2362_v55 = vor.u32 %v403_v51, %v402_v45  ;;  %v482_v14 = vor.u32 %v481_v9, %v400_v43  ;;  %v442_v43 = vsel %vm2397_vm7, 0, %v2288_v49 }
  0x31   : > { %536 = vrot.lane.b32.xlu1 %v2148_v46, %s2185_s22  ;;  %v474_v46 = vor.u32 %v473_v38, %v372_v3  ;;  %v478_v3 = vor.u32 %v477_v58, %v386_v18  ;;  %v444_v58 = vsel %vm2397_vm7, 0, %v2298_v57 }
  0x32   : > { %538 = vrot.lane.b32.xlu0 %v2149_v53, %s2185_s22  ;;  %v2156_v53 = vld [vmem:[%s2235_s19 + $0x78] sm:$0xff]  }
  0x33   : > { %v515_v56 = vsel %vm2256_vm4, %v474_v46, 0  ;;  %v414_v0 = vshrl.u32 %v2156_v53, 16  ;;  %v417_v6 = vshll.u32 %v2156_v53, 16  ;;  %v517_v8 = vsel %vm2256_vm4, %v478_v3, 0 }
  0x35   : > { %584 = vrot.lane.b32.xlu1 %v513_v1, %s2186_s23  ;;  %v485_v16 = vrot.slane %v417_v6, 1 }
  0x36   : > { %586 = vrot.lane.b32.xlu0 %v514_v41, %s2186_s23 }
  0x37   : > { %v486_v18 = vor.u32 %v485_v16, %v414_v0 }
  0x39   : > { %540 = vrot.lane.b32.xlu1 %v2150_v61, %s2185_s22  ;;  %v416_v61 = vrot.slane %v414_v0, 7  ;;  %v521_v19 = vsel %vm2256_vm4, %v486_v18, 0  ;;  %v448_v18 = vsel %vm2397_vm7, 0, %v2341_v32 }
  0x3a   : > { %542 = vrot.lane.b32.xlu0 %v2302_v62, %s2185_s22  ;;  %v480_v62 = vor.u32 %v479_v63, %v393_v36 }
  0x3b   : > { %v2376_v7 = vor.u32 %v417_v6, %v416_v61  ;;  %v446_v6 = vsel %vm2397_vm7, 0, %v2337_v29 }
  0x3c   : > { %v518_v10 = vsel %vm2256_vm4, %v480_v62, 0  ;;  %v447_v62 = vsel %vm2397_vm7, 0, %v2339_v31 }
  0x3d   : > { %588 = vrot.lane.b32.xlu1 %v515_v56, %s2186_s23  ;;  %v445_v56 = vsel %vm2397_vm7, 0, %v2335_v28 }
  0x3e   : > { %590 = vrot.lane.b32.xlu0 %v516_v60, %s2186_s23 }
  0x41   : > { %544 = vrot.lane.b32.xlu1 %v2314_v11, %s2185_s22  ;;  %v519_v11 = vsel %vm2256_vm4, %v482_v14, 0 }
  0x42   : > { %546 = vrot.lane.b32.xlu0 %v2153_v26, %s2185_s22 }
  0x45   : > { %592 = vrot.lane.b32.xlu1 %v517_v8, %s2186_s23 }
  0x46   : > { %594 = vrot.lane.b32.xlu0 %v518_v10, %s2186_s23 }
  0x49   : > { %548 = vrot.lane.b32.xlu1 %v2154_v37, %s2185_s22 }
  0x4a   : > { %550 = vrot.lane.b32.xlu0 %v2155_v47, %s2185_s22 }
  0x4d   : > { %596 = vrot.lane.b32.xlu1 %v519_v11, %s2186_s23 }
  0x4e   : > { %598 = vrot.lane.b32.xlu0 %v520_v17, %s2186_s23  ;;  %v449_v17 = vsel %vm2397_vm7, 0, %v2343_v34 }
  0x51   : > { %552 = vrot.lane.b32.xlu1 %v2156_v53, %s2185_s22 }
  0x55   : > { %600 = vrot.lane.b32.xlu1 %v521_v19, %s2186_s23 }
  0x84   : > { %v523_v22 = vpop.permute.xlu0 %522 }
  0x85   : > { %v605_v27 = vsel %vm602_vm8, %v439_v24, %v523_v22 }
  0x88   : > { %v525_v26 = vpop.permute.xlu0 %524 }
  0x89   : > { %v608_v1 = vsel %vm602_vm8, %v440_v13, %v525_v26 }
  0x8b   : > { %v571_v30 = vpop.permute.xlu1 %570 }
  0x8c   : > { %v653_v36 = vsel %vm651_vm9, %v605_v27, %v571_v30  ;;  %v527_v37 = vpop.permute.xlu0 %526 }
  0x8d   : > { %705 = vst.msk [vmem:[#allocation2 + $0x8] sm:$0xff] %vm700_vm0, %v653_v36  ;;  %v611_v21 = vsel %vm602_vm8, %v441_v35, %v527_v37  ;;  %v451_v36 = vsel %vm2397_vm7, 0, %v2358_v48  ;;  %v450_v37 = vsel %vm2397_vm7, 0, %v2351_v40 }
  0x8f   : > { %v573_v38 = vpop.permute.xlu1 %572 }
  0x90   : > { %v656_v39 = vsel %vm651_vm9, %v608_v1, %v573_v38  ;;  %v575_v41 = vpop.permute.xlu0 %574 }
  0x91   : > { %706 = vst.msk [vmem:[#allocation2 + $0x10] sm:$0xff] %vm700_vm0, %v656_v39  ;;  %v659_v25 = vsel %vm651_vm9, %v611_v21, %v575_v41 }
  0x92   : > { %707 = vst.msk [vmem:[#allocation2 + $0x18] sm:$0xff] %vm700_vm0, %v659_v25 }
  0x93   : > { %v529_v33 = vpop.permute.xlu1 %528 }
  0x94   : > { %v747_v44 = vld [vmem:[#allocation2 + $0x8] sm:$0xff]  ;;  %v531_v45 = vpop.permute.xlu0 %530  ;;  %v614_v47 = vsel %vm602_vm8, %v442_v43, %v529_v33  ;;  %v453_v43 = vsel %vm2397_vm7, 0, %v2372_v5 }
  0x95   : > { %1944 = vmatprep.mubr.msk.bf16.mxu1 %vm700_vm0, %v747_v44  ;;  %1979 = vmatmul.mubr.msk.bf16.vlgmr.msra.gmra.mrb[0].mxu0 %vm700_vm0, %v747_v44  ;;  %v617_v46 = vsel %vm602_vm8, %v443_v42, %v531_v45  ;;  %v452_v44 = vsel %vm2397_vm7, 0, %v2362_v55 }
  0x96   : > { %2011 = vmatpush3.bf16.msra.mxu0 %v2329_v23 }
  0x97   : > { %v577_v50 = vpop.permute.xlu1 %576 }
  0x98   : > { %v662_v51 = vsel %vm651_vm9, %v614_v47, %v577_v50  ;;  %v748_v54 = vld [vmem:[#allocation2 + $0x10] sm:$0xff]  ;;  %v579_v52 = vpop.permute.xlu0 %578 }
  0x99   : > { %708 = vst.msk [vmem:[#allocation2 + $0x20] sm:$0xff] %vm700_vm0, %v662_v51  ;;  %1945 = vmatmul.mubr.msk.bf16.vlgmr.msra.gmra.mrb[0].mxu1 %vm700_vm0, %v748_v54  ;;  %1982 = vmatprep.mubr.msk.bf16.mxu0 %vm700_vm0, %v748_v54  ;;  %v665_v49 = vsel %vm651_vm9, %v617_v46, %v579_v52  ;;  %v749_v53 = vld [vmem:[#allocation2 + $0x18] sm:$0xff] }
  0x9a   : > { %2045 = vmatpush3.bf16.msra.mxu1 %v2248_v4  ;;  %709 = vst.msk [vmem:[#allocation2 + $0x28] sm:$0xff] %vm700_vm0, %v665_v49  ;;  %1948 = vmatprep.mubr.msk.bf16.mxu1 %vm700_vm0, %v749_v53 }
  0x9b   : > { %v533_v23 = vpop.permute.xlu1 %532 }
  0x9c   : > { %v535_v59 = vpop.permute.xlu0 %534  ;;  %v620_v4 = vsel %vm602_vm8, %v444_v58, %v533_v23 }
  0x9d   : > { %1983 = vmatmul.mubr.msk.bf16.gmra.mrb[4].mxu0 %vm700_vm0, %v749_v53  ;;  %v623_v60 = vsel %vm602_vm8, %v445_v56, %v535_v59 }
  0x9f   : > { %v581_v63 = vpop.permute.xlu1 %580 }
  0xa0   : > { %v668_v0 = vsel %vm651_vm9, %v620_v4, %v581_v63  ;;  %v750_v2 = vld [vmem:[#allocation2 + $0x20] sm:$0xff]  ;;  %v583_v61 = vpop.permute.xlu0 %582 }
  0xa1   : > { %710 = vst.msk [vmem:[#allocation2 + $0x30] sm:$0xff] %vm700_vm0, %v668_v0  ;;  %1949 = vmatmul.mubr.msk.bf16.gmra.mrb[4].mxu1 %vm700_vm0, %v750_v2  ;;  %1986 = vmatprep.mubr.msk.bf16.mxu0 %vm700_vm0, %v750_v2  ;;  %v671_v57 = vsel %vm651_vm9, %v623_v60, %v583_v61  ;;  %v751_v28 = vld [vmem:[#allocation2 + $0x28] sm:$0xff] }
  0xa2   : > { %711 = vst.msk [vmem:[#allocation2 + $0x38] sm:$0xff] %vm700_vm0, %v671_v57  ;;  %1952 = vmatprep.mubr.msk.bf16.mxu1 %vm700_vm0, %v751_v28 }
  0xa3   : > { %v537_v3 = vpop.permute.xlu1 %536 }
  0xa4   : > { %v539_v8 = vpop.permute.xlu0 %538  ;;  %v626_v10 = vsel %vm602_vm8, %v446_v6, %v537_v3 }
  0xa5   : > { %1987 = vmatmul.mubr.msk.bf16.gmra.mrb[8].mxu0 %vm700_vm0, %v751_v28  ;;  %v629_v9 = vsel %vm602_vm8, %v447_v62, %v539_v8 }
  0xa7   : > { %v585_v12 = vpop.permute.xlu1 %584 }
  0xa8   : > { %v674_v14 = vsel %vm651_vm9, %v626_v10, %v585_v12  ;;  %v752_v15 = vld [vmem:[#allocation2 + $0x30] sm:$0xff]  ;;  %v587_v11 = vpop.permute.xlu0 %586 }
  0xa9   : > { %712 = vst.msk [vmem:[#allocation2 + $0x40] sm:$0xff] %vm700_vm0, %v674_v14  ;;  %1953 = vmatmul.mubr.msk.bf16.gmra.mrb[8].mxu1 %vm700_vm0, %v752_v15  ;;  %1990 = vmatprep.mubr.msk.bf16.mxu0 %vm700_vm0, %v752_v15  ;;  %v677_v29 = vsel %vm651_vm9, %v629_v9, %v587_v11  ;;  %v753_v31 = vld [vmem:[#allocation2 + $0x38] sm:$0xff] }
  0xaa   : > { %713 = vst.msk [vmem:[#allocation2 + $0x48] sm:$0xff] %vm700_vm0, %v677_v29  ;;  %1956 = vmatprep.mubr.msk.bf16.mxu1 %vm700_vm0, %v753_v31  ;;  %v2557_v29 = vld [vmem:[%s2677_s2] ss:$0 sm:$0xff] }
  0xab   : > { %v541_v16 = vpop.permute.xlu1 %540 }
  0xac   : > { %v543_v19 = vpop.permute.xlu0 %542  ;;  %v632_v24 = vsel %vm602_vm8, %v448_v18, %v541_v16 }
  0xad   : > { %1991 = vmatmul.mubr.msk.bf16.gmra.mrb[12].mxu0 %vm700_vm0, %v753_v31  ;;  %v635_v22 = vsel %vm602_vm8, %v449_v17, %v543_v19 }
  0xae   : > { %2012 = vmatprep.mubr.msk.bf16.mxu0 %vm700_vm0, %v748_v54 }
  0xaf   : > { %v589_v26 = vpop.permute.xlu1 %588 }
  0xb0   : > { %v680_v27 = vsel %vm651_vm9, %v632_v24, %v589_v26  ;;  %v754_v13 = vld [vmem:[#allocation2 + $0x40] sm:$0xff]  ;;  %v591_v30 = vpop.permute.xlu0 %590 }
  0xb1   : > { %714 = vst.msk [vmem:[#allocation2 + $0x50] sm:$0xff] %vm700_vm0, %v680_v27  ;;  %1957 = vmatmul.mubr.msk.bf16.gmra.mrb[12].mxu1 %vm700_vm0, %v754_v13  ;;  %v683_v32 = vsel %vm651_vm9, %v635_v22, %v591_v30  ;;  %v755_v34 = vld [vmem:[#allocation2 + $0x48] sm:$0xff] }
  0xb2   : > { %715 = vst.msk [vmem:[#allocation2 + $0x58] sm:$0xff] %vm700_vm0, %v683_v32  ;;  %1960 = vmatprep.mubr.msk.bf16.mxu1 %vm700_vm0, %v755_v34 }
  0xb3   : > { %v545_v35 = vpop.permute.xlu1 %544 }
  0xb4   : > { %v547_v1 = vpop.permute.xlu0 %546  ;;  %v638_v38 = vsel %vm602_vm8, %v450_v37, %v545_v35 }
  0xb5   : > { %2013 = vmatmul.mubr.msk.bf16.vlgmr.msra.gmra.mrb[0].mxu0 %vm700_vm0, %v749_v53  ;;  %v641_v21 = vsel %vm602_vm8, %v451_v36, %v547_v1  ;;  %v454_v53 = vsel %vm2397_vm7, 0, %v2376_v7 }
  0xb6   : > { %2016 = vmatprep.mubr.msk.bf16.mxu0 %vm700_vm0, %v750_v2 }
  0xb7   : > { %v593_v39 = vpop.permute.xlu1 %592 }
  0xb8   : > { %v686_v41 = vsel %vm651_vm9, %v638_v38, %v593_v39  ;;  %v756_v25 = vld [vmem:[#allocation2 + $0x50] sm:$0xff]  ;;  %v595_v33 = vpop.permute.xlu0 %594 }
  0xb9   : > { %716 = vst.msk [vmem:[#allocation2 + $0x60] sm:$0xff] %vm700_vm0, %v686_v41  ;;  %1961 = vmatmul.mubr.msk.bf16.gmra.mrb[16].mxu1 %vm700_vm0, %v756_v25  ;;  %v689_v40 = vsel %vm651_vm9, %v641_v21, %v595_v33  ;;  %v757_v48 = vld [vmem:[#allocation2 + $0x58] sm:$0xff] }
  0xba   : > { %717 = vst.msk [vmem:[#allocation2 + $0x68] sm:$0xff] %vm700_vm0, %v689_v40  ;;  %1964 = vmatprep.mubr.msk.bf16.mxu1 %vm700_vm0, %v757_v48 }
  0xbb   : > { %v549_v42 = vpop.permute.xlu1 %548 }
  0xbc   : > { %v551_v45 = vpop.permute.xlu0 %550  ;;  %v644_v47 = vsel %vm602_vm8, %v452_v44, %v549_v42 }
  0xbd   : > { %2017 = vmatmul.mubr.msk.bf16.gmra.mrb[4].mxu0 %vm700_vm0, %v751_v28  ;;  %v647_v46 = vsel %vm602_vm8, %v453_v43, %v551_v45 }
  0xbe   : > { %2020 = vmatprep.mubr.msk.bf16.mxu0 %vm700_vm0, %v752_v15 }
  0xbf   : > { %v597_v50 = vpop.permute.xlu1 %596 }
  0xc0   : > { %v692_v51 = vsel %vm651_vm9, %v644_v47, %v597_v50  ;;  %v758_v54 = vld [vmem:[#allocation2 + $0x60] sm:$0xff]  ;;  %v599_v52 = vpop.permute.xlu0 %598 }
  0xc1   : > { %718 = vst.msk [vmem:[#allocation2 + $0x70] sm:$0xff] %vm700_vm0, %v692_v51  ;;  %1965 = vmatmul.mubr.msk.bf16.gmra.mrb[20].mxu1 %vm700_vm0, %v758_v54  ;;  %v695_v55 = vsel %vm651_vm9, %v647_v46, %v599_v52  ;;  %v759_v5 = vld [vmem:[#allocation2 + $0x68] sm:$0xff] }
  0xc2   : > { %719 = vst.msk [vmem:[#allocation2 + $0x78] sm:$0xff] %vm700_vm0, %v695_v55  ;;  %1968 = vmatprep.mubr.msk.bf16.mxu1 %vm700_vm0, %v759_v5 }
  0xc3   : > { %v553_v49 = vpop.permute.xlu1 %552 }
  0xc4   : > { %v650_v23 = vsel %vm602_vm8, %v454_v53, %v553_v49 }
  0xc5   : > { %2021 = vmatmul.mubr.msk.bf16.gmra.mrb[8].mxu0 %vm700_vm0, %v753_v31 }
  0xc6   : > { %2024 = vmatprep.mubr.msk.bf16.mxu0 %vm700_vm0, %v754_v13 }
  0xc7   : > { %v601_v56 = vpop.permute.xlu1 %600 }
  0xc8   : > { %v698_v58 = vsel %vm651_vm9, %v650_v23, %v601_v56  ;;  %v760_v59 = vld [vmem:[#allocation2 + $0x70] sm:$0xff] }
  0xc9   : > { %720 = vst.msk [vmem:[#allocation2 + $0x80] sm:$0xff] %vm700_vm0, %v698_v58  ;;  %1969 = vmatmul.mubr.msk.bf16.gmra.mrb[24].mxu1 %vm700_vm0, %v760_v59  ;;  %v761_v60 = vld [vmem:[#allocation2 + $0x78] sm:$0xff] }
  0xca   : > { %1972 = vmatprep.mubr.msk.bf16.mxu1 %vm700_vm0, %v761_v60 }
  0xcd   : > { %2025 = vmatmul.mubr.msk.bf16.gmra.mrb[12].mxu0 %vm700_vm0, %v755_v34 }
  0xce   : > { %2028 = vmatprep.mubr.msk.bf16.mxu0 %vm700_vm0, %v756_v25 }
  0xd0   : > { %v762_v7 = vld [vmem:[#allocation2 + $0x80] sm:$0xff] }
  0xd1   : > { %1973 = vmatmul.mubr.msk.bf16.gmra.mrb[28].mxu1 %vm700_vm0, %v762_v7 }
  0xd2   : > { %1994 = vmatprep.mubr.msk.bf16.mxu1 %vm700_vm0, %v754_v13 }
  0xd5   : > { %2029 = vmatmul.mubr.msk.bf16.gmra.mrb[16].mxu0 %vm700_vm0, %v757_v48 }
  0xd6   : > { %2032 = vmatprep.mubr.msk.bf16.mxu0 %vm700_vm0, %v758_v54 }
  0xd9   : > { %1995 = vmatmul.mubr.msk.bf16.vlgmr.msra.gmra.mrb[16].mxu1 %vm700_vm0, %v755_v34 }
  0xda   : > { %1998 = vmatprep.mubr.msk.bf16.mxu1 %vm700_vm0, %v756_v25 }
  0xdd   : > { %2033 = vmatmul.mubr.msk.bf16.gmra.mrb[20].mxu0 %vm700_vm0, %v759_v5 }
  0xde   : > { %2036 = vmatprep.mubr.msk.bf16.mxu0 %vm700_vm0, %v760_v59 }
  0xe1   : > { %1999 = vmatmul.mubr.msk.bf16.gmra.mrb[20].mxu1 %vm700_vm0, %v757_v48 }
  0xe2   : > { %2002 = vmatprep.mubr.msk.bf16.mxu1 %vm700_vm0, %v758_v54 }
  0xe5   : > { %2037 = vmatmul.mubr.msk.bf16.gmra.mrb[24].mxu0 %vm700_vm0, %v761_v60 }
  0xe6   : > { %2040 = vmatprep.mubr.msk.bf16.mxu0 %vm700_vm0, %v762_v7 }
  0xe9   : > { %2003 = vmatmul.mubr.msk.bf16.gmra.mrb[24].mxu1 %vm700_vm0, %v759_v5 }
  0xea   : > { %2006 = vmatprep.mubr.msk.bf16.mxu1 %vm700_vm0, %v760_v59 }
  0xed   : > { %2041 = vmatmul.mubr.msk.bf16.gmra.mrb[28].mxu0 %vm700_vm0, %v1215_v20 }
  0xf1   : > { %2007 = vmatmul.mubr.msk.bf16.gmra.mrb[28].mxu1 %vm700_vm0, %v761_v60 }
 0x16c   : > { %v1946_v4 = vpop.f32.mrb[0].mxu1 }
 0x16d   : > { %v855_v63 = vpop.f32.mrb[1].mxu1 }
 0x16e   : > { %v1947_v0 = vpop.f32.mrb[2].mxu1 }
 0x16f   : > { %v858_v2 = vpop.f32.mrb[3].mxu1 }
 0x174   : > { %v1950_v61 = vpop.f32.mrb[4].mxu1 }
 0x175   : > { %v871_v57 = vpop.f32.mrb[5].mxu1 }
 0x176   : > { %v1951_v28 = vpop.f32.mrb[6].mxu1 }
 0x177   : > { %v874_v3 = vpop.f32.mrb[7].mxu1 }
 0x17c   : > { %v1954_v62 = vpop.f32.mrb[8].mxu1 }
 0x17d   : > { %v887_v6 = vpop.f32.mrb[9].mxu1 }
 0x17e   : > { %v1955_v8 = vpop.f32.mrb[10].mxu1 }
 0x17f   : > { %v890_v9 = vpop.f32.mrb[11].mxu1 }
 0x184   : > { %v2546_v10 = vpop.f32.mrb[12].mxu1 }
 0x185   : > { %v2548_v12 = vpop.f32.mrb[13].mxu1 }
 0x186   : > { %v2550_v14 = vpop.f32.mrb[14].mxu1 }
 0x187   : > { %v2552_v15 = vpop.f32.mrb[15].mxu1 }
 0x188   : > { %v2014_v11 = vpop.f32.mrb[0].mxu0 }
 0x189   : > { %v2046_v31 = vadd.f32 %v2014_v11, %v1946_v4  ;;  %v1306_v16 = vpop.f32.mrb[1].mxu0 }
 0x18a   : > { %v2047_v17 = vadd.f32 %v1306_v16, %v855_v63  ;;  %v2015_v18 = vpop.f32.mrb[2].mxu0 }
 0x18b   : > { %v1475_v19 = vadd.f32 %v2046_v31, %v2557_v29  ;;  %v2048_v22 = vadd.f32 %v2015_v18, %v1947_v0  ;;  %v1309_v24 = vpop.f32.mrb[3].mxu0 }
 0x18c   : > { %v1473_v26 = vadd.f32 %v2047_v17, %v2557_v29  ;;  %v2049_v27 = vadd.f32 %v1309_v24, %v858_v2 }
 0x18d   : > { %v1861_v13 = vpack.c.bf16 %v1475_v19, %v1475_v19  ;;  %v1476_v30 = vadd.f32 %v2048_v22, %v2557_v29 }
 0x18e   : > { %v1859_v32 = vpack.c.bf16 %v1473_v26, %v1473_v26  ;;  %v1474_v34 = vadd.f32 %v2049_v27, %v2557_v29 }
 0x18f   : > { %1636 = vst.msk [vmem:[%s2565_s5 + $0x8] sm:$0xf] %vm1633_vm10, %v1861_v13  ;;  %v1862_v35 = vpack.c.bf16 %v1476_v30, %v1476_v30 }
 0x190   : > { %1634 = vst.msk [vmem:[%s2565_s5] sm:$0xf] %vm1633_vm10, %v1859_v32  ;;  %v1860_v36 = vpack.c.bf16 %v1474_v34, %v1474_v34  ;;  %v2018_v37 = vpop.f32.mrb[4].mxu0 }
 0x191   : > { %1637 = vst.msk [vmem:[%s2565_s5 + $0xc] sm:$0xf] %vm1633_vm10, %v1862_v35  ;;  %v2050_v1 = vadd.f32 %v2018_v37, %v1950_v61  ;;  %v1322_v21 = vpop.f32.mrb[5].mxu0 }
 0x192   : > { %1635 = vst.msk [vmem:[%s2565_s5 + $0x4] sm:$0xf] %vm1633_vm10, %v1860_v36  ;;  %v2051_v38 = vadd.f32 %v1322_v21, %v871_v57  ;;  %v2019_v39 = vpop.f32.mrb[6].mxu0 }
 0x193   : > { %v1479_v41 = vadd.f32 %v2050_v1, %v2557_v29  ;;  %v2052_v25 = vadd.f32 %v2019_v39, %v1951_v28  ;;  %v1325_v33 = vpop.f32.mrb[7].mxu0 }
 0x194   : > { %v1477_v40 = vadd.f32 %v2051_v38, %v2557_v29  ;;  %v2053_v48 = vadd.f32 %v1325_v33, %v874_v3 }
 0x195   : > { %v1865_v42 = vpack.c.bf16 %v1479_v41, %v1479_v41  ;;  %v1480_v43 = vadd.f32 %v2052_v25, %v2557_v29 }
 0x196   : > { %v1863_v44 = vpack.c.bf16 %v1477_v40, %v1477_v40  ;;  %v1478_v45 = vadd.f32 %v2053_v48, %v2557_v29 }
 0x197   : > { %1640 = vst.msk [vmem:[%s2565_s5 + $0x18] sm:$0xf] %vm1633_vm10, %v1865_v42  ;;  %v1866_v46 = vpack.c.bf16 %v1480_v43, %v1480_v43 }
 0x198   : > { %1638 = vst.msk [vmem:[%s2565_s5 + $0x10] sm:$0xf] %vm1633_vm10, %v1863_v44  ;;  %v1864_v47 = vpack.c.bf16 %v1478_v45, %v1478_v45  ;;  %v2022_v50 = vpop.f32.mrb[8].mxu0 }
 0x199   : > { %1641 = vst.msk [vmem:[%s2565_s5 + $0x1c] sm:$0xf] %vm1633_vm10, %v1866_v46  ;;  %v2054_v51 = vadd.f32 %v2022_v50, %v1954_v62  ;;  %v1338_v54 = vpop.f32.mrb[9].mxu0 }
 0x19a   : > { %1639 = vst.msk [vmem:[%s2565_s5 + $0x14] sm:$0xf] %vm1633_vm10, %v1864_v47  ;;  %v2055_v52 = vadd.f32 %v1338_v54, %v887_v6  ;;  %v2023_v55 = vpop.f32.mrb[10].mxu0 }
 0x19b   : > { %v1483_v5 = vadd.f32 %v2054_v51, %v2557_v29  ;;  %v2056_v49 = vadd.f32 %v2023_v55, %v1955_v8  ;;  %v1341_v53 = vpop.f32.mrb[11].mxu0 }
 0x19c   : > { %v1481_v23 = vadd.f32 %v2055_v52, %v2557_v29  ;;  %v2057_v56 = vadd.f32 %v1341_v53, %v890_v9 }
 0x19d   : > { %v1869_v58 = vpack.c.bf16 %v1483_v5, %v1483_v5  ;;  %v1484_v59 = vadd.f32 %v2056_v49, %v2557_v29 }
 0x19e   : > { %v1867_v60 = vpack.c.bf16 %v1481_v23, %v1481_v23  ;;  %v1482_v7 = vadd.f32 %v2057_v56, %v2557_v29 }
 0x19f   : > { %1644 = vst.msk [vmem:[%s2565_s5 + $0x28] sm:$0xf] %vm1633_vm10, %v1869_v58  ;;  %v1870_v20 = vpack.c.bf16 %v1484_v59, %v1484_v59 }
 0x1a0   : > { %1642 = vst.msk [vmem:[%s2565_s5 + $0x20] sm:$0xf] %vm1633_vm10, %v1867_v60  ;;  %v1868_v4 = vpack.c.bf16 %v1482_v7, %v1482_v7  ;;  %v2026_v63 = vpop.f32.mrb[12].mxu0 }
 0x1a1   : > { %1645 = vst.msk [vmem:[%s2565_s5 + $0x2c] sm:$0xf] %vm1633_vm10, %v1870_v20  ;;  %v2058_v0 = vadd.f32 %v2026_v63, %v2546_v10  ;;  %v1354_v2 = vpop.f32.mrb[13].mxu0 }
 0x1a2   : > { %1643 = vst.msk [vmem:[%s2565_s5 + $0x24] sm:$0xf] %vm1633_vm10, %v1868_v4  ;;  %v2059_v61 = vadd.f32 %v1354_v2, %v2548_v12  ;;  %v2027_v57 = vpop.f32.mrb[14].mxu0 }
 0x1a3   : > { %v1487_v28 = vadd.f32 %v2058_v0, %v2557_v29  ;;  %v2060_v3 = vadd.f32 %v2027_v57, %v2550_v14  ;;  %v1357_v62 = vpop.f32.mrb[15].mxu0 }
 0x1a4   : > { %v1485_v6 = vadd.f32 %v2059_v61, %v2557_v29  ;;  %v2061_v8 = vadd.f32 %v1357_v62, %v2552_v15 }
 0x1a5   : > { %v1873_v9 = vpack.c.bf16 %v1487_v28, %v1487_v28  ;;  %v1488_v10 = vadd.f32 %v2060_v3, %v2557_v29 }
 0x1a6   : > { %v1871_v11 = vpack.c.bf16 %v1485_v6, %v1485_v6  ;;  %v1486_v31 = vadd.f32 %v2061_v8, %v2557_v29 }
 0x1a7   : > { %1648 = vst.msk [vmem:[%s2565_s5 + $0x38] sm:$0xf] %vm1633_vm10, %v1873_v9  ;;  %v1874_v12 = vpack.c.bf16 %v1488_v10, %v1488_v10 }
 0x1a8   : > { %1646 = vst.msk [vmem:[%s2565_s5 + $0x30] sm:$0xf] %vm1633_vm10, %v1871_v11  ;;  %v1872_v16 = vpack.c.bf16 %v1486_v31, %v1486_v31  ;;  %v2030_v17 = vpop.f32.mrb[16].mxu0 }
 0x1a9   : > { %1649 = vst.msk [vmem:[%s2565_s5 + $0x3c] sm:$0xf] %vm1633_vm10, %v1874_v12  ;;  %v1370_v14 = vpop.f32.mrb[17].mxu0 }
 0x1aa   : > { %1647 = vst.msk [vmem:[%s2565_s5 + $0x34] sm:$0xf] %vm1633_vm10, %v1872_v16  ;;  %v2031_v18 = vpop.f32.mrb[18].mxu0 }
 0x1ab   : > { %v1373_v15 = vpop.f32.mrb[19].mxu0 }
 0x1ac   : > { %v1996_v19 = vpop.f32.mrb[16].mxu1 }
 0x1ad   : > { %v2062_v22 = vadd.f32 %v2030_v17, %v1996_v19  ;;  %v1136_v24 = vpop.f32.mrb[17].mxu1 }
 0x1ae   : > { %v2063_v26 = vadd.f32 %v1370_v14, %v1136_v24  ;;  %v1997_v27 = vpop.f32.mrb[18].mxu1 }
 0x1af   : > { %v1491_v13 = vadd.f32 %v2062_v22, %v2557_v29  ;;  %v2064_v30 = vadd.f32 %v2031_v18, %v1997_v27  ;;  %v1139_v32 = vpop.f32.mrb[19].mxu1 }
 0x1b0   : > { %v1489_v34 = vadd.f32 %v2063_v26, %v2557_v29  ;;  %v2065_v35 = vadd.f32 %v1373_v15, %v1139_v32  ;;  %v2034_v36 = vpop.f32.mrb[20].mxu0 }
 0x1b1   : > { %v1877_v37 = vpack.c.bf16 %v1491_v13, %v1491_v13  ;;  %v1492_v1 = vadd.f32 %v2064_v30, %v2557_v29  ;;  %v1386_v21 = vpop.f32.mrb[21].mxu0 }
 0x1b2   : > { %v1875_v38 = vpack.c.bf16 %v1489_v34, %v1489_v34  ;;  %v1490_v39 = vadd.f32 %v2065_v35, %v2557_v29  ;;  %v2035_v41 = vpop.f32.mrb[22].mxu0 }
 0x1b3   : > { %1652 = vst.msk [vmem:[%s2565_s5 + $0x48] sm:$0xf] %vm1633_vm10, %v1877_v37  ;;  %v1878_v25 = vpack.c.bf16 %v1492_v1, %v1492_v1  ;;  %v1389_v33 = vpop.f32.mrb[23].mxu0 }
 0x1b4   : > { %1650 = vst.msk [vmem:[%s2565_s5 + $0x40] sm:$0xf] %vm1633_vm10, %v1875_v38  ;;  %v1876_v40 = vpack.c.bf16 %v1490_v39, %v1490_v39  ;;  %v2000_v48 = vpop.f32.mrb[20].mxu1 }
 0x1b5   : > { %1653 = vst.msk [vmem:[%s2565_s5 + $0x4c] sm:$0xf] %vm1633_vm10, %v1878_v25  ;;  %v2066_v42 = vadd.f32 %v2034_v36, %v2000_v48  ;;  %v1152_v43 = vpop.f32.mrb[21].mxu1 }
 0x1b6   : > { %1651 = vst.msk [vmem:[%s2565_s5 + $0x44] sm:$0xf] %vm1633_vm10, %v1876_v40  ;;  %v2067_v44 = vadd.f32 %v1386_v21, %v1152_v43  ;;  %v2001_v45 = vpop.f32.mrb[22].mxu1 }
 0x1b7   : > { %v1495_v46 = vadd.f32 %v2066_v42, %v2557_v29  ;;  %v2068_v47 = vadd.f32 %v2035_v41, %v2001_v45  ;;  %v1155_v50 = vpop.f32.mrb[23].mxu1 }
 0x1b8   : > { %v1493_v51 = vadd.f32 %v2067_v44, %v2557_v29  ;;  %v2069_v54 = vadd.f32 %v1389_v33, %v1155_v50  ;;  %v2038_v52 = vpop.f32.mrb[24].mxu0 }
 0x1b9   : > { %v1881_v55 = vpack.c.bf16 %v1495_v46, %v1495_v46  ;;  %v1496_v5 = vadd.f32 %v2068_v47, %v2557_v29  ;;  %v1402_v49 = vpop.f32.mrb[25].mxu0 }
 0x1ba   : > { %v1879_v53 = vpack.c.bf16 %v1493_v51, %v1493_v51  ;;  %v1494_v23 = vadd.f32 %v2069_v54, %v2557_v29  ;;  %v2039_v56 = vpop.f32.mrb[26].mxu0 }
 0x1bb   : > { %1656 = vst.msk [vmem:[%s2565_s5 + $0x58] sm:$0xf] %vm1633_vm10, %v1881_v55  ;;  %v1882_v58 = vpack.c.bf16 %v1496_v5, %v1496_v5  ;;  %v1405_v59 = vpop.f32.mrb[27].mxu0 }
 0x1bc   : > { %1654 = vst.msk [vmem:[%s2565_s5 + $0x50] sm:$0xf] %vm1633_vm10, %v1879_v53  ;;  %v1880_v60 = vpack.c.bf16 %v1494_v23, %v1494_v23  ;;  %v2004_v7 = vpop.f32.mrb[24].mxu1 }
 0x1bd   : > { %1657 = vst.msk [vmem:[%s2565_s5 + $0x5c] sm:$0xf] %vm1633_vm10, %v1882_v58  ;;  %v2070_v20 = vadd.f32 %v2038_v52, %v2004_v7  ;;  %v1168_v4 = vpop.f32.mrb[25].mxu1 }
 0x1be   : > { %1655 = vst.msk [vmem:[%s2565_s5 + $0x54] sm:$0xf] %vm1633_vm10, %v1880_v60  ;;  %v2071_v63 = vadd.f32 %v1402_v49, %v1168_v4  ;;  %v2005_v0 = vpop.f32.mrb[26].mxu1 }
 0x1bf   : > { %v1499_v2 = vadd.f32 %v2070_v20, %v2557_v29  ;;  %v2072_v61 = vadd.f32 %v2039_v56, %v2005_v0  ;;  %v1171_v57 = vpop.f32.mrb[27].mxu1 }
 0x1c0   : > { %v1497_v28 = vadd.f32 %v2071_v63, %v2557_v29  ;;  %v2073_v3 = vadd.f32 %v1405_v59, %v1171_v57  ;;  %v2042_v62 = vpop.f32.mrb[28].mxu0 }
 0x1c1   : > { %v1885_v6 = vpack.c.bf16 %v1499_v2, %v1499_v2  ;;  %v1500_v8 = vadd.f32 %v2072_v61, %v2557_v29  ;;  %v1418_v9 = vpop.f32.mrb[29].mxu0 }
 0x1c2   : > { %v1883_v10 = vpack.c.bf16 %v1497_v28, %v1497_v28  ;;  %v1498_v11 = vadd.f32 %v2073_v3, %v2557_v29  ;;  %v2043_v31 = vpop.f32.mrb[30].mxu0 }
 0x1c3   : > { %1660 = vst.msk [vmem:[%s2565_s5 + $0x68] sm:$0xf] %vm1633_vm10, %v1885_v6  ;;  %v1886_v12 = vpack.c.bf16 %v1500_v8, %v1500_v8  ;;  %v1421_v16 = vpop.f32.mrb[31].mxu0 }
 0x1c4   : > { %1658 = vst.msk [vmem:[%s2565_s5 + $0x60] sm:$0xf] %vm1633_vm10, %v1883_v10  ;;  %v1884_v17 = vpack.c.bf16 %v1498_v11, %v1498_v11  ;;  %v2008_v14 = vpop.f32.mrb[28].mxu1 }
 0x1c5   : > { %1661 = vst.msk [vmem:[%s2565_s5 + $0x6c] sm:$0xf] %vm1633_vm10, %v1886_v12  ;;  %v2074_v18 = vadd.f32 %v2042_v62, %v2008_v14  ;;  %v1184_v15 = vpop.f32.mrb[29].mxu1 }
 0x1c6   : > { %1659 = vst.msk [vmem:[%s2565_s5 + $0x64] sm:$0xf] %vm1633_vm10, %v1884_v17  ;;  %v2075_v19 = vadd.f32 %v1418_v9, %v1184_v15  ;;  %v2009_v22 = vpop.f32.mrb[30].mxu1 }
 0x1c7   : > { %v1503_v24 = vadd.f32 %v2074_v18, %v2557_v29  ;;  %v2076_v26 = vadd.f32 %v2043_v31, %v2009_v22  ;;  %v1187_v27 = vpop.f32.mrb[31].mxu1 }
 0x1c8   : > { %v1501_v13 = vadd.f32 %v2075_v19, %v2557_v29  ;;  %v2077_v30 = vadd.f32 %v1421_v16, %v1187_v27 }
 0x1c9   : > { %v1889_v32 = vpack.c.bf16 %v1503_v24, %v1503_v24  ;;  %v1504_v34 = vadd.f32 %v2076_v26, %v2557_v29 }
 0x1ca   : > { %v1887_v35 = vpack.c.bf16 %v1501_v13, %v1501_v13  ;;  %v1502_v36 = vadd.f32 %v2077_v30, %v2557_v29 }
 0x1cb   : > { %1664 = vst.msk [vmem:[%s2565_s5 + $0x78] sm:$0xf] %vm1633_vm10, %v1889_v32  ;;  %v1890_v37 = vpack.c.bf16 %v1504_v34, %v1504_v34 }
 0x1cc   : > { %1662 = vst.msk [vmem:[%s2565_s5 + $0x70] sm:$0xf] %vm1633_vm10, %v1887_v35  ;;  %v1888_v1 = vpack.c.bf16 %v1502_v36, %v1502_v36 }
 0x1cd   : > { %1665 = vst.msk [vmem:[%s2565_s5 + $0x7c] sm:$0xf] %vm1633_vm10, %v1890_v37 }
 0x1ce   : > { %1663 = vst.msk [vmem:[%s2565_s5 + $0x74] sm:$0xf] %vm1633_vm10, %v1888_v1 }
 0x1cf PF: > { %s13_s14 = sadd.s32 1, %s2182_s14   ;;  %s2683_s12 = smov %s2178_s13 }
 0x1d0   : > { %p10_p5 = scmp.ge.s32.totalorder %s13_s14, 4   ;;  %s2684_s13 = smov %s2686_s15 }
 0x1d2   :  { %12 = sbr.rel (!%p10_p5) target bundleno = 2 (0x2), region = 72 }

// kernel: ftb_forward.4
= control target key start
LH: loop header
LB: loop body
LE: loop exit
PB: predicated region body
PF: predicated region fallthrough
CT: control target
= control target key end

     0   :  { %s2837_s18 = smov 0   ;;  %s2839_s19 = smov 0   ;;  %s3601_s0 = inlined_call_operand.vmem [shape: bf16[2,16,16,32], index: 0, kind: input, shape index: {}]   ;;  %s3602_s1 = inlined_call_operand.vmem [shape: bf16[1,3,96,32], index: 1, kind: input, shape index: {}]   ;;  %s3603_s2 = inlined_call_operand.vmem [shape: f32[1,1,32], index: 2, kind: input, shape index: {}]   ;;  %s3604_s3 = inlined_call_operand.vmem [shape: bf16[2,16,16,32], index: 3, kind: output, shape index: {0}]   ;;  %s3605_s4 = inlined_call_operand.vmem [shape: f32[2,1,32], index: 4, kind: output, shape index: {1}]   ;;  %s3606_s5 = inlined_call_operand.vmem [shape: f32[2,1,32], index: 5, kind: output, shape index: {2}]  }
   0x1   :  { %s2841_s20 = smov 0  }
   0x2 LB: > { %s28_s21 = sadd.s32 1, %s2798_s19  ;;  %p2242_p0 = scmp.ge.s32.totalorder %s2802_s20, 1  ;;  %s2802_s20 = sphi %s2841_s20, %s16_s20   ;;  %s2798_s19 = sphi %s2839_s19, %s3612_s19   ;;  %s2794_s18 = sphi %s2837_s18, %s3611_s18  }
   0x3   : > { %p30_p1 = scmp.ge.s32.totalorder %s28_s21, 2  ;;  %p210_p2 = scmp.lt.s32.totalorder %s2802_s20, 3 }
   0x5   : > { %s3614_s21 = smov (%p30_p1, %s28_s21), 0  ;;  %p211_p3 = pnand %p2242_p0, %p210_p2 }
   0x6   : > { %p253_p4 = scmp.lt.s32.totalorder (!%p211_p3), %s2794_s18, 1  ;;  %v2858_v0 = vld [vmem:[%s3602_s1] sm:$0xff] (!%p211_p3)   ;;  %v2763_v1 = vld [vmem:[%s3602_s1 + $0x30] sm:$0xff] (!%p211_p3)   ;;  %v2870_v2 = vld [vmem:[%s3602_s1 + $0x8] sm:$0xff] (!%p211_p3)   ;;  %vm590_vm0 = vcmask (!%p211_p3), 1047552   ;;  %s2804_s13 = smov (!%p211_p3), 32  }
   0x7   : > { %214 = sbr.rel (%p211_p3) target bundleno = 501 (0x1f5), region = 32  ;;  %2571 = vmatprep.subr.bf16.mxu0 (!%p211_p3), %v2858_v0  ;;  %2527 = vmatprep.subr.bf16.mxu1 (!%p211_p3), %v2763_v1  ;;  %v2765_v3 = vld [vmem:[%s3602_s1 + $0x38] sm:$0xff] (!%p211_p3)   ;;  %v2887_v4 = vld [vmem:[%s3602_s1 + $0x10] sm:$0xff] (!%p211_p3)   ;;  %vm591_vm1 = vsmask.f32 (!%p211_p3), 7424  ;;  %v2767_v34 = vld [vmem:[%s3602_s1 + $0x40] sm:$0xff] (!%p211_p3)  }
   0x8   : > { %2572 = vmatpush3.bf16.msra.mxu0 (!%p211_p3), %v2858_v0  ;;  %2528 = vmatpush3.bf16.msra.mxu1 (!%p211_p3), %v2763_v1  ;;  %vm2917_vm2 = vmand (!%p211_p3), %vm590_vm0, %vm591_vm1  ;;  %v2931_v48 = vld [vmem:[%s3602_s1 + $0x18] sm:$0xff] (!%p211_p3)   ;;  %v2769_v49 = vld [vmem:[%s3602_s1 + $0x48] sm:$0xff] (!%p211_p3)   ;;  %s2805_s26 = smov (!%p211_p3), 64   ;;  %vm803_vm3 = vcmask (!%p211_p3), 785408   ;;  %vm523_vm4 = vcmask (!%p211_p3), 1040384   ;;  %vm705_vm7 = vcmask (!%p211_p3), 261120  }
   0x9   : > { %2573 = vmatprep.subr.bf16.mxu0 (!%p211_p3), %v2870_v2  ;;  %2529 = vmatprep.subr.bf16.mxu1 (!%p211_p3), %v2765_v3  ;;  %v2944_v53 = vld [vmem:[%s3602_s1 + $0x20] sm:$0xff] (!%p211_p3)   ;;  %v2771_v62 = vld [vmem:[%s3602_s1 + $0x50] sm:$0xff] (!%p211_p3)   ;;  %vm524_vm5 = vsmask.f32 (!%p211_p3), 256  ;;  %vm754_vm8 = vcmask (!%p211_p3), 523264   ;;  %vm1849_vm9 = vcmask (!%p211_p3), 257024  }
   0xa   : > { %vm3186_vm6 = vmand (!%p211_p3), %vm523_vm4, %vm524_vm5  ;;  %vm1984_vm10 = vcmask (!%p211_p3), 253952  }
   0xc   : > { %2574 = vmatpush3.bf16.msra.mxu0 (!%p211_p3), %v2870_v2  ;;  %2530 = vmatpush3.bf16.msra.mxu1 (!%p211_p3), %v2765_v3 }
   0xd   : > { %2575 = vmatprep.subr.bf16.mxu0 (!%p211_p3), %v2887_v4  ;;  %2531 = vmatprep.subr.bf16.mxu1 (!%p211_p3), %v2767_v34 }
   0xe   : > { %s3616_s18 = smov (!%p253_p4, %s2794_s18), 1 }
   0xf   : > { %s2348_s28 = sshll.u32 %s3616_s18, 7  ;;  %s271_s30 = scalar_lea.vmem %s3605_s4, %s3616_s18 }
  0x10   : > { %s2881_s8 = scalar_lea.vmem %s3601_s0, %s2348_s28  ;;  %2576 = vmatpush3.bf16.msra.mxu0 %v2887_v4  ;;  %2532 = vmatpush3.bf16.msra.mxu1 %v2767_v34  ;;  %s3412_s27 = scalar_lea.vmem %s3604_s3, %s2348_s28 }
  0x11   : > { %v2383_v5 = vld [vmem:[%s2881_s8] sm:$0xff]   ;;  %v2446_v6 = vld [vmem:[%s2881_s8 + $0x8] sm:$0xff]   ;;  %v2447_v7 = vld [vmem:[%s2881_s8 + $0x10] sm:$0xff]   ;;  %2577 = vmatprep.subr.bf16.mxu0 %v2931_v48  ;;  %2533 = vmatprep.subr.bf16.mxu1 %v2769_v49  ;;  %s277_s9 = scalar_lea.vmem %s3606_s5, %s3616_s18 }
  0x12   : > { %v2384_v8 = vunpack.c.l.bf16 %v2383_v5  ;;  %v2385_v9 = vunpack.c.h.bf16 %v2383_v5  ;;  %v2388_v10 = vunpack.c.l.bf16 %v2446_v6  ;;  %v2389_v11 = vunpack.c.h.bf16 %v2446_v6  ;;  %v2448_v12 = vld [vmem:[%s2881_s8 + $0x18] sm:$0xff]   ;;  %v2449_v17 = vld [vmem:[%s2881_s8 + $0x20] sm:$0xff]   ;;  %v2450_v22 = vld [vmem:[%s2881_s8 + $0x28] sm:$0xff]  }
  0x13   : > { %v2392_v13 = vunpack.c.l.bf16 %v2447_v7  ;;  %v2393_v14 = vunpack.c.h.bf16 %v2447_v7  ;;  %v2396_v15 = vunpack.c.l.bf16 %v2448_v12  ;;  %v2397_v16 = vunpack.c.h.bf16 %v2448_v12  ;;  %v2451_v47 = vld [vmem:[%s2881_s8 + $0x30] sm:$0xff]   ;;  %v2452_v52 = vld [vmem:[%s2881_s8 + $0x38] sm:$0xff]   ;;  %v2453_v61 = vld [vmem:[%s2881_s8 + $0x40] sm:$0xff]  }
  0x14   : > { %v347_v18 = vmax.f32 %v2384_v8, 0.0  ;;  %v348_v19 = vmax.f32 %v2385_v9, 0.0  ;;  %v349_v20 = vmax.f32 %v2388_v10, 0.0  ;;  %v350_v21 = vmax.f32 %v2389_v11, 0.0  ;;  %2578 = vmatpush3.bf16.msra.mxu0 %v2931_v48  ;;  %2534 = vmatpush3.bf16.msra.mxu1 %v2769_v49  ;;  %v2979_v10 = vld [vmem:[%s3602_s1 + $0x28] sm:$0xff]  }
  0x15   : > { %v351_v23 = vmax.f32 %v2392_v13, 0.0  ;;  %v352_v24 = vmax.f32 %v2393_v14, 0.0  ;;  %v353_v25 = vmax.f32 %v2396_v15, 0.0  ;;  %v354_v26 = vmax.f32 %v2397_v16, 0.0  ;;  %2579 = vmatprep.subr.bf16.mxu0 %v2944_v53  ;;  %2535 = vmatprep.subr.bf16.mxu1 %v2771_v62 }
  0x16   : > { %v2897_v27 = vpack.c.bf16 %v348_v19, %v347_v18  ;;  %v2899_v28 = vpack.c.bf16 %v350_v21, %v349_v20  ;;  %v2400_v29 = vunpack.c.l.bf16 %v2449_v17  ;;  %v2401_v30 = vunpack.c.h.bf16 %v2449_v17  ;;  %v2773_v17 = vld [vmem:[%s3602_s1 + $0x58] sm:$0xff]   ;;  %v2454_v19 = vld [vmem:[%s2881_s8 + $0x48] sm:$0xff]  }
  0x17   : > { %v2902_v31 = vpack.c.bf16 %v352_v24, %v351_v23  ;;  %v2904_v32 = vpack.c.bf16 %v354_v26, %v353_v25  ;;  %v2404_v33 = vunpack.c.l.bf16 %v2450_v22  ;;  %v2405_v46 = vunpack.c.h.bf16 %v2450_v22  ;;  %v2997_v24 = vld [vmem:[%s3602_s1 + $0x60] sm:$0xff]  }
  0x18   : > { %625 = vrot.lane.b32.xlu0 %v2897_v27, %s2804_s13  ;;  %v396_v35 = vshrl.u32 %v2897_v27, 16  ;;  %v399_v36 = vshll.u32 %v2897_v27, 16  ;;  %v403_v37 = vshrl.u32 %v2899_v28, 16  ;;  %v406_v38 = vshll.u32 %v2899_v28, 16  ;;  %2580 = vmatpush3.bf16.msra.mxu0 %v2944_v53 }
  0x19   : > { %v410_v40 = vshrl.u32 %v2902_v31, 16  ;;  %v413_v41 = vshll.u32 %v2902_v31, 16  ;;  %v355_v42 = vmax.f32 %v2400_v29, 0.0  ;;  %v356_v43 = vmax.f32 %v2401_v30, 0.0  ;;  %2536 = vmatpush3.bf16.msra.mxu1 %v2771_v62  ;;  %2581 = vmatprep.subr.bf16.mxu0 %v2979_v10 }
  0x1a   : > { %v542_v44 = vrot.slane %v399_v36, 1  ;;  %v544_v45 = vrot.slane %v406_v38, 1  ;;  %v420_v56 = vshll.u32 %v2904_v32, 16  ;;  %v357_v57 = vmax.f32 %v2404_v33, 0.0  ;;  %2537 = vmatprep.subr.bf16.mxu1 %v2773_v17  ;;  %v2455_v33 = vld [vmem:[%s2881_s8 + $0x50] sm:$0xff]  }
  0x1b   : > { %v546_v50 = vrot.slane %v413_v41, 1  ;;  %v2938_v51 = vpack.c.bf16 %v356_v43, %v355_v42  ;;  %v417_v59 = vshrl.u32 %v2904_v32, 16  ;;  %v358_v5 = vmax.f32 %v2405_v46, 0.0 }
  0x1c   : > { %627 = vrot.lane.b32.xlu0 %v2899_v28, %s2804_s13  ;;  %v543_v54 = vor.u32 %v542_v44, %v396_v35  ;;  %v545_v55 = vor.u32 %v544_v45, %v403_v37  ;;  %v548_v7 = vrot.slane %v420_v56, 1  ;;  %v2408_v9 = vunpack.c.l.bf16 %v2451_v47  ;;  %2582 = vmatpush3.bf16.msra.mxu0 %v2979_v10 }
  0x1d   : > { %v547_v58 = vor.u32 %v546_v50, %v410_v40  ;;  %v427_v60 = vshll.u32 %v2938_v51, 16  ;;  %v424_v3 = vshrl.u32 %v2938_v51, 16  ;;  %v2983_v11 = vpack.c.bf16 %v358_v5, %v357_v57  ;;  %2538 = vmatpush3.bf16.msra.mxu1 %v2773_v17  ;;  %2615 = vmatprep.subr.bf16.mxu0 %v2997_v24 }
  0x1e   : > { %v593_v63 = vsel %vm2917_vm2, %v543_v54, 0  ;;  %v594_v1 = vsel %vm2917_vm2, %v545_v55, 0  ;;  %v2409_v12 = vunpack.c.h.bf16 %v2451_v47  ;;  %v2412_v13 = vunpack.c.l.bf16 %v2452_v52  ;;  %2659 = vmatprep.subr.bf16.mxu1 %v2858_v0 }
  0x1f   : > { %673 = vrot.lane.b32.xlu1 %v593_v63, %s2805_s26  ;;  %v595_v6 = vsel %vm2917_vm2, %v547_v58, 0  ;;  %v550_v8 = vrot.slane %v427_v60, 1  ;;  %v359_v14 = vmax.f32 %v2408_v9, 0.0  ;;  %v2413_v15 = vunpack.c.h.bf16 %v2452_v52 }
  0x20   : > { %629 = vrot.lane.b32.xlu0 %v2902_v31, %s2804_s13  ;;  %v2416_v16 = vunpack.c.l.bf16 %v2453_v61  ;;  %v360_v18 = vmax.f32 %v2409_v12, 0.0  ;;  %v549_v20 = vor.u32 %v548_v7, %v417_v59  ;;  %v361_v21 = vmax.f32 %v2412_v13, 0.0 }
  0x21   : > { %v362_v22 = vmax.f32 %v2413_v15, 0.0  ;;  %v2417_v23 = vunpack.c.h.bf16 %v2453_v61  ;;  %v551_v25 = vor.u32 %v550_v8, %v424_v3  ;;  %v434_v29 = vshll.u32 %v2983_v11, 16 }
  0x22   : > { %v3002_v26 = vpack.c.bf16 %v360_v18, %v359_v14  ;;  %v363_v30 = vmax.f32 %v2416_v16, 0.0  ;;  %v2420_v43 = vunpack.c.l.bf16 %v2454_v19  ;;  %v2421_v44 = vunpack.c.h.bf16 %v2454_v19  ;;  %v2457_v18 = vld [vmem:[%s2881_s8 + $0x60] sm:$0xff]  }
  0x23   : > { %675 = vrot.lane.b32.xlu1 %v594_v1, %s2805_s26  ;;  %v3006_v34 = vpack.c.bf16 %v362_v22, %v361_v21  ;;  %v364_v42 = vmax.f32 %v2417_v23, 0.0  ;;  %v596_v46 = vsel %vm2917_vm2, %v549_v20, 0  ;;  %v2424_v49 = vunpack.c.l.bf16 %v2455_v33 }
  0x24   : > { %677 = vrot.lane.b32.xlu0 %v595_v6, %s2805_s26  ;;  %v441_v45 = vshll.u32 %v3002_v26, 16  ;;  %v365_v47 = vmax.f32 %v2420_v43, 0.0  ;;  %v431_v50 = vshrl.u32 %v2983_v11, 16  ;;  %v552_v52 = vrot.slane %v434_v29, 1  ;;  %v2456_v6 = vld [vmem:[%s2881_s8 + $0x58] sm:$0xff]   ;;  %v2458_v43 = vld [vmem:[%s2881_s8 + $0x68] sm:$0xff]  }
  0x25   : > { %v448_v54 = vshll.u32 %v3006_v34, 16  ;;  %v366_v55 = vmax.f32 %v2421_v44, 0.0  ;;  %v597_v57 = vsel %vm2917_vm2, %v551_v25, 0  ;;  %v438_v58 = vshrl.u32 %v3002_v26, 16 }
  0x26   : > { %v554_v61 = vrot.slane %v441_v45, 1  ;;  %v3027_v62 = vpack.c.bf16 %v364_v42, %v363_v30  ;;  %v2425_v1 = vunpack.c.h.bf16 %v2455_v33  ;;  %v367_v5 = vmax.f32 %v2424_v49, 0.0 }
  0x27   : > { %631 = vrot.lane.b32.xlu1 %v2904_v32, %s2804_s13  ;;  %v3029_v63 = vpack.c.bf16 %v366_v55, %v365_v47  ;;  %v553_v7 = vor.u32 %v552_v52, %v431_v50  ;;  %v445_v8 = vshrl.u32 %v3006_v34, 16  ;;  %v556_v9 = vrot.slane %v448_v54, 1 }
  0x28   : > { %633 = vrot.lane.b32.xlu0 %v2938_v51, %s2804_s13  ;;  %v368_v12 = vmax.f32 %v2425_v1, 0.0  ;;  %v555_v13 = vor.u32 %v554_v61, %v438_v58  ;;  %v455_v14 = vshll.u32 %v3027_v62, 16  ;;  %v2428_v16 = vunpack.c.l.bf16 %v2456_v6 }
  0x29   : > { %v462_v15 = vshll.u32 %v3029_v63, 16  ;;  %v2429_v17 = vunpack.c.h.bf16 %v2456_v6  ;;  %v398_v19 = vrot.slane %v396_v35, 7  ;;  %v405_v20 = vrot.slane %v403_v37, 7 }
  0x2a   : > { %v3046_v21 = vrot.slane %v410_v40, 7  ;;  %v3050_v22 = vpack.c.bf16 %v368_v12, %v367_v5  ;;  %v3054_v23 = vrot.slane %v417_v59, 7  ;;  %v598_v35 = vsel %vm2917_vm2, %v553_v7, 0  ;;  %v2459_v59 = vld [vmem:[%s2881_s8 + $0x70] sm:$0xff]  }
  0x2b   : > { %679 = vrot.lane.b32.xlu1 %v596_v46, %s2805_s26  ;;  %v557_v37 = vor.u32 %v556_v9, %v445_v8  ;;  %v452_v25 = vshrl.u32 %v3027_v62, 16  ;;  %v599_v40 = vsel %vm2917_vm2, %v555_v13, 0  ;;  %v558_v30 = vrot.slane %v455_v14, 1  ;;  %v2460_v9 = vld [vmem:[%s2881_s8 + $0x78] sm:$0xff]  }
  0x2c   : > { %681 = vrot.lane.b32.xlu0 %v597_v57, %s2805_s26  ;;  %v2432_v33 = vunpack.c.l.bf16 %v2457_v18  ;;  %v2433_v42 = vunpack.c.h.bf16 %v2457_v18  ;;  %v459_v44 = vshrl.u32 %v3029_v63, 16  ;;  %v560_v46 = vrot.slane %v462_v15, 1 }
  0x2d   : > { %v369_v47 = vmax.f32 %v2428_v16, 0.0  ;;  %v370_v49 = vmax.f32 %v2429_v17, 0.0  ;;  %v426_v52 = vrot.slane %v424_v3, 7  ;;  %v433_v55 = vrot.slane %v431_v50, 7 }
  0x2e   : > { %v3073_v57 = vrot.slane %v438_v58, 7  ;;  %v469_v61 = vshll.u32 %v3050_v22, 16  ;;  %v2436_v1 = vunpack.c.l.bf16 %v2458_v43  ;;  %v2437_v5 = vunpack.c.h.bf16 %v2458_v43 }
  0x2f   : > { %635 = vrot.lane.b32.xlu1 %v2983_v11, %s2804_s13  ;;  %v2440_v6 = vunpack.c.l.bf16 %v2459_v59  ;;  %v2441_v7 = vunpack.c.h.bf16 %v2459_v59  ;;  %v447_v12 = vrot.slane %v445_v8, 7  ;;  %v559_v13 = vor.u32 %v558_v30, %v452_v25 }
  0x30   : > { %637 = vrot.lane.b32.xlu0 %v3002_v26, %s2804_s13  ;;  %v371_v16 = vmax.f32 %v2432_v33, 0.0  ;;  %v372_v17 = vmax.f32 %v2433_v42, 0.0  ;;  %v600_v3 = vsel %vm2917_vm2, %v557_v37, 0  ;;  %v454_v50 = vrot.slane %v452_v25, 7 }
  0x31   : > { %v561_v58 = vor.u32 %v560_v46, %v459_v44  ;;  %v3080_v18 = vpack.c.bf16 %v370_v49, %v369_v47  ;;  %v2444_v43 = vunpack.c.l.bf16 %v2460_v9  ;;  %v2445_v8 = vunpack.c.h.bf16 %v2460_v9 }
  0x32   : > { %v373_v30 = vmax.f32 %v2436_v1, 0.0  ;;  %v374_v33 = vmax.f32 %v2437_v5, 0.0  ;;  %v375_v37 = vmax.f32 %v2440_v6, 0.0  ;;  %v376_v25 = vmax.f32 %v2441_v7, 0.0 }
  0x33   : > { %683 = vrot.lane.b32.xlu1 %v598_v35, %s2805_s26  ;;  %v466_v35 = vshrl.u32 %v3050_v22, 16  ;;  %v601_v42 = vsel %vm2917_vm2, %v559_v13, 0  ;;  %v391_v59 = vpack.c.bf16 %v372_v17, %v371_v16  ;;  %v3093_v46 = vor.u32 %v399_v36, %v398_v19 }
  0x34   : > { %685 = vrot.lane.b32.xlu0 %v599_v40, %s2805_s26  ;;  %v562_v40 = vrot.slane %v469_v61, 1  ;;  %v3097_v47 = vor.u32 %v406_v38, %v405_v20  ;;  %v461_v49 = vrot.slane %v459_v44, 7  ;;  %v602_v9 = vsel %vm2917_vm2, %v561_v58, 0 }
  0x35   : > { %v473_v1 = vshrl.u32 %v3080_v18, 16  ;;  %v476_v5 = vshll.u32 %v3080_v18, 16  ;;  %v468_v6 = vrot.slane %v466_v35, 7  ;;  %v377_v13 = vmax.f32 %v2444_v43, 0.0 }
  0x36   : > { %v563_v7 = vor.u32 %v562_v40, %v466_v35  ;;  %v378_v27 = vmax.f32 %v2445_v8, 0.0  ;;  %v392_v28 = vpack.c.bf16 %v374_v33, %v373_v30  ;;  %v393_v38 = vpack.c.bf16 %v376_v25, %v375_v37 }
  0x37   : > { %639 = vrot.lane.b32.xlu1 %v3006_v34, %s2804_s13  ;;  %v475_v36 = vrot.slane %v473_v1, 7  ;;  %v3108_v19 = vor.u32 %v413_v41, %v3046_v21  ;;  %v480_v20 = vshrl.u32 %v391_v59, 16  ;;  %v483_v44 = vshll.u32 %v391_v59, 16 }
  0x38   : > { %641 = vrot.lane.b32.xlu0 %v3027_v62, %s2804_s13  ;;  %v3113_v16 = vor.u32 %v420_v56, %v3054_v23  ;;  %v564_v17 = vrot.slane %v476_v5, 1  ;;  %v494_v58 = vshrl.u32 %v393_v38, 16  ;;  %v2806_v35 = vmov 0  }
  0x39   : > { %804 = vst.msk [vmem:[#allocation2] sm:$0xff] %vm803_vm3, %v2806_v35  ;;  %806 = vst.msk [vmem:[#allocation2 + $0x88] sm:$0xff] %vm803_vm3, %v2806_v35  ;;  %v3119_v31 = vor.u32 %v427_v60, %v426_v52  ;;  %v603_v32 = vsel %vm2917_vm2, %v563_v7, 0  ;;  %v482_v41 = vrot.slane %v480_v20, 7  ;;  %v394_v56 = vpack.c.bf16 %v378_v27, %v377_v13  ;;  %v2775_v35 = vld [vmem:[%s3602_s1 + $0x68] sm:$0xff]  }
  0x3a   : > { %v3127_v21 = vor.u32 %v434_v29, %v433_v55  ;;  %v496_v40 = vrot.slane %v494_v58, 7  ;;  %v3134_v51 = vor.u32 %v441_v45, %v3073_v57  ;;  %v3138_v60 = vor.u32 %v448_v54, %v447_v12 }
  0x3b   : > { %687 = vrot.lane.b32.xlu1 %v600_v3, %s2805_s26  ;;  %v487_v3 = vshrl.u32 %v392_v28, 16  ;;  %v566_v52 = vrot.slane %v483_v44, 1  ;;  %v501_v43 = vshrl.u32 %v394_v56, 16  ;;  %v3142_v11 = vor.u32 %v455_v14, %v454_v50 }
  0x3c   : > { %689 = vrot.lane.b32.xlu0 %v601_v42, %s2805_s26  ;;  %v3146_v29 = vor.u32 %v462_v15, %v461_v49  ;;  %v490_v55 = vshll.u32 %v392_v28, 16  ;;  %v497_v8 = vshll.u32 %v393_v38, 16  ;;  %v3150_v26 = vor.u32 %v469_v61, %v468_v6 }
  0x3d   : > { %v489_v23 = vrot.slane %v487_v3, 7  ;;  %v3152_v45 = vor.u32 %v476_v5, %v475_v36  ;;  %v503_v34 = vrot.slane %v501_v43, 7  ;;  %v3155_v54 = vor.u32 %v483_v44, %v482_v41 }
  0x3e   : > { %v565_v62 = vor.u32 %v564_v17, %v473_v1  ;;  %v567_v15 = vor.u32 %v566_v52, %v480_v20  ;;  %v504_v57 = vshll.u32 %v394_v56, 16  ;;  %v568_v50 = vrot.slane %v490_v55, 1 }
  0x3f   : > { %643 = vrot.lane.b32.xlu1 %v3029_v63, %s2804_s13  ;;  %v3158_v14 = vor.u32 %v490_v55, %v489_v23  ;;  %v3160_v63 = vor.u32 %v497_v8, %v496_v40  ;;  %v570_v33 = vrot.slane %v497_v8, 1  ;;  %v526_v6 = vsel %vm3186_vm6, 0, %v3093_v46 }
  0x40   : > { %645 = vrot.lane.b32.xlu0 %v3050_v22, %s2804_s13  ;;  %v863_v12 = vld [vmem:[#allocation2] sm:$0xff]  ;;  %v3165_v22 = vor.u32 %v504_v57, %v503_v34  ;;  %v604_v61 = vsel %vm2917_vm2, %v565_v62, 0  ;;  %v605_v30 = vsel %vm2917_vm2, %v567_v15, 0  ;;  %v569_v37 = vor.u32 %v568_v50, %v487_v3  ;;  %v1403_v1 = vld [vmem:[#allocation2 + $0x88] sm:$0xff] }
  0x41   : > { %2583 = vmatprep.mubr.msk.bf16.mxu0 %vm803_vm3, %v863_v12  ;;  %v571_v25 = vor.u32 %v570_v33, %v494_v58  ;;  %v572_v42 = vrot.slane %v504_v57, 1  ;;  %v527_v39 = vsel %vm3186_vm6, 0, %v3097_v47  ;;  %v528_v36 = vsel %vm3186_vm6, 0, %v3108_v19  ;;  %v2778_v33 = vld [vmem:[%s3602_s1 + $0x80] sm:$0xff]  }
  0x42   : > { %v530_v58 = vsel %vm3186_vm6, 0, %v3119_v31  ;;  %v532_v62 = vsel %vm3186_vm6, 0, %v3134_v51  ;;  %v531_v15 = vsel %vm3186_vm6, 0, %v3127_v21 }
  0x43   : > { %691 = vrot.lane.b32.xlu1 %v602_v9, %s2805_s26  ;;  %v573_v49 = vor.u32 %v572_v42, %v501_v43  ;;  %v533_v42 = vsel %vm3186_vm6, 0, %v3138_v60 }
  0x44   : > { %693 = vrot.lane.b32.xlu0 %v603_v32, %s2805_s26  ;;  %v529_v32 = vsel %vm3186_vm6, 0, %v3113_v16  ;;  %v2776_v16 = vld [vmem:[%s3602_s1 + $0x70] sm:$0xff]  }
  0x45   : > { %v608_v9 = vsel %vm2917_vm2, %v573_v49, 0  ;;  %v2779_v49 = vld [vmem:[%s3602_s1 + $0x88] sm:$0xff]  }
  0x47   : > { %647 = vrot.lane.b32.xlu1 %v3080_v18, %s2804_s13  ;;  %v606_v18 = vsel %vm2917_vm2, %v569_v37, 0 }
  0x48   : > { %649 = vrot.lane.b32.xlu0 %v391_v59, %s2804_s13  ;;  %v607_v59 = vsel %vm2917_vm2, %v571_v25, 0 }
  0x4b   : > { %695 = vrot.lane.b32.xlu1 %v604_v61, %s2805_s26 }
  0x4c   : > { %697 = vrot.lane.b32.xlu0 %v605_v30, %s2805_s26 }
  0x4f   : > { %651 = vrot.lane.b32.xlu1 %v392_v28, %s2804_s13 }
  0x50   : > { %653 = vrot.lane.b32.xlu0 %v393_v38, %s2804_s13 }
  0x53   : > { %699 = vrot.lane.b32.xlu1 %v606_v18, %s2805_s26  ;;  %v534_v18 = vsel %vm3186_vm6, 0, %v3142_v11 }
  0x54   : > { %701 = vrot.lane.b32.xlu0 %v607_v59, %s2805_s26 }
  0x57   : > { %655 = vrot.lane.b32.xlu1 %v394_v56, %s2804_s13 }
  0x5b   : > { %703 = vrot.lane.b32.xlu1 %v608_v9, %s2805_s26 }
  0x8a   : > { %v626_v5 = vpop.permute.xlu0 %625 }
  0x8b   : > { %v708_v13 = vsel %vm705_vm7, %v526_v6, %v626_v5 }
  0x8e   : > { %v628_v7 = vpop.permute.xlu0 %627 }
  0x8f   : > { %v711_v20 = vsel %vm705_vm7, %v527_v39, %v628_v7  ;;  %v536_v39 = vsel %vm3186_vm6, 0, %v3150_v26 }
  0x91   : > { %v674_v27 = vpop.permute.xlu1 %673 }
  0x92   : > { %v756_v28 = vsel %vm754_vm8, %v708_v13, %v674_v27  ;;  %v630_v38 = vpop.permute.xlu0 %629  ;;  %v535_v27 = vsel %vm3186_vm6, 0, %v3146_v29 }
  0x93   : > { %808 = vst.msk [vmem:[#allocation2 + $0x8] sm:$0xff] %vm803_vm3, %v756_v28  ;;  %v714_v46 = vsel %vm705_vm7, %v528_v36, %v630_v38 }
  0x95   : > { %v676_v44 = vpop.permute.xlu1 %675 }
  0x96   : > { %v759_v17 = vsel %vm754_vm8, %v711_v20, %v676_v44  ;;  %v678_v3 = vpop.permute.xlu0 %677 }
  0x97   : > { %809 = vst.msk [vmem:[#allocation2 + $0x10] sm:$0xff] %vm803_vm3, %v759_v17  ;;  %v762_v47 = vsel %vm754_vm8, %v714_v46, %v678_v3  ;;  %v537_v3 = vsel %vm3186_vm6, 0, %v3152_v45 }
  0x98   : > { %810 = vst.msk [vmem:[#allocation2 + $0x18] sm:$0xff] %vm803_vm3, %v762_v47 }
  0x99   : > { %v632_v19 = vpop.permute.xlu1 %631 }
  0x9a   : > { %v880_v41 = vld [vmem:[#allocation2 + $0x8] sm:$0xff]  ;;  %v634_v56 = vpop.permute.xlu0 %633  ;;  %v717_v31 = vsel %vm705_vm7, %v529_v32, %v632_v19 }
  0x9b   : > { %2539 = vmatprep.mubr.msk.bf16.mxu1 %vm803_vm3, %v880_v41  ;;  %2584 = vmatmul.mubr.msk.bf16.vlgmr.msra.gmra.mrb[0].mxu0 %vm803_vm3, %v880_v41  ;;  %v720_v23 = vsel %vm705_vm7, %v530_v58, %v634_v56 }
  0x9c   : > { %2616 = vmatpush3.bf16.msra.mxu0 %v2997_v24 }
  0x9d   : > { %v680_v40 = vpop.permute.xlu1 %679  ;;  %2617 = vmatprep.subr.bf16.mxu0 %v2775_v35 }
  0x9e   : > { %v765_v52 = vsel %vm754_vm8, %v717_v31, %v680_v40  ;;  %v3223_v43 = vld [vmem:[#allocation2 + $0x10] sm:$0xff]  ;;  %v682_v55 = vpop.permute.xlu0 %681  ;;  %v540_v31 = vsel %vm3186_vm6, 0, %v3160_v63  ;;  %v539_v40 = vsel %vm3186_vm6, 0, %v3158_v14 }
  0x9f   : > { %811 = vst.msk [vmem:[#allocation2 + $0x20] sm:$0xff] %vm803_vm3, %v765_v52  ;;  %2540 = vmatmul.mubr.msk.bf16.vlgmr.msra.gmra.mrb[0].mxu1 %vm803_vm3, %v3223_v43  ;;  %2587 = vmatprep.mubr.msk.bf16.mxu0 %vm803_vm3, %v3223_v43  ;;  %v768_v24 = vsel %vm754_vm8, %v720_v23, %v682_v55  ;;  %v3234_v8 = vld [vmem:[#allocation2 + $0x18] sm:$0xff] }
  0xa0   : > { %2665 = vmatpush3.bf16.msra.mxu1 %v2858_v0  ;;  %812 = vst.msk [vmem:[#allocation2 + $0x28] sm:$0xff] %vm803_vm3, %v768_v24  ;;  %2543 = vmatprep.mubr.msk.bf16.mxu1 %vm803_vm3, %v3234_v8  ;;  %v2777_v0 = vld [vmem:[%s3602_s1 + $0x78] sm:$0xff]  }
  0xa1   : > { %v636_v34 = vpop.permute.xlu1 %635  ;;  %2618 = vmatpush3.bf16.msra.mxu0 %v2775_v35  ;;  %2660 = vmatprep.subr.bf16.mxu1 %v2870_v2 }
  0xa2   : > { %v638_v57 = vpop.permute.xlu0 %637  ;;  %2619 = vmatprep.subr.bf16.mxu0 %v2776_v16  ;;  %v723_v51 = vsel %vm705_vm7, %v531_v15, %v636_v34  ;;  %v541_v15 = vsel %vm3186_vm6, 0, %v3165_v22 }
  0xa3   : > { %2588 = vmatmul.mubr.msk.bf16.gmra.mrb[4].mxu0 %vm803_vm3, %v3234_v8  ;;  %v726_v12 = vsel %vm705_vm7, %v532_v62, %v638_v57 }
  0xa4   : > { %2666 = vmatpush3.bf16.msra.mxu1 %v2870_v2 }
  0xa5   : > { %v684_v61 = vpop.permute.xlu1 %683  ;;  %2620 = vmatpush3.bf16.msra.mxu0 %v2776_v16  ;;  %2661 = vmatprep.subr.bf16.mxu1 %v2887_v4 }
  0xa6   : > { %v771_v21 = vsel %vm754_vm8, %v723_v51, %v684_v61  ;;  %v3257_v50 = vld [vmem:[#allocation2 + $0x20] sm:$0xff]  ;;  %v686_v30 = vpop.permute.xlu0 %685  ;;  %2621 = vmatprep.subr.bf16.mxu0 %v2777_v0 }
  0xa7   : > { %813 = vst.msk [vmem:[#allocation2 + $0x30] sm:$0xff] %vm803_vm3, %v771_v21  ;;  %2544 = vmatmul.mubr.msk.bf16.gmra.mrb[4].mxu1 %vm803_vm3, %v3257_v50  ;;  %2591 = vmatprep.mubr.msk.bf16.mxu0 %vm803_vm3, %v3257_v50  ;;  %v774_v2 = vsel %vm754_vm8, %v726_v12, %v686_v30  ;;  %v3268_v37 = vld [vmem:[#allocation2 + $0x28] sm:$0xff] }
  0xa8   : > { %814 = vst.msk [vmem:[#allocation2 + $0x38] sm:$0xff] %vm803_vm3, %v774_v2  ;;  %2547 = vmatprep.mubr.msk.bf16.mxu1 %vm803_vm3, %v3268_v37  ;;  %2667 = vmatpush3.bf16.msra.mxu1 %v2887_v4 }
  0xa9   : > { %v640_v25 = vpop.permute.xlu1 %639  ;;  %2622 = vmatpush3.bf16.msra.mxu0 %v2777_v0  ;;  %2662 = vmatprep.subr.bf16.mxu1 %v2931_v48 }
  0xaa   : > { %v642_v59 = vpop.permute.xlu0 %641  ;;  %2623 = vmatprep.subr.bf16.mxu0 %v2778_v33  ;;  %v729_v11 = vsel %vm705_vm7, %v533_v42, %v640_v25 }
  0xab   : > { %2592 = vmatmul.mubr.msk.bf16.gmra.mrb[8].mxu0 %vm803_vm3, %v3268_v37  ;;  %v732_v4 = vsel %vm705_vm7, %v534_v18, %v642_v59 }
  0xac   : > { %2668 = vmatpush3.bf16.msra.mxu1 %v2931_v48 }
  0xad   : > { %v688_v9 = vpop.permute.xlu1 %687  ;;  %2624 = vmatpush3.bf16.msra.mxu0 %v2778_v33  ;;  %2663 = vmatprep.subr.bf16.mxu1 %v2944_v53 }
  0xae   : > { %v777_v60 = vsel %vm754_vm8, %v729_v11, %v688_v9  ;;  %v885_v5 = vld [vmem:[#allocation2 + $0x30] sm:$0xff]  ;;  %v690_v6 = vpop.permute.xlu0 %689  ;;  %2625 = vmatprep.subr.bf16.mxu0 %v2779_v49 }
  0xaf   : > { %815 = vst.msk [vmem:[#allocation2 + $0x40] sm:$0xff] %vm803_vm3, %v777_v60  ;;  %2548 = vmatmul.mubr.msk.bf16.gmra.mrb[8].mxu1 %vm803_vm3, %v885_v5  ;;  %2595 = vmatprep.mubr.msk.bf16.mxu0 %vm803_vm3, %v885_v5  ;;  %v780_v7 = vsel %vm754_vm8, %v732_v4, %v690_v6  ;;  %v3295_v48 = vld [vmem:[#allocation2 + $0x38] sm:$0xff] }
  0xb0   : > { %816 = vst.msk [vmem:[#allocation2 + $0x48] sm:$0xff] %vm803_vm3, %v780_v7  ;;  %2551 = vmatprep.mubr.msk.bf16.mxu1 %vm803_vm3, %v3295_v48  ;;  %2669 = vmatpush3.bf16.msra.mxu1 %v2944_v53  ;;  %v3404_v7 = vld [vmem:[%s3603_s2] ss:$0 sm:$0xff] }
  0xb1   : > { %v644_v13 = vpop.permute.xlu1 %643  ;;  %2626 = vmatpush3.bf16.msra.mxu0 %v2779_v49  ;;  %2664 = vmatprep.subr.bf16.mxu1 %v2979_v10 }
  0xb2   : > { %v646_v36 = vpop.permute.xlu0 %645  ;;  %v735_v26 = vsel %vm705_vm7, %v535_v27, %v644_v13 }
  0xb3   : > { %2596 = vmatmul.mubr.msk.bf16.gmra.mrb[12].mxu0 %vm803_vm3, %v3295_v48  ;;  %v738_v53 = vsel %vm705_vm7, %v536_v39, %v646_v36 }
  0xb4   : > { %2627 = vmatprep.mubr.msk.bf16.mxu0 %vm803_vm3, %v3223_v43  ;;  %2670 = vmatpush3.bf16.msra.mxu1 %v2979_v10  ;;  %v538_v10 = vsel %vm3186_vm6, 0, %v3155_v54 }
  0xb5   : > { %v692_v28 = vpop.permute.xlu1 %691 }
  0xb6   : > { %v783_v38 = vsel %vm754_vm8, %v735_v26, %v692_v28  ;;  %v887_v20 = vld [vmem:[#allocation2 + $0x40] sm:$0xff]  ;;  %v694_v46 = vpop.permute.xlu0 %693 }
  0xb7   : > { %817 = vst.msk [vmem:[#allocation2 + $0x50] sm:$0xff] %vm803_vm3, %v783_v38  ;;  %2552 = vmatmul.mubr.msk.bf16.gmra.mrb[12].mxu1 %vm803_vm3, %v887_v20  ;;  %v786_v29 = vsel %vm754_vm8, %v738_v53, %v694_v46  ;;  %v888_v44 = vld [vmem:[#allocation2 + $0x48] sm:$0xff] }
  0xb8   : > { %818 = vst.msk [vmem:[#allocation2 + $0x58] sm:$0xff] %vm803_vm3, %v786_v29  ;;  %2555 = vmatprep.mubr.msk.bf16.mxu1 %vm803_vm3, %v888_v44 }
  0xb9   : > { %v648_v17 = vpop.permute.xlu1 %647 }
  0xba   : > { %v650_v47 = vpop.permute.xlu0 %649  ;;  %v741_v58 = vsel %vm705_vm7, %v537_v3, %v648_v17 }
  0xbb   : > { %2628 = vmatmul.mubr.msk.bf16.vlgmr.msra.gmra.mrb[0].mxu0 %vm803_vm3, %v3234_v8  ;;  %v744_v19 = vsel %vm705_vm7, %v538_v10, %v650_v47 }
  0xbc   : > { %2631 = vmatprep.mubr.msk.bf16.mxu0 %vm803_vm3, %v3257_v50 }
  0xbd   : > { %v696_v35 = vpop.permute.xlu1 %695 }
  0xbe   : > { %v789_v32 = vsel %vm754_vm8, %v741_v58, %v696_v35  ;;  %v889_v41 = vld [vmem:[#allocation2 + $0x50] sm:$0xff]  ;;  %v698_v54 = vpop.permute.xlu0 %697 }
  0xbf   : > { %819 = vst.msk [vmem:[#allocation2 + $0x60] sm:$0xff] %vm803_vm3, %v789_v32  ;;  %2556 = vmatmul.mubr.msk.bf16.gmra.mrb[16].mxu1 %vm803_vm3, %v889_v41  ;;  %v792_v45 = vsel %vm754_vm8, %v744_v19, %v698_v54  ;;  %v890_v56 = vld [vmem:[#allocation2 + $0x58] sm:$0xff] }
  0xc0   : > { %820 = vst.msk [vmem:[#allocation2 + $0x68] sm:$0xff] %vm803_vm3, %v792_v45  ;;  %2559 = vmatprep.mubr.msk.bf16.mxu1 %vm803_vm3, %v890_v56 }
  0xc1   : > { %v652_v23 = vpop.permute.xlu1 %651 }
  0xc2   : > { %v654_v52 = vpop.permute.xlu0 %653  ;;  %v747_v55 = vsel %vm705_vm7, %v539_v40, %v652_v23 }
  0xc3   : > { %2632 = vmatmul.mubr.msk.bf16.gmra.mrb[4].mxu0 %vm803_vm3, %v3268_v37  ;;  %v750_v43 = vsel %vm705_vm7, %v540_v31, %v654_v52 }
  0xc4   : > { %2635 = vmatprep.mubr.msk.bf16.mxu0 %vm803_vm3, %v885_v5 }
  0xc5   : > { %v700_v16 = vpop.permute.xlu1 %699 }
  0xc6   : > { %v795_v24 = vsel %vm754_vm8, %v747_v55, %v700_v16  ;;  %v891_v8 = vld [vmem:[#allocation2 + $0x60] sm:$0xff]  ;;  %v702_v34 = vpop.permute.xlu0 %701 }
  0xc7   : > { %821 = vst.msk [vmem:[#allocation2 + $0x70] sm:$0xff] %vm803_vm3, %v795_v24  ;;  %2560 = vmatmul.mubr.msk.bf16.gmra.mrb[20].mxu1 %vm803_vm3, %v891_v8  ;;  %v798_v14 = vsel %vm754_vm8, %v750_v43, %v702_v34  ;;  %v892_v63 = vld [vmem:[#allocation2 + $0x68] sm:$0xff] }
  0xc8   : > { %822 = vst.msk [vmem:[#allocation2 + $0x78] sm:$0xff] %vm803_vm3, %v798_v14  ;;  %2563 = vmatprep.mubr.msk.bf16.mxu1 %vm803_vm3, %v892_v63 }
  0xc9   : > { %v656_v62 = vpop.permute.xlu1 %655 }
  0xca   : > { %v753_v57 = vsel %vm705_vm7, %v541_v15, %v656_v62 }
  0xcb   : > { %2636 = vmatmul.mubr.msk.bf16.gmra.mrb[8].mxu0 %vm803_vm3, %v3295_v48 }
  0xcc   : > { %2639 = vmatprep.mubr.msk.bf16.mxu0 %vm803_vm3, %v887_v20 }
  0xcd   : > { %v704_v0 = vpop.permute.xlu1 %703 }
  0xce   : > { %v801_v12 = vsel %vm754_vm8, %v753_v57, %v704_v0  ;;  %v893_v51 = vld [vmem:[#allocation2 + $0x70] sm:$0xff] }
  0xcf   : > { %823 = vst.msk [vmem:[#allocation2 + $0x80] sm:$0xff] %vm803_vm3, %v801_v12  ;;  %2564 = vmatmul.mubr.msk.bf16.gmra.mrb[24].mxu1 %vm803_vm3, %v893_v51  ;;  %v894_v61 = vld [vmem:[#allocation2 + $0x78] sm:$0xff] }
  0xd0   : > { %2567 = vmatprep.mubr.msk.bf16.mxu1 %vm803_vm3, %v894_v61 }
  0xd3   : > { %2640 = vmatmul.mubr.msk.bf16.gmra.mrb[12].mxu0 %vm803_vm3, %v888_v44 }
  0xd4   : > { %2643 = vmatprep.mubr.msk.bf16.mxu0 %vm803_vm3, %v889_v41 }
  0xd6   : > { %v895_v22 = vld [vmem:[#allocation2 + $0x80] sm:$0xff] }
  0xd7   : > { %2568 = vmatmul.mubr.msk.bf16.gmra.mrb[28].mxu1 %vm803_vm3, %v895_v22 }
  0xd8   : > { %2599 = vmatprep.mubr.msk.bf16.mxu1 %vm803_vm3, %v887_v20 }
  0xdb   : > { %2644 = vmatmul.mubr.msk.bf16.gmra.mrb[16].mxu0 %vm803_vm3, %v890_v56 }
  0xdc   : > { %2647 = vmatprep.mubr.msk.bf16.mxu0 %vm803_vm3, %v891_v8 }
  0xdf   : > { %2600 = vmatmul.mubr.msk.bf16.vlgmr.msra.gmra.mrb[16].mxu1 %vm803_vm3, %v888_v44 }
  0xe0   : > { %2603 = vmatprep.mubr.msk.bf16.mxu1 %vm803_vm3, %v889_v41 }
  0xe3   : > { %2648 = vmatmul.mubr.msk.bf16.gmra.mrb[20].mxu0 %vm803_vm3, %v892_v63 }
  0xe4   : > { %2651 = vmatprep.mubr.msk.bf16.mxu0 %vm803_vm3, %v893_v51 }
  0xe7   : > { %2604 = vmatmul.mubr.msk.bf16.gmra.mrb[20].mxu1 %vm803_vm3, %v890_v56 }
  0xe8   : > { %2607 = vmatprep.mubr.msk.bf16.mxu1 %vm803_vm3, %v891_v8 }
  0xeb   : > { %2652 = vmatmul.mubr.msk.bf16.gmra.mrb[24].mxu0 %vm803_vm3, %v894_v61 }
  0xec   : > { %2655 = vmatprep.mubr.msk.bf16.mxu0 %vm803_vm3, %v895_v22 }
  0xef   : > { %2608 = vmatmul.mubr.msk.bf16.gmra.mrb[24].mxu1 %vm803_vm3, %v892_v63 }
  0xf0   : > { %2611 = vmatprep.mubr.msk.bf16.mxu1 %vm803_vm3, %v893_v51 }
  0xf3   : > { %2656 = vmatmul.mubr.msk.bf16.gmra.mrb[28].mxu0 %vm803_vm3, %v1403_v1 }
  0xf7   : > { %2612 = vmatmul.mubr.msk.bf16.gmra.mrb[28].mxu1 %vm803_vm3, %v894_v61 }
 0x172   : > { %v2541_v21 = vpop.f32.mrb[0].mxu1 }
 0x173   : > { %v1015_v50 = vpop.f32.mrb[1].mxu1 }
 0x174   : > { %v2542_v30 = vpop.f32.mrb[2].mxu1 }
 0x175   : > { %v1018_v33 = vpop.f32.mrb[3].mxu1 }
 0x17a   : > { %v2545_v2 = vpop.f32.mrb[4].mxu1 }
 0x17b   : > { %v1031_v37 = vpop.f32.mrb[5].mxu1 }
 0x17c   : > { %v2546_v25 = vpop.f32.mrb[6].mxu1 }
 0x17d   : > { %v1034_v18 = vpop.f32.mrb[7].mxu1 }
 0x182   : > { %v3385_v42 = vpop.f32.mrb[8].mxu1 }
 0x183   : > { %v3387_v59 = vpop.f32.mrb[9].mxu1 }
 0x184   : > { %v3389_v49 = vpop.f32.mrb[10].mxu1 }
 0x185   : > { %v3391_v4 = vpop.f32.mrb[11].mxu1 }
 0x18a   : > { %v3393_v11 = vpop.f32.mrb[12].mxu1 }
 0x18b   : > { %v3395_v9 = vpop.f32.mrb[13].mxu1 }
 0x18c   : > { %v3397_v60 = vpop.f32.mrb[14].mxu1 }
 0x18d   : > { %v3399_v5 = vpop.f32.mrb[15].mxu1 }
 0x18e   : > { %v2629_v6 = vpop.f32.mrb[0].mxu0 }
 0x18f   : > { %v2671_v48 = vadd.f32 %v2629_v6, %v2541_v21  ;;  %v1522_v13 = vpop.f32.mrb[1].mxu0 }
 0x190   : > { %v2672_v39 = vadd.f32 %v1522_v13, %v1015_v50  ;;  %v2630_v27 = vpop.f32.mrb[2].mxu0 }
 0x191   : > { %v1691_v36 = vadd.f32 %v2671_v48, %v3404_v7  ;;  %v2673_v53 = vadd.f32 %v2630_v27, %v2542_v30  ;;  %v1525_v26 = vpop.f32.mrb[3].mxu0 }
 0x192   : > { %v1689_v28 = vadd.f32 %v2672_v39, %v3404_v7  ;;  %v2674_v38 = vadd.f32 %v1525_v26, %v1018_v33 }
 0x193   : > { %v2352_v20 = vpack.c.bf16 %v1691_v36, %v1691_v36  ;;  %v1692_v46 = vadd.f32 %v2673_v53, %v3404_v7 }
 0x194   : > { %v2350_v29 = vpack.c.bf16 %v1689_v28, %v1689_v28  ;;  %v1690_v44 = vadd.f32 %v2674_v38, %v3404_v7 }
 0x195   : > { %1852 = vst.msk [vmem:[%s3412_s27 + $0x8] sm:$0xf] %vm1849_vm9, %v2352_v20  ;;  %v1722_v17 = vpack.c.bf16 %v1692_v46, %v1691_v36  ;;  %v2353_v10 = vpack.c.bf16 %v1692_v46, %v1692_v46 }
 0x196   : > { %1850 = vst.msk [vmem:[%s3412_s27] sm:$0xf] %vm1849_vm9, %v2350_v29  ;;  %v1721_v3 = vpack.c.bf16 %v1690_v44, %v1689_v28  ;;  %v2351_v47 = vpack.c.bf16 %v1690_v44, %v1690_v44  ;;  %v2633_v19 = vpop.f32.mrb[4].mxu0 }
 0x197   : > { %1853 = vst.msk [vmem:[%s3412_s27 + $0xc] sm:$0xf] %vm1849_vm9, %v2353_v10  ;;  %v1884_v58 = vunpack.c.l.bf16 %v1722_v17  ;;  %v1885_v35 = vunpack.c.h.bf16 %v1722_v17  ;;  %v2675_v32 = vadd.f32 %v2633_v19, %v2545_v2  ;;  %v1538_v41 = vpop.f32.mrb[5].mxu0 }
 0x198   : > { %1851 = vst.msk [vmem:[%s3412_s27 + $0x4] sm:$0xf] %vm1849_vm9, %v2351_v47  ;;  %v1882_v54 = vunpack.c.l.bf16 %v1721_v3  ;;  %v1883_v45 = vunpack.c.h.bf16 %v1721_v3  ;;  %v2676_v56 = vadd.f32 %v1538_v41, %v1031_v37  ;;  %v2634_v23 = vpop.f32.mrb[6].mxu0 }
 0x199   : > { %v1988_v31 = vmul.f32 %v1884_v58, %v1884_v58  ;;  %v1541_v40 = vpop.f32.mrb[7].mxu0  ;;  %v1918_v24 = vsel %vm705_vm7, %v1884_v58, 0.0  ;;  %v1989_v8 = vmul.f32 %v1885_v35, %v1885_v35  ;;  %v1695_v14 = vadd.f32 %v2675_v32, %v3404_v7 }
 0x19a   : > { %v1915_v52 = vsel %vm705_vm7, %v1882_v54, 0.0  ;;  %v1916_v43 = vsel %vm705_vm7, %v1883_v45, 0.0  ;;  %v1986_v55 = vmul.f32 %v1882_v54, %v1882_v54  ;;  %v1987_v16 = vmul.f32 %v1883_v45, %v1883_v45 }
 0x19b   : > { %v1917_v34 = vadd.f32 %v1916_v43, %v1915_v52  ;;  %v1693_v15 = vadd.f32 %v2676_v56, %v3404_v7  ;;  %v2677_v57 = vadd.f32 %v2634_v23, %v2546_v25  ;;  %v2356_v51 = vpack.c.bf16 %v1695_v14, %v1695_v14 }
 0x19c   : > { %v2018_v63 = vsel %vm705_vm7, %v1986_v55, 0.0  ;;  %v2019_v62 = vsel %vm705_vm7, %v1987_v16, 0.0  ;;  %v2678_v61 = vadd.f32 %v1541_v40, %v1034_v18  ;;  %v1920_v22 = vsel %vm705_vm7, %v1885_v35, 0.0 }
 0x19d   : > { %v1919_v0 = vadd.f32 %v1918_v24, %v1917_v34  ;;  %v2020_v12 = vadd.f32 %v2019_v62, %v2018_v63  ;;  %v2021_v1 = vsel %vm705_vm7, %v1988_v31, 0.0  ;;  %v2354_v21 = vpack.c.bf16 %v1693_v15, %v1693_v15  ;;  %1856 = vst.msk [vmem:[%s3412_s27 + $0x18] sm:$0xf] %vm1849_vm9, %v2356_v51 }
 0x19e   : > { %v1696_v50 = vadd.f32 %v2677_v57, %v3404_v7  ;;  %v2637_v30 = vpop.f32.mrb[8].mxu0  ;;  %v1694_v2 = vadd.f32 %v2678_v61, %v3404_v7  ;;  %v2023_v18 = vsel %vm705_vm7, %v1989_v8, 0.0 }
 0x19f   : > { %v2022_v33 = vadd.f32 %v2021_v1, %v2020_v12  ;;  %v1921_v37 = vadd.f32 %v1920_v22, %v1919_v0  ;;  %v2679_v25 = vadd.f32 %v2637_v30, %v3385_v42  ;;  %v1554_v6 = vpop.f32.mrb[9].mxu0  ;;  %1854 = vst.msk [vmem:[%s3412_s27 + $0x10] sm:$0xf] %vm1849_vm9, %v2354_v21 }
 0x1a0   : > { %v1724_v48 = vpack.c.bf16 %v1696_v50, %v1695_v14  ;;  %v2357_v13 = vpack.c.bf16 %v1696_v50, %v1696_v50  ;;  %v2680_v39 = vadd.f32 %v1554_v6, %v3387_v59  ;;  %v2638_v27 = vpop.f32.mrb[10].mxu0  ;;  %v1723_v36 = vpack.c.bf16 %v1694_v2, %v1693_v15 }
 0x1a1   : > { %v2355_v53 = vpack.c.bf16 %v1694_v2, %v1694_v2  ;;  %v2024_v26 = vadd.f32 %v2023_v18, %v2022_v33  ;;  %v1699_v28 = vadd.f32 %v2679_v25, %v3404_v7  ;;  %v1557_v38 = vpop.f32.mrb[11].mxu0  ;;  %v2681_v29 = vadd.f32 %v2638_v27, %v3389_v49 }
 0x1a2   : > { %1857 = vst.msk [vmem:[%s3412_s27 + $0x1c] sm:$0xf] %vm1849_vm9, %v2357_v13  ;;  %v1888_v42 = vunpack.c.l.bf16 %v1724_v48  ;;  %v1889_v20 = vunpack.c.h.bf16 %v1724_v48  ;;  %v1697_v46 = vadd.f32 %v2680_v39, %v3404_v7  ;;  %v1886_v44 = vunpack.c.l.bf16 %v1723_v36 }
 0x1a3   : > { %1855 = vst.msk [vmem:[%s3412_s27 + $0x14] sm:$0xf] %vm1849_vm9, %v2355_v53  ;;  %v1887_v59 = vunpack.c.h.bf16 %v1723_v36  ;;  %v2360_v17 = vpack.c.bf16 %v1699_v28, %v1699_v28  ;;  %v2682_v10 = vadd.f32 %v1557_v38, %v3391_v4  ;;  %v1700_v40 = vadd.f32 %v2681_v29, %v3404_v7 }
 0x1a4   : > { %v1926_v3 = vsel %vm705_vm7, %v1888_v42, 0.0  ;;  %v1928_v47 = vsel %vm705_vm7, %v1889_v20, 0.0  ;;  %v1992_v19 = vmul.f32 %v1888_v42, %v1888_v42  ;;  %v1993_v58 = vmul.f32 %v1889_v20, %v1889_v20 }
 0x1a5   : > { %v1922_v35 = vsel %vm705_vm7, %v1886_v44, 0.0  ;;  %v1990_v32 = vmul.f32 %v1886_v44, %v1886_v44  ;;  %v1991_v41 = vmul.f32 %v1887_v59, %v1887_v59  ;;  %1860 = vst.msk [vmem:[%s3412_s27 + $0x28] sm:$0xf] %vm1849_vm9, %v2360_v17  ;;  %v1924_v45 = vsel %vm705_vm7, %v1887_v59, 0.0 }
 0x1a6   : > { %v2029_v49 = vsel %vm705_vm7, %v1992_v19, 0.0  ;;  %v1923_v54 = vadd.f32 %v1922_v35, %v1921_v37  ;;  %v2358_v56 = vpack.c.bf16 %v1697_v46, %v1697_v46  ;;  %v2641_v4 = vpop.f32.mrb[12].mxu0  ;;  %v1698_v52 = vadd.f32 %v2682_v10, %v3404_v7 }
 0x1a7   : > { %v2025_v23 = vsel %vm705_vm7, %v1990_v32, 0.0  ;;  %v2027_v31 = vsel %vm705_vm7, %v1991_v41, 0.0  ;;  %v1570_v43 = vpop.f32.mrb[13].mxu0  ;;  %v2683_v24 = vadd.f32 %v2641_v4, %v3393_v11  ;;  %v1726_v14 = vpack.c.bf16 %v1700_v40, %v1699_v28 }
 0x1a8   : > { %v1925_v55 = vadd.f32 %v1924_v45, %v1923_v54  ;;  %v2026_v16 = vadd.f32 %v2025_v23, %v2024_v26  ;;  %1858 = vst.msk [vmem:[%s3412_s27 + $0x20] sm:$0xf] %vm1849_vm9, %v2358_v56  ;;  %v2684_v8 = vadd.f32 %v1570_v43, %v3395_v9  ;;  %v2642_v34 = vpop.f32.mrb[14].mxu0  ;;  %v2361_v63 = vpack.c.bf16 %v1700_v40, %v1700_v40 }
 0x1a9   : > { %v1725_v62 = vpack.c.bf16 %v1698_v52, %v1697_v46  ;;  %v2359_v15 = vpack.c.bf16 %v1698_v52, %v1698_v52  ;;  %v1573_v57 = vpop.f32.mrb[15].mxu0  ;;  %v1703_v51 = vadd.f32 %v2683_v24, %v3404_v7  ;;  %v1892_v22 = vunpack.c.l.bf16 %v1726_v14 }
 0x1aa   : > { %v1927_v0 = vadd.f32 %v1926_v3, %v1925_v55  ;;  %v2028_v12 = vadd.f32 %v2027_v31, %v2026_v16  ;;  %v1701_v61 = vadd.f32 %v2684_v8, %v3404_v7  ;;  %1861 = vst.msk [vmem:[%s3412_s27 + $0x2c] sm:$0xf] %vm1849_vm9, %v2361_v63  ;;  %v1893_v11 = vunpack.c.h.bf16 %v1726_v14 }
 0x1ab   : > { %1859 = vst.msk [vmem:[%s3412_s27 + $0x24] sm:$0xf] %vm1849_vm9, %v2359_v15  ;;  %v1890_v9 = vunpack.c.l.bf16 %v1725_v62  ;;  %v1891_v1 = vunpack.c.h.bf16 %v1725_v62  ;;  %v2364_v30 = vpack.c.bf16 %v1703_v51, %v1703_v51  ;;  %v2031_v2 = vsel %vm705_vm7, %v1993_v58, 0.0 }
 0x1ac   : > { %v2030_v21 = vadd.f32 %v2029_v49, %v2028_v12  ;;  %v1929_v50 = vadd.f32 %v1928_v47, %v1927_v0  ;;  %v2362_v33 = vpack.c.bf16 %v1701_v61, %v1701_v61  ;;  %v1996_v37 = vmul.f32 %v1892_v22, %v1892_v22 }
 0x1ad   : > { %v1930_v25 = vsel %vm705_vm7, %v1890_v9, 0.0  ;;  %v1994_v6 = vmul.f32 %v1890_v9, %v1890_v9  ;;  %v1995_v18 = vmul.f32 %v1891_v1, %v1891_v1  ;;  %1864 = vst.msk [vmem:[%s3412_s27 + $0x38] sm:$0xf] %vm1849_vm9, %v2364_v30  ;;  %v1997_v13 = vmul.f32 %v1893_v11, %v1893_v11 }
 0x1ae   : > { %1862 = vst.msk [vmem:[%s3412_s27 + $0x30] sm:$0xf] %vm1849_vm9, %v2362_v33  ;;  %v2645_v48 = vpop.f32.mrb[16].mxu0  ;;  %v1931_v39 = vadd.f32 %v1930_v25, %v1929_v50  ;;  %v2032_v27 = vadd.f32 %v2031_v2, %v2030_v21  ;;  %v1932_v53 = vsel %vm705_vm7, %v1891_v1, 0.0  ;;  %v2685_v28 = vadd.f32 %v2642_v34, %v3397_v60 }
 0x1af   : > { %v1586_v36 = vpop.f32.mrb[17].mxu0  ;;  %v2033_v26 = vsel %vm705_vm7, %v1994_v6, 0.0  ;;  %v2686_v38 = vadd.f32 %v1573_v57, %v3399_v5  ;;  %v1934_v20 = vsel %vm705_vm7, %v1892_v22, 0.0  ;;  %v1936_v46 = vsel %vm705_vm7, %v1893_v11, 0.0 }
 0x1b0   : > { %v2646_v42 = vpop.f32.mrb[18].mxu0  ;;  %v1933_v29 = vadd.f32 %v1932_v53, %v1931_v39  ;;  %v2034_v44 = vadd.f32 %v2033_v26, %v2032_v27  ;;  %v2037_v17 = vsel %vm705_vm7, %v1996_v37, 0.0  ;;  %v2035_v10 = vsel %vm705_vm7, %v1995_v18, 0.0 }
 0x1b1   : > { %v1589_v59 = vpop.f32.mrb[19].mxu0  ;;  %v1704_v3 = vadd.f32 %v2685_v28, %v3404_v7  ;;  %v1702_v47 = vadd.f32 %v2686_v38, %v3404_v7  ;;  %v2039_v60 = vsel %vm705_vm7, %v1997_v13, 0.0 }
 0x1b2   : > { %v2601_v19 = vpop.f32.mrb[16].mxu1  ;;  %v1935_v5 = vadd.f32 %v1934_v20, %v1933_v29  ;;  %v2036_v58 = vadd.f32 %v2035_v10, %v2034_v44 }
 0x1b3   : > { %v2687_v35 = vadd.f32 %v2645_v48, %v2601_v19  ;;  %v1324_v32 = vpop.f32.mrb[17].mxu1  ;;  %v1728_v41 = vpack.c.bf16 %v1704_v3, %v1703_v51  ;;  %v2365_v49 = vpack.c.bf16 %v1704_v3, %v1704_v3  ;;  %v1727_v54 = vpack.c.bf16 %v1702_v47, %v1701_v61 }
 0x1b4   : > { %v2363_v45 = vpack.c.bf16 %v1702_v47, %v1702_v47  ;;  %v2602_v56 = vpop.f32.mrb[18].mxu1  ;;  %v2038_v4 = vadd.f32 %v2037_v17, %v2036_v58  ;;  %v1937_v23 = vadd.f32 %v1936_v46, %v1935_v5  ;;  %v2688_v40 = vadd.f32 %v1586_v36, %v1324_v32 }
 0x1b5   : > { %v1707_v31 = vadd.f32 %v2687_v35, %v3404_v7  ;;  %v1327_v52 = vpop.f32.mrb[19].mxu1  ;;  %1865 = vst.msk [vmem:[%s3412_s27 + $0x3c] sm:$0xf] %vm1849_vm9, %v2365_v49  ;;  %v1896_v43 = vunpack.c.l.bf16 %v1728_v41  ;;  %v1897_v55 = vunpack.c.h.bf16 %v1728_v41  ;;  %v1894_v16 = vunpack.c.l.bf16 %v1727_v54 }
 0x1b6   : > { %1863 = vst.msk [vmem:[%s3412_s27 + $0x34] sm:$0xf] %vm1849_vm9, %v2363_v45  ;;  %v1895_v24 = vunpack.c.h.bf16 %v1727_v54  ;;  %v2649_v8 = vpop.f32.mrb[20].mxu0  ;;  %v2040_v34 = vadd.f32 %v2039_v60, %v2038_v4  ;;  %v1705_v63 = vadd.f32 %v2688_v40, %v3404_v7  ;;  %v2689_v62 = vadd.f32 %v2646_v42, %v2602_v56 }
 0x1b7   : > { %v2368_v14 = vpack.c.bf16 %v1707_v31, %v1707_v31  ;;  %v1602_v15 = vpop.f32.mrb[21].mxu0  ;;  %v1942_v57 = vsel %vm705_vm7, %v1896_v43, 0.0  ;;  %v1944_v0 = vsel %vm705_vm7, %v1897_v55, 0.0  ;;  %v2000_v12 = vmul.f32 %v1896_v43, %v1896_v43 }
 0x1b8   : > { %v2650_v51 = vpop.f32.mrb[22].mxu0  ;;  %v2001_v61 = vmul.f32 %v1897_v55, %v1897_v55  ;;  %v1938_v22 = vsel %vm705_vm7, %v1894_v16, 0.0  ;;  %v1998_v11 = vmul.f32 %v1894_v16, %v1894_v16  ;;  %v1999_v9 = vmul.f32 %v1895_v24, %v1895_v24 }
 0x1b9   : > { %1868 = vst.msk [vmem:[%s3412_s27 + $0x48] sm:$0xf] %vm1849_vm9, %v2368_v14  ;;  %v1605_v1 = vpop.f32.mrb[23].mxu0  ;;  %v2045_v21 = vsel %vm705_vm7, %v2000_v12, 0.0  ;;  %v1939_v50 = vadd.f32 %v1938_v22, %v1937_v23  ;;  %v1940_v30 = vsel %vm705_vm7, %v1895_v24, 0.0  ;;  %v2366_v33 = vpack.c.bf16 %v1705_v63, %v1705_v63 }
 0x1ba   : > { %v2605_v2 = vpop.f32.mrb[20].mxu1  ;;  %v2041_v37 = vsel %vm705_vm7, %v1998_v11, 0.0  ;;  %v2043_v25 = vsel %vm705_vm7, %v1999_v9, 0.0  ;;  %v1708_v6 = vadd.f32 %v2689_v62, %v3404_v7  ;;  %v2690_v18 = vadd.f32 %v1589_v59, %v1327_v52 }
 0x1bb   : > { %v1340_v48 = vpop.f32.mrb[21].mxu1  ;;  %v1941_v13 = vadd.f32 %v1940_v30, %v1939_v50  ;;  %v2042_v39 = vadd.f32 %v2041_v37, %v2040_v34  ;;  %1866 = vst.msk [vmem:[%s3412_s27 + $0x40] sm:$0xf] %vm1849_vm9, %v2366_v33  ;;  %v2691_v27 = vadd.f32 %v2649_v8, %v2605_v2  ;;  %v2047_v49 = vsel %vm705_vm7, %v2001_v61, 0.0 }
 0x1bc   : > { %v2692_v36 = vadd.f32 %v1602_v15, %v1340_v48  ;;  %v2606_v53 = vpop.f32.mrb[22].mxu1  ;;  %v1730_v26 = vpack.c.bf16 %v1708_v6, %v1707_v31  ;;  %v2369_v28 = vpack.c.bf16 %v1708_v6, %v1708_v6  ;;  %v1706_v38 = vadd.f32 %v2690_v18, %v3404_v7 }
 0x1bd   : > { %v2693_v42 = vadd.f32 %v2650_v51, %v2606_v53  ;;  %v1343_v20 = vpop.f32.mrb[23].mxu1  ;;  %v1943_v46 = vadd.f32 %v1942_v57, %v1941_v13  ;;  %v2044_v29 = vadd.f32 %v2043_v25, %v2042_v39  ;;  %v1711_v44 = vadd.f32 %v2691_v27, %v3404_v7 }
 0x1be   : > { %v1709_v59 = vadd.f32 %v2692_v36, %v3404_v7  ;;  %v2653_v17 = vpop.f32.mrb[24].mxu0  ;;  %1869 = vst.msk [vmem:[%s3412_s27 + $0x4c] sm:$0xf] %vm1849_vm9, %v2369_v28  ;;  %v1900_v10 = vunpack.c.l.bf16 %v1730_v26  ;;  %v1901_v3 = vunpack.c.h.bf16 %v1730_v26  ;;  %v1729_v47 = vpack.c.bf16 %v1706_v38, %v1705_v63 }
 0x1bf   : > { %v2367_v19 = vpack.c.bf16 %v1706_v38, %v1706_v38  ;;  %v1618_v60 = vpop.f32.mrb[25].mxu0  ;;  %v2046_v5 = vadd.f32 %v2045_v21, %v2044_v29  ;;  %v1945_v58 = vadd.f32 %v1944_v0, %v1943_v46  ;;  %v2372_v35 = vpack.c.bf16 %v1711_v44, %v1711_v44 }
 0x1c0   : > { %v2370_v32 = vpack.c.bf16 %v1709_v59, %v1709_v59  ;;  %v2654_v41 = vpop.f32.mrb[26].mxu0  ;;  %v1950_v54 = vsel %vm705_vm7, %v1900_v10, 0.0  ;;  %v1898_v56 = vunpack.c.l.bf16 %v1729_v47  ;;  %v1899_v4 = vunpack.c.h.bf16 %v1729_v47 }
 0x1c1   : > { %1867 = vst.msk [vmem:[%s3412_s27 + $0x44] sm:$0xf] %vm1849_vm9, %v2367_v19  ;;  %v3516_v45 = vpop.f32.mrb[27].mxu0  ;;  %v2048_v23 = vadd.f32 %v2047_v49, %v2046_v5  ;;  %1872 = vst.msk [vmem:[%s3412_s27 + $0x58] sm:$0xf] %vm1849_vm9, %v2372_v35  ;;  %v1712_v31 = vadd.f32 %v2693_v42, %v3404_v7  ;;  %v2004_v52 = vmul.f32 %v1900_v10, %v1900_v10  ;;  %v1952_v13 = vsel %vm705_vm7, %v1901_v3, 0.0 }
 0x1c2   : > { %1870 = vst.msk [vmem:[%s3412_s27 + $0x50] sm:$0xf] %vm1849_vm9, %v2370_v32  ;;  %v2609_v40 = vpop.f32.mrb[24].mxu1  ;;  %v2005_v43 = vmul.f32 %v1901_v3, %v1901_v3  ;;  %v2694_v55 = vadd.f32 %v1605_v1, %v1343_v20  ;;  %v1946_v8 = vsel %vm705_vm7, %v1898_v56, 0.0  ;;  %v1948_v34 = vsel %vm705_vm7, %v1899_v4, 0.0 }
 0x1c3   : > { %v2695_v16 = vadd.f32 %v2653_v17, %v2609_v40  ;;  %v1356_v24 = vpop.f32.mrb[25].mxu1  ;;  %v2002_v14 = vmul.f32 %v1898_v56, %v1898_v56  ;;  %v2003_v63 = vmul.f32 %v1899_v4, %v1899_v4  ;;  %v1947_v15 = vadd.f32 %v1946_v8, %v1945_v58 }
 0x1c4   : > { %v2610_v62 = vpop.f32.mrb[26].mxu1  ;;  %v1732_v57 = vpack.c.bf16 %v1712_v31, %v1711_v44  ;;  %v2373_v0 = vpack.c.bf16 %v1712_v31, %v1712_v31  ;;  %v1710_v12 = vadd.f32 %v2694_v55, %v3404_v7  ;;  %v2696_v9 = vadd.f32 %v1618_v60, %v1356_v24 }
 0x1c5   : > { %v1359_v51 = vpop.f32.mrb[27].mxu1  ;;  %v2049_v61 = vsel %vm705_vm7, %v2002_v14, 0.0  ;;  %v2051_v22 = vsel %vm705_vm7, %v2003_v63, 0.0  ;;  %v1715_v11 = vadd.f32 %v2695_v16, %v3404_v7  ;;  %v1949_v21 = vadd.f32 %v1948_v34, %v1947_v15 }
 0x1c6   : > { %v2657_v1 = vpop.f32.mrb[28].mxu0  ;;  %v2050_v50 = vadd.f32 %v2049_v61, %v2048_v23  ;;  %1873 = vst.msk [vmem:[%s3412_s27 + $0x5c] sm:$0xf] %vm1849_vm9, %v2373_v0  ;;  %v1904_v30 = vunpack.c.l.bf16 %v1732_v57  ;;  %v1905_v33 = vunpack.c.h.bf16 %v1732_v57  ;;  %v1731_v37 = vpack.c.bf16 %v1710_v12, %v1709_v59 }
 0x1c7   : > { %v1634_v2 = vpop.f32.mrb[29].mxu0  ;;  %v2371_v25 = vpack.c.bf16 %v1710_v12, %v1710_v12  ;;  %v2376_v6 = vpack.c.bf16 %v1715_v11, %v1715_v11  ;;  %v1713_v18 = vadd.f32 %v2696_v9, %v3404_v7  ;;  %v2053_v39 = vsel %vm705_vm7, %v2004_v52, 0.0 }
 0x1c8   : > { %v2658_v48 = vpop.f32.mrb[30].mxu0  ;;  %v1951_v27 = vadd.f32 %v1950_v54, %v1949_v21  ;;  %v2052_v36 = vadd.f32 %v2051_v22, %v2050_v50  ;;  %v2055_v26 = vsel %vm705_vm7, %v2005_v43, 0.0  ;;  %v1958_v28 = vsel %vm705_vm7, %v1904_v30, 0.0 }
 0x1c9   : > { %v1637_v53 = vpop.f32.mrb[31].mxu0  ;;  %1871 = vst.msk [vmem:[%s3412_s27 + $0x54] sm:$0xf] %vm1849_vm9, %v2371_v25  ;;  %v1902_v38 = vunpack.c.l.bf16 %v1731_v37  ;;  %v1903_v42 = vunpack.c.h.bf16 %v1731_v37  ;;  %1876 = vst.msk [vmem:[%s3412_s27 + $0x68] sm:$0xf] %vm1849_vm9, %v2376_v6  ;;  %v2374_v44 = vpack.c.bf16 %v1713_v18, %v1713_v18  ;;  %v2697_v59 = vadd.f32 %v2654_v41, %v2610_v62 }
 0x1ca   : > { %v2613_v20 = vpop.f32.mrb[28].mxu1  ;;  %v2054_v46 = vadd.f32 %v2053_v39, %v2052_v36  ;;  %v1953_v29 = vadd.f32 %v1952_v13, %v1951_v27  ;;  %v2008_v10 = vmul.f32 %v1904_v30, %v1904_v30  ;;  %v2009_v3 = vmul.f32 %v1905_v33, %v1905_v33 }
 0x1cb   : > { %v1372_v17 = vpop.f32.mrb[29].mxu1  ;;  %v1954_v47 = vsel %vm705_vm7, %v1902_v38, 0.0  ;;  %v1956_v19 = vsel %vm705_vm7, %v1903_v42, 0.0  ;;  %v2006_v58 = vmul.f32 %v1902_v38, %v1902_v38  ;;  %v2007_v35 = vmul.f32 %v1903_v42, %v1903_v42  ;;  %1874 = vst.msk [vmem:[%s3412_s27 + $0x60] sm:$0xf] %vm1849_vm9, %v2374_v44 }
 0x1cc   : > { %v2614_v60 = vpop.f32.mrb[30].mxu1  ;;  %v1955_v5 = vadd.f32 %v1954_v47, %v1953_v29  ;;  %v2056_v32 = vadd.f32 %v2055_v26, %v2054_v46  ;;  %v1716_v54 = vadd.f32 %v2697_v59, %v3404_v7  ;;  %v2698_v56 = vadd.f32 %v3516_v45, %v1359_v51 }
 0x1cd   : > { %v1375_v49 = vpop.f32.mrb[31].mxu1  ;;  %v2699_v41 = vadd.f32 %v2657_v1, %v2613_v20  ;;  %v2700_v4 = vadd.f32 %v1634_v2, %v1372_v17  ;;  %v2057_v31 = vsel %vm705_vm7, %v2006_v58, 0.0  ;;  %v2059_v40 = vsel %vm705_vm7, %v2007_v35, 0.0 }
 0x1ce   : > { %v1957_v23 = vadd.f32 %v1956_v19, %v1955_v5  ;;  %v2701_v52 = vadd.f32 %v2658_v48, %v2614_v60  ;;  %v2058_v43 = vadd.f32 %v2057_v31, %v2056_v32  ;;  %v1734_v55 = vpack.c.bf16 %v1716_v54, %v1715_v11 }
 0x1cf   : > { %v2377_v16 = vpack.c.bf16 %v1716_v54, %v1716_v54  ;;  %v1714_v24 = vadd.f32 %v2698_v56, %v3404_v7  ;;  %v1719_v34 = vadd.f32 %v2699_v41, %v3404_v7  ;;  %v1717_v45 = vadd.f32 %v2700_v4, %v3404_v7 }
 0x1d0   : > { %v1959_v8 = vadd.f32 %v1958_v28, %v1957_v23  ;;  %v1720_v14 = vadd.f32 %v2701_v52, %v3404_v7  ;;  %v1960_v63 = vsel %vm705_vm7, %v1905_v33, 0.0  ;;  %v2061_v62 = vsel %vm705_vm7, %v2008_v10, 0.0 }
 0x1d1   : > { %v2060_v15 = vadd.f32 %v2059_v40, %v2058_v43  ;;  %1877 = vst.msk [vmem:[%s3412_s27 + $0x6c] sm:$0xf] %vm1849_vm9, %v2377_v16  ;;  %v1733_v57 = vpack.c.bf16 %v1714_v24, %v1713_v18  ;;  %v2375_v0 = vpack.c.bf16 %v1714_v24, %v1714_v24  ;;  %v2380_v51 = vpack.c.bf16 %v1719_v34, %v1719_v34 }
 0x1d2   : > { %v1961_v12 = vadd.f32 %v1960_v63, %v1959_v8  ;;  %v2378_v61 = vpack.c.bf16 %v1717_v45, %v1717_v45  ;;  %v2063_v22 = vsel %vm705_vm7, %v2009_v3, 0.0  ;;  %v1908_v9 = vunpack.c.l.bf16 %v1734_v55 }
 0x1d3   : > { %v2062_v11 = vadd.f32 %v2061_v62, %v2060_v15  ;;  %1875 = vst.msk [vmem:[%s3412_s27 + $0x64] sm:$0xf] %vm1849_vm9, %v2375_v0  ;;  %v1906_v1 = vunpack.c.l.bf16 %v1733_v57  ;;  %v1907_v21 = vunpack.c.h.bf16 %v1733_v57  ;;  %1880 = vst.msk [vmem:[%s3412_s27 + $0x78] sm:$0xf] %vm1849_vm9, %v2380_v51  ;;  %v1736_v50 = vpack.c.bf16 %v1720_v14, %v1719_v34 }
 0x1d4   : > { %1878 = vst.msk [vmem:[%s3412_s27 + $0x70] sm:$0xf] %vm1849_vm9, %v2378_v61  ;;  %v1909_v30 = vunpack.c.h.bf16 %v1734_v55  ;;  %v2381_v2 = vpack.c.bf16 %v1720_v14, %v1720_v14  ;;  %v2702_v37 = vadd.f32 %v1637_v53, %v1375_v49  ;;  %v2012_v13 = vmul.f32 %v1908_v9, %v1908_v9 }
 0x1d5   : > { %v2064_v33 = vadd.f32 %v2063_v22, %v2062_v11  ;;  %v1962_v25 = vsel %vm705_vm7, %v1906_v1, 0.0  ;;  %v2010_v6 = vmul.f32 %v1906_v1, %v1906_v1  ;;  %v2011_v48 = vmul.f32 %v1907_v21, %v1907_v21 }
 0x1d6   : > { %v1963_v18 = vadd.f32 %v1962_v25, %v1961_v12  ;;  %1881 = vst.msk [vmem:[%s3412_s27 + $0x7c] sm:$0xf] %vm1849_vm9, %v2381_v2  ;;  %v1964_v39 = vsel %vm705_vm7, %v1907_v21, 0.0  ;;  %v1718_v36 = vadd.f32 %v2702_v37, %v3404_v7  ;;  %v2013_v26 = vmul.f32 %v1909_v30, %v1909_v30 }
 0x1d7   : > { %v2065_v27 = vsel %vm705_vm7, %v2010_v6, 0.0  ;;  %v1966_v53 = vsel %vm705_vm7, %v1908_v9, 0.0  ;;  %v2067_v42 = vsel %vm705_vm7, %v2011_v48, 0.0  ;;  %v1968_v46 = vsel %vm705_vm7, %v1909_v30, 0.0 }
 0x1d8   : > { %v1965_v28 = vadd.f32 %v1964_v39, %v1963_v18  ;;  %v2066_v38 = vadd.f32 %v2065_v27, %v2064_v33  ;;  %v1735_v20 = vpack.c.bf16 %v1718_v36, %v1717_v45  ;;  %v2379_v59 = vpack.c.bf16 %v1718_v36, %v1718_v36 }
 0x1d9   : > { %v2069_v17 = vsel %vm705_vm7, %v2012_v13, 0.0  ;;  %v1912_v10 = vunpack.c.l.bf16 %v1736_v50  ;;  %v2071_v7 = vsel %vm705_vm7, %v2013_v26, 0.0  ;;  %v1913_v5 = vunpack.c.h.bf16 %v1736_v50 }
 0x1da   : > { %v1967_v29 = vadd.f32 %v1966_v53, %v1965_v28  ;;  %v2068_v44 = vadd.f32 %v2067_v42, %v2066_v38  ;;  %v1910_v3 = vunpack.c.l.bf16 %v1735_v20  ;;  %v1911_v47 = vunpack.c.h.bf16 %v1735_v20  ;;  %1879 = vst.msk [vmem:[%s3412_s27 + $0x74] sm:$0xf] %vm1849_vm9, %v2379_v59 }
 0x1db   : > { %v2016_v56 = vmul.f32 %v1912_v10, %v1912_v10  ;;  %v1974_v40 = vsel %vm705_vm7, %v1912_v10, 0.0  ;;  %v2017_v52 = vmul.f32 %v1913_v5, %v1913_v5  ;;  %v1976_v24 = vsel %vm705_vm7, %v1913_v5, 0.0 }
 0x1dc   : > { %v2070_v19 = vadd.f32 %v2069_v17, %v2068_v44  ;;  %v1969_v60 = vadd.f32 %v1968_v46, %v1967_v29  ;;  %v1970_v58 = vsel %vm705_vm7, %v1910_v3, 0.0  ;;  %v2014_v35 = vmul.f32 %v1910_v3, %v1910_v3 }
 0x1dd   : > { %v2015_v32 = vmul.f32 %v1911_v47, %v1911_v47  ;;  %v1972_v41 = vsel %vm705_vm7, %v1911_v47, 0.0  ;;  %v2077_v8 = vsel %vm705_vm7, %v2016_v56, 0.0  ;;  %v2079_v14 = vsel %vm705_vm7, %v2017_v52, 0.0 }
 0x1de   : > { %v1971_v49 = vadd.f32 %v1970_v58, %v1969_v60  ;;  %v2072_v54 = vadd.f32 %v2071_v7, %v2070_v19  ;;  %v2073_v4 = vsel %vm705_vm7, %v2014_v35, 0.0 }
 0x1df   : > { %v2075_v43 = vsel %vm705_vm7, %v2015_v32, 0.0 }
 0x1e0   : > { %v1973_v23 = vadd.f32 %v1972_v41, %v1971_v49  ;;  %v2074_v31 = vadd.f32 %v2073_v4, %v2072_v54 }
 0x1e2   : > { %v1975_v55 = vadd.f32 %v1974_v40, %v1973_v23  ;;  %v2076_v16 = vadd.f32 %v2075_v43, %v2074_v31 }
 0x1e4   : > { %v1977_v34 = vadd.f32 %v1976_v24, %v1975_v55  ;;  %v2078_v45 = vadd.f32 %v2077_v8, %v2076_v16 }
 0x1e6   : > { %v1978_v63 = vrot.slane %v1977_v34, 4  ;;  %v2080_v62 = vadd.f32 %v2079_v14, %v2078_v45 }
 0x1e8   : > { %v1979_v15 = vadd.f32 %v1978_v63, %v1977_v34  ;;  %v2081_v57 = vrot.slane %v2080_v62, 4 }
 0x1ea   : > { %v1980_v0 = vrot.slane %v1979_v15, 2  ;;  %v2082_v12 = vadd.f32 %v2081_v57, %v2080_v62 }
 0x1ec   : > { %v1981_v51 = vadd.f32 %v1980_v0, %v1979_v15  ;;  %v2083_v61 = vrot.slane %v2082_v12, 2 }
 0x1ee   : > { %v1982_v22 = vrot.slane %v1981_v51, 1  ;;  %v2084_v11 = vadd.f32 %v2083_v61, %v2082_v12 }
 0x1f0   : > { %v1983_v9 = vadd.f32 %v1982_v22, %v1981_v51  ;;  %v2085_v1 = vrot.slane %v2084_v11, 1 }
 0x1f2   : > { %1985 = vst.msk [vmem:[%s271_s30] sm:$0x1] %vm1984_vm10, %v1983_v9  ;;  %v2086_v21 = vadd.f32 %v2085_v1, %v2084_v11 }
 0x1f4   : > { %2087 = vst.msk [vmem:[%s277_s9] sm:$0x1] %vm1984_vm10, %v2086_v21 }
 0x1f5 PF: > { %s16_s20 = sadd.s32 1, %s2802_s20   ;;  %s3611_s18 = smov %s2798_s19 }
 0x1f6   : > { %p13_p5 = scmp.ge.s32.totalorder %s16_s20, 4   ;;  %s3612_s19 = smov %s3614_s21 }
 0x1f8   :  { %15 = sbr.rel (!%p13_p5) target bundleno = 2 (0x2), region = 96 }

</bundles_post_ra>
